<compile_context>
chip_gen: v6e
topology: v6e:2x2x1
jax: 0.10.0
libtpu: 0.0.40
codegen_flags: <defaults>
</compile_context>

<pallas_src>
import functools

import jax
import jax.numpy as jnp
import numpy as np
from jax import lax
from jax.experimental import pallas as pl
from jax.experimental.pallas import tpu as pltpu

_EPS = 1e-5
_NEG = float(jnp.finfo(jnp.float32).min)


def _plan_blocks(n, h, w, hp, wp, ho, wo, c, padding,
                 budget_bytes=24 * 1024 * 1024):
    """Channel block size + scoped-VMEM limit (double-buffered in/out + halo)."""

    def usage(cb):
        in_blk = n * h * w * cb * 4
        out_blk = n * ho * wo * cb * 4
        pad_blk = n * hp * wp * cb * 4 if padding > 0 else 0
        return 2 * in_blk + 2 * out_blk + pad_blk   # BlockSpec double-buffers I/O

    if c % 128 != 0:
        cblk = c            # small / irregular C: one block covers all channels
    else:
        cblk = 128
        while c % (cblk * 2) == 0 and usage(cblk * 2) <= budget_bytes:
            cblk *= 2

    vmem_bytes = min(60 << 20, max(32 << 20, usage(cblk) + (4 << 20)))
    return cblk, vmem_bytes


def _pool_bn_kernel(x_ref, cinv_ref, gamma_ref, beta_ref, out_ref, *scratch,
                    pool_type, kernel_size, stride, padding, h, w, ho, wo, eps):
    n = x_ref.shape[0]
    cblk = x_ref.shape[3]
    pad_val = 0.0 if pool_type == "avg" else _NEG
    combine = jnp.maximum if pool_type == "max" else jnp.add

    if padding > 0:
        # Build the halo in VMEM scratch (no extra HBM traffic): tiny border
        # strips get the pool identity value, the real block fills the interior.
        xpad_ref = scratch[0]
        hp, wp = h + 2 * padding, w + 2 * padding
        xpad_ref[:, :padding, :, :] = jnp.full(
            (n, padding, wp, cblk), pad_val, jnp.float32)
        xpad_ref[:, padding + h:, :, :] = jnp.full(
            (n, padding, wp, cblk), pad_val, jnp.float32)
        xpad_ref[:, padding:padding + h, :padding, :] = jnp.full(
            (n, h, padding, cblk), pad_val, jnp.float32)
        xpad_ref[:, padding:padding + h, padding + w:, :] = jnp.full(
            (n, h, padding, cblk), pad_val, jnp.float32)
        xpad_ref[:, padding:padding + h, padding:padding + w, :] = (
            x_ref[...].astype(jnp.float32))
        src = xpad_ref
    else:
        hp, wp = h, w
        src = x_ref

    # Separable pooling.  Pass 1: K taps along H (dim 1 is untiled, so each tap
    # is a cheap static-offset read straight from the ref).
    rows = None
    for dy in range(kernel_size):
        if stride == 1:
            tap = src[:, dy:dy + ho, :, :].astype(jnp.float32)
        else:
            tap = src[:, pl.ds(dy, ho, stride), :, :].astype(jnp.float32)
        rows = tap if rows is None else combine(rows, tap)

    # Pass 2: K taps along W (sublane axis), done second so it operates on the
    # already-H-reduced intermediate.
    acc = None
    for dx in range(kernel_size):
        tap = lax.slice(rows, (0, 0, dx, 0),
                        (n, ho, dx + (wo - 1) * stride + 1, cblk),
                        (1, 1, stride, 1))
        acc = tap if acc is None else combine(acc, tap)

    if pool_type == "avg":
        # Precomputed reciprocal divisor map (count_include_pad=False):
        # a single VPU multiply, broadcast over N and the lane (channel) axis.
        pooled = acc * cinv_ref[...]
    else:
        pooled = acc

    # BatchNorm2d training-mode forward: per-channel (per-lane) batch mean and
    # biased variance over (N, Ho, Wo).
    inv_cnt = 1.0 / float(n * ho * wo)
    mean = jnp.sum(pooled, axis=(0, 1, 2), keepdims=True) * inv_cnt
    centered = pooled - mean
    var = jnp.sum(centered * centered, axis=(0, 1, 2), keepdims=True) * inv_cnt
    scale = lax.rsqrt(var + eps) * gamma_ref[...]
    out_ref[...] = (centered * scale + beta_ref[...]).astype(out_ref.dtype)
    # TODO(synk): running_mean/running_var updates and BNWider (`wider`) are
    # stateful PyTorch bookkeeping, not part of the forward output.


def pool_bn(x, gamma, beta, *, pool_type="avg", kernel_size=3, stride=1,
            padding=1, eps=_EPS):
    """PoolBN forward. x: (N, C, H, W) float32. Returns (N, C, Ho, Wo)."""
    n, c, h, w = x.shape
    ho = (h + 2 * padding - kernel_size) // stride + 1
    wo = (w + 2 * padding - kernel_size) // stride + 1
    hp, wp = h + 2 * padding, w + 2 * padding

    # Channels-last so C is on the lane axis (layout plumbing only).
    x_nhwc = jnp.transpose(x, (0, 2, 3, 1)).astype(jnp.float32)

    cblk, vmem_bytes = _plan_blocks(n, h, w, hp, wp, ho, wo, c, padding)
    grid = (c // cblk,)

    # Reciprocal divisor map for AvgPool2d(count_include_pad=False), computed
    # once outside the kernel (separable in h/w).  Constant index_map => the
    # pipeline fetches it only once.
    ih = jnp.arange(ho) * stride - padding
    iw = jnp.arange(wo) * stride - padding
    cnt_h = jnp.minimum(ih + kernel_size, h) - jnp.maximum(ih, 0)
    cnt_w = jnp.minimum(iw + kernel_size, w) - jnp.maximum(iw, 0)
    cinv = (1.0 / (cnt_h[:, None] * cnt_w[None, :]).astype(jnp.float32))
    cinv = cinv.reshape(1, ho, wo, 1)

    gamma4 = gamma.astype(jnp.float32).reshape(1, 1, 1, c)
    beta4 = beta.astype(jnp.float32).reshape(1, 1, 1, c)

    kernel = functools.partial(
        _pool_bn_kernel, pool_type=pool_type, kernel_size=kernel_size,
        stride=stride, padding=padding, h=h, w=w, ho=ho, wo=wo, eps=eps)

    scratch_shapes = []
    if padding > 0:
        scratch_shapes.append(pltpu.VMEM((n, hp, wp, cblk), jnp.float32))

    flops = n * c * ((kernel_size - 1) * (ho * wp + ho * wo) + 8 * ho * wo)
    bytes_accessed = 4 * (n * h * w * c + n * ho * wo * c + 2 * c + ho * wo)
    cost = pl.CostEstimate(flops=int(flops), transcendentals=int(c),
                           bytes_accessed=int(bytes_accessed))

    out_nhwc = pl.pallas_call(
        kernel,
        out_shape=jax.ShapeDtypeStruct((n, ho, wo, c), jnp.float32),
        grid=grid,
        in_specs=[
            pl.BlockSpec((n, h, w, cblk), lambda ci: (0, 0, 0, ci)),
            pl.BlockSpec((1, ho, wo, 1), lambda ci: (0, 0, 0, 0)),
            pl.BlockSpec((1, 1, 1, cblk), lambda ci: (0, 0, 0, ci)),
            pl.BlockSpec((1, 1, 1, cblk), lambda ci: (0, 0, 0, ci)),
        ],
        out_specs=pl.BlockSpec((n, ho, wo, cblk), lambda ci: (0, 0, 0, ci)),
        scratch_shapes=scratch_shapes,
        compiler_params=pltpu.CompilerParams(
            dimension_semantics=("parallel",),
            vmem_limit_bytes=int(vmem_bytes)),
        cost_estimate=cost,
    )(x_nhwc, cinv, gamma4, beta4)

    return jnp.transpose(out_nhwc, (0, 3, 1, 2))


def _reference(x, gamma, beta, *, pool_type, kernel_size, stride, padding,
               eps=_EPS):
    """Pure-JAX reference (lax.reduce_window + explicit BN), NCHW."""
    n, c, h, w = x.shape
    ho = (h + 2 * padding - kernel_size) // stride + 1
    wo = (w + 2 * padding - kernel_size) // stride + 1
    window = (1, 1, kernel_size, kernel_size)
    strides = (1, 1, stride, stride)
    pads = [(0, 0), (0, 0), (padding, padding), (padding, padding)]
    if pool_type == "avg":
        sums = lax.reduce_window(x, 0.0, lax.add, window, strides, pads)
        ih = jnp.arange(ho) * stride - padding
        iw = jnp.arange(wo) * stride - padding
        cnt_h = jnp.minimum(ih + kernel_size, h) - jnp.maximum(ih, 0)
        cnt_w = jnp.minimum(iw + kernel_size, w) - jnp.maximum(iw, 0)
        counts = (cnt_h[:, None] * cnt_w[None, :]).astype(jnp.float32)
        pooled = sums / counts[None, None]
    else:
        pooled = lax.reduce_window(x, _NEG, lax.max, window, strides, pads)
    mean = jnp.mean(pooled, axis=(0, 2, 3), keepdims=True)
    var = jnp.mean((pooled - mean) ** 2, axis=(0, 2, 3), keepdims=True)
    y = (pooled - mean) * lax.rsqrt(var + eps)
    return y * gamma[None, :, None, None] + beta[None, :, None, None]


if __name__ == "__main__":
    key = jax.random.PRNGKey(0)
    N, C, H, W = 2, 4, 16, 16
    x = jax.random.normal(key, (N, C, H, W), dtype=jnp.float32)

    # Deterministic affine params (BatchNorm2d(C, affine=True)).
    gamma = 1.0 + 0.1 * jnp.arange(C, dtype=jnp.float32)
    beta = 0.05 * jnp.arange(C, dtype=jnp.float32)

    for pool_type in ("avg", "max"):
        out = pool_bn(x, gamma, beta, pool_type=pool_type,
                      kernel_size=3, stride=1, padding=1)
        out = jax.block_until_ready(out)
        ref = _reference(x, gamma, beta, pool_type=pool_type,
                         kernel_size=3, stride=1, padding=1)
        np.testing.assert_allclose(np.asarray(out), np.asarray(ref),
                                   rtol=1e-4, atol=1e-4)

    print("KERNEL_OK")
</pallas_src>

<mosaic_0001>
module attributes {stable_mosaic.version = 11 : i64} {
  func.func @_pool_bn_kernel(%arg0: i32, %arg1: memref<2x16x16x4xf32, #tpu.memory_space<vmem>>, %arg2: memref<1x16x16x1xf32, #tpu.memory_space<vmem>>, %arg3: memref<1x1x1x4xf32, #tpu.memory_space<vmem>>, %arg4: memref<1x1x1x4xf32, #tpu.memory_space<vmem>>, %arg5: memref<2x16x16x4xf32, #tpu.memory_space<vmem>>, %arg6: memref<2x18x18x4xf32, #tpu.memory_space<vmem>>) attributes {dimension_semantics = [#tpu.dimension_semantics<parallel>], iteration_bounds = array<i64: 1>, scalar_prefetch = 0 : i64, scratch_operands = 1 : i64, tpu.core_type = #tpu.core_type<tc>, window_params = [{transform_indices = @transform_0, window_bounds = array<i64: 2, 16, 16, 4>}, {pipeline_mode = #tpu.pipeline_mode<synchronous>, transform_indices = @transform_1, window_bounds = array<i64: 1, 16, 16, 1>}, {transform_indices = @transform_2, window_bounds = array<i64: 1, 1, 1, 4>}, {transform_indices = @transform_3, window_bounds = array<i64: 1, 1, 1, 4>}, {transform_indices = @transform_4, window_bounds = array<i64: 2, 16, 16, 4>}]} {
    %cst = arith.constant 0.000000e+00 : f32
    %0 = vector.broadcast %cst : f32 to vector<2x1x18x4xf32>
    %c0 = arith.constant 0 : index
    %c0_0 = arith.constant 0 : index
    %c0_1 = arith.constant 0 : index
    %c0_2 = arith.constant 0 : index
    %1 = vector.load %arg6[%c0, %c0_0, %c0_1, %c0_2] : memref<2x18x18x4xf32, #tpu.memory_space<vmem>>, vector<2x1x18x4xf32>
    tpu.vector_store %arg6[%c0, %c0_0, %c0_1, %c0_2], %0 {strides = array<i32>} : memref<2x18x18x4xf32, #tpu.memory_space<vmem>>, vector<2x1x18x4xf32>,
    %cst_3 = arith.constant 0.000000e+00 : f32
    %2 = vector.broadcast %cst_3 : f32 to vector<2x1x18x4xf32>
    %c0_4 = arith.constant 0 : index
    %c17 = arith.constant 17 : index
    %c0_5 = arith.constant 0 : index
    %c0_6 = arith.constant 0 : index
    %3 = vector.load %arg6[%c0_4, %c17, %c0_5, %c0_6] : memref<2x18x18x4xf32, #tpu.memory_space<vmem>>, vector<2x1x18x4xf32>
    tpu.vector_store %arg6[%c0_4, %c17, %c0_5, %c0_6], %2 {strides = array<i32>} : memref<2x18x18x4xf32, #tpu.memory_space<vmem>>, vector<2x1x18x4xf32>,
    %cst_7 = arith.constant 0.000000e+00 : f32
    %4 = vector.broadcast %cst_7 : f32 to vector<2x16x1x4xf32>
    %c0_8 = arith.constant 0 : index
    %c1 = arith.constant 1 : index
    %c0_9 = arith.constant 0 : index
    %c0_10 = arith.constant 0 : index
    %5 = vector.load %arg6[%c0_8, %c1, %c0_9, %c0_10] : memref<2x18x18x4xf32, #tpu.memory_space<vmem>>, vector<2x16x1x4xf32>
    tpu.vector_store %arg6[%c0_8, %c1, %c0_9, %c0_10], %4 {strides = array<i32>} : memref<2x18x18x4xf32, #tpu.memory_space<vmem>>, vector<2x16x1x4xf32>,
    %cst_11 = arith.constant 0.000000e+00 : f32
    %6 = vector.broadcast %cst_11 : f32 to vector<2x16x1x4xf32>
    %c0_12 = arith.constant 0 : index
    %c1_13 = arith.constant 1 : index
    %c17_14 = arith.constant 17 : index
    %c0_15 = arith.constant 0 : index
    %7 = vector.load %arg6[%c0_12, %c1_13, %c17_14, %c0_15] : memref<2x18x18x4xf32, #tpu.memory_space<vmem>>, vector<2x16x1x4xf32>
    tpu.vector_store %arg6[%c0_12, %c1_13, %c17_14, %c0_15], %6 {strides = array<i32>} : memref<2x18x18x4xf32, #tpu.memory_space<vmem>>, vector<2x16x1x4xf32>,
    %c0_16 = arith.constant 0 : index
    %c0_17 = arith.constant 0 : index
    %c0_18 = arith.constant 0 : index
    %c0_19 = arith.constant 0 : index
    %8 = vector.load %arg1[%c0_16, %c0_17, %c0_18, %c0_19] : memref<2x16x16x4xf32, #tpu.memory_space<vmem>>, vector<2x16x16x4xf32>
    %c0_20 = arith.constant 0 : index
    %c1_21 = arith.constant 1 : index
    %c1_22 = arith.constant 1 : index
    %c0_23 = arith.constant 0 : index
    %9 = vector.load %arg6[%c0_20, %c1_21, %c1_22, %c0_23] : memref<2x18x18x4xf32, #tpu.memory_space<vmem>>, vector<2x16x16x4xf32>
    tpu.vector_store %arg6[%c0_20, %c1_21, %c1_22, %c0_23], %8 {strides = array<i32>} : memref<2x18x18x4xf32, #tpu.memory_space<vmem>>, vector<2x16x16x4xf32>,
    %c0_24 = arith.constant 0 : index
    %c0_25 = arith.constant 0 : index
    %c0_26 = arith.constant 0 : index
    %c0_27 = arith.constant 0 : index
    %10 = vector.load %arg6[%c0_24, %c0_25, %c0_26, %c0_27] : memref<2x18x18x4xf32, #tpu.memory_space<vmem>>, vector<2x16x18x4xf32>
    %c0_28 = arith.constant 0 : index
    %c1_29 = arith.constant 1 : index
    %c0_30 = arith.constant 0 : index
    %c0_31 = arith.constant 0 : index
    %11 = vector.load %arg6[%c0_28, %c1_29, %c0_30, %c0_31] : memref<2x18x18x4xf32, #tpu.memory_space<vmem>>, vector<2x16x18x4xf32>
    %12 = arith.addf %10, %11 : vector<2x16x18x4xf32>
    %c0_32 = arith.constant 0 : index
    %c2 = arith.constant 2 : index
    %c0_33 = arith.constant 0 : index
    %c0_34 = arith.constant 0 : index
    %13 = vector.load %arg6[%c0_32, %c2, %c0_33, %c0_34] : memref<2x18x18x4xf32, #tpu.memory_space<vmem>>, vector<2x16x18x4xf32>
    %14 = arith.addf %12, %13 : vector<2x16x18x4xf32>
    %15 = vector.extract_strided_slice %14 {offsets = [0, 0, 0, 0], sizes = [2, 16, 16, 4], strides = [1, 1, 1, 1]} : vector<2x16x18x4xf32> to vector<2x16x16x4xf32>
    %16 = vector.extract_strided_slice %14 {offsets = [0, 0, 1, 0], sizes = [2, 16, 16, 4], strides = [1, 1, 1, 1]} : vector<2x16x18x4xf32> to vector<2x16x16x4xf32>
    %17 = arith.addf %15, %16 : vector<2x16x16x4xf32>
    %18 = vector.extract_strided_slice %14 {offsets = [0, 0, 2, 0], sizes = [2, 16, 16, 4], strides = [1, 1, 1, 1]} : vector<2x16x18x4xf32> to vector<2x16x16x4xf32>
    %19 = arith.addf %17, %18 : vector<2x16x16x4xf32>
    %c0_35 = arith.constant 0 : index
    %c0_36 = arith.constant 0 : index
    %c0_37 = arith.constant 0 : index
    %c0_38 = arith.constant 0 : index
    %20 = vector.load %arg2[%c0_35, %c0_36, %c0_37, %c0_38] : memref<1x16x16x1xf32, #tpu.memory_space<vmem>>, vector<1x16x16x1xf32>
    %21 = vector.broadcast %20 : vector<1x16x16x1xf32> to vector<2x16x16x4xf32>
    %22 = arith.mulf %19, %21 : vector<2x16x16x4xf32>
    %cst_39 = arith.constant dense<0.000000e+00> : vector<4xf32>
    %23 = vector.multi_reduction <add>, %22, %cst_39 [0, 1, 2] : vector<2x16x16x4xf32> to vector<4xf32>
    %24 = vector.shape_cast %23 : vector<4xf32> to vector<1x1x1x4xf32>
    %cst_40 = arith.constant 0.001953125 : f32
    %25 = vector.broadcast %cst_40 : f32 to vector<1x1x1x4xf32>
    %26 = arith.mulf %24, %25 : vector<1x1x1x4xf32>
    %27 = vector.broadcast %26 : vector<1x1x1x4xf32> to vector<2x16x16x4xf32>
    %28 = arith.subf %22, %27 : vector<2x16x16x4xf32>
    %29 = arith.mulf %28, %28 : vector<2x16x16x4xf32>
    %cst_41 = arith.constant dense<0.000000e+00> : vector<4xf32>
    %30 = vector.multi_reduction <add>, %29, %cst_41 [0, 1, 2] : vector<2x16x16x4xf32> to vector<4xf32>
    %31 = vector.shape_cast %30 : vector<4xf32> to vector<1x1x1x4xf32>
    %cst_42 = arith.constant 0.001953125 : f32
    %32 = vector.broadcast %cst_42 : f32 to vector<1x1x1x4xf32>
    %33 = arith.mulf %31, %32 : vector<1x1x1x4xf32>
    %cst_43 = arith.constant 9.99999974E-6 : f32
    %34 = vector.broadcast %cst_43 : f32 to vector<1x1x1x4xf32>
    %35 = arith.addf %33, %34 : vector<1x1x1x4xf32>
    %36 = math.rsqrt %35 : vector<1x1x1x4xf32>
    %c0_44 = arith.constant 0 : index
    %c0_45 = arith.constant 0 : index
    %c0_46 = arith.constant 0 : index
    %c0_47 = arith.constant 0 : index
    %37 = vector.load %arg3[%c0_44, %c0_45, %c0_46, %c0_47] : memref<1x1x1x4xf32, #tpu.memory_space<vmem>>, vector<1x1x1x4xf32>
    %38 = arith.mulf %36, %37 : vector<1x1x1x4xf32>
    %39 = vector.broadcast %38 : vector<1x1x1x4xf32> to vector<2x16x16x4xf32>
    %40 = arith.mulf %28, %39 : vector<2x16x16x4xf32>
    %c0_48 = arith.constant 0 : index
    %c0_49 = arith.constant 0 : index
    %c0_50 = arith.constant 0 : index
    %c0_51 = arith.constant 0 : index
    %41 = vector.load %arg4[%c0_48, %c0_49, %c0_50, %c0_51] : memref<1x1x1x4xf32, #tpu.memory_space<vmem>>, vector<1x1x1x4xf32>
    %42 = vector.broadcast %41 : vector<1x1x1x4xf32> to vector<2x16x16x4xf32>
    %43 = arith.addf %40, %42 : vector<2x16x16x4xf32>
    %c0_52 = arith.constant 0 : index
    %c0_53 = arith.constant 0 : index
    %c0_54 = arith.constant 0 : index
    %c0_55 = arith.constant 0 : index
    %44 = vector.load %arg5[%c0_52, %c0_53, %c0_54, %c0_55] : memref<2x16x16x4xf32, #tpu.memory_space<vmem>>, vector<2x16x16x4xf32>
    tpu.vector_store %arg5[%c0_52, %c0_53, %c0_54, %c0_55], %43 {strides = array<i32>} : memref<2x16x16x4xf32, #tpu.memory_space<vmem>>, vector<2x16x16x4xf32>,
    return
  }
  func.func @transform_0(%arg0: i32) -> (i32, i32, i32, i32) {
    %c0_i32 = arith.constant 0 : i32
    %c0_i32_0 = arith.constant 0 : i32
    %c0_i32_1 = arith.constant 0 : i32
    %c0_i32_2 = arith.constant 0 : i32
    return %c0_i32, %c0_i32_0, %c0_i32_1, %arg0 : i32, i32, i32, i32
  }
  func.func @transform_1(%arg0: i32) -> (i32, i32, i32, i32) {
    %c0_i32 = arith.constant 0 : i32
    %c0_i32_0 = arith.constant 0 : i32
    %c0_i32_1 = arith.constant 0 : i32
    %c0_i32_2 = arith.constant 0 : i32
    %c0_i32_3 = arith.constant 0 : i32
    return %c0_i32, %c0_i32_0, %c0_i32_1, %c0_i32_2 : i32, i32, i32, i32
  }
  func.func @transform_2(%arg0: i32) -> (i32, i32, i32, i32) {
    %c0_i32 = arith.constant 0 : i32
    %c0_i32_0 = arith.constant 0 : i32
    %c0_i32_1 = arith.constant 0 : i32
    %c0_i32_2 = arith.constant 0 : i32
    return %c0_i32, %c0_i32_0, %c0_i32_1, %arg0 : i32, i32, i32, i32
  }
  func.func @transform_3(%arg0: i32) -> (i32, i32, i32, i32) {
    %c0_i32 = arith.constant 0 : i32
    %c0_i32_0 = arith.constant 0 : i32
    %c0_i32_1 = arith.constant 0 : i32
    %c0_i32_2 = arith.constant 0 : i32
    return %c0_i32, %c0_i32_0, %c0_i32_1, %arg0 : i32, i32, i32, i32
  }
  func.func @transform_4(%arg0: i32) -> (i32, i32, i32, i32) {
    %c0_i32 = arith.constant 0 : i32
    %c0_i32_0 = arith.constant 0 : i32
    %c0_i32_1 = arith.constant 0 : i32
    %c0_i32_2 = arith.constant 0 : i32
    return %c0_i32, %c0_i32_0, %c0_i32_1, %arg0 : i32, i32, i32, i32
  }
}

</mosaic_0001>

<bundles_post_ra>
// kernel: tpu_custom_call.1
= control target key start
LH: loop header
LB: loop body
LE: loop exit
PB: predicated region body
PF: predicated region fallthrough
CT: control target
= control target key end

     0   :  { %vm17_vm0 = vcmask 31744   ;;  %vm33_vm1 = vcmask 24576   ;;  %v2251_v0 = vmov 0   ;;  %v2252_v3 = vmov 0.0   ;;  %s5042_s1 = inlined_call_operand.vmem [shape: f32[1,16,16,1], index: 1, kind: input, shape index: {}]   ;;  %s5043_s0 = inlined_call_operand.vmem [shape: f32[2,16,16,4], index: 0, kind: input, shape index: {}]   ;;  %s5044_s2 = inlined_call_operand.vmem [shape: f32[1,1,1,4], index: 2, kind: input, shape index: {}]   ;;  %s5045_s3 = inlined_call_operand.vmem [shape: f32[1,1,1,4], index: 3, kind: input, shape index: {}]   ;;  %s5046_s4 = inlined_call_operand.vmem [shape: f32[2,16,16,4], index: 4, kind: output, shape index: {}]  }
   0x1   :  { %2248 = vset.pattern.permute.xlu1 %v2251_v0  ;;  %2247 = vset.pattern.permute.xlu0 %v2251_v0  ;;  %v2281_v1 = vld [vmem:[%s5042_s1 + $0x10] sm:$0xff]  ;;  %v2286_v2 = vld [vmem:[%s5042_s1] sm:$0xff]  ;;  %34 = vst.msk [vmem:[#allocation2 + $0x18] sm:$0x1] %vm33_vm1, %v2252_v3  ;;  %35 = vst.msk [vmem:[#allocation2 + $0x30] sm:$0x1] %vm33_vm1, %v2252_v3 }
   0x2   :  { %36 = vst.msk [vmem:[#allocation2 + $0x48] sm:$0x1] %vm33_vm1, %v2252_v3  ;;  %50 = vst.msk [vmem:[#allocation2 + $0x1c8] sm:$0x1] %vm33_vm1, %v2252_v3  ;;  %vm20_vm2 = vcmask 25600   ;;  %1425 = vperm.xlu1 %2248, %v2281_v1   ;;  %1415 = vperm.xlu0 %2247, %v2286_v2   ;;  %v1384_v4 = vld [vmem:[%s5042_s1 + $0x18] sm:$0xff] }
   0x3   :  { %51 = vst.msk [vmem:[#allocation2 + $0x1e0] sm:$0x1] %vm33_vm1, %v2252_v3  ;;  %52 = vst.msk [vmem:[#allocation2 + $0x1f8] sm:$0x1] %vm33_vm1, %v2252_v3  ;;  %v1382_v5 = vld [vmem:[%s5042_s1 + $0x8] sm:$0xff]  ;;  %v1385_v7 = vld [vmem:[%s5042_s1 + $0x20] sm:$0xff] }
   0x4   :  { %18 = vst.msk [vmem:[#allocation2] sm:$0xff] %vm17_vm0, %v2252_v3  ;;  %19 = vst.msk [vmem:[#allocation2 + $0x8] sm:$0xff] %vm17_vm0, %v2252_v3  ;;  %v1386_v6 = vld [vmem:[%s5042_s1 + $0x28] sm:$0xff]  ;;  %v1388_v8 = vld [vmem:[%s5042_s1 + $0x38] sm:$0xff]  ;;  %vm803_vm3 = vcmask 1046528   ;;  %vm1092_vm4 = vcmask 1045504  }
   0x5   :  { %22 = vst.msk [vmem:[#allocation2 + $0x1b0] sm:$0xff] %vm17_vm0, %v2252_v3  ;;  %23 = vst.msk [vmem:[#allocation2 + $0x1b8] sm:$0xff] %vm17_vm0, %v2252_v3  ;;  %v1387_v9 = vld [vmem:[%s5042_s1 + $0x30] sm:$0xff]  ;;  %v98_v10 = vld [vmem:[%s5043_s0] sm:$0xff] }
   0x6   :  { %26 = vst.msk [vmem:[#allocation2 + $0x198] sm:$0xff] %vm17_vm0, %v2252_v3  ;;  %27 = vst.msk [vmem:[#allocation2 + $0x1a0] sm:$0xff] %vm17_vm0, %v2252_v3  ;;  %1430 = vperm.xlu1 %2248, %v1384_v4   ;;  %1420 = vperm.xlu0 %2247, %v1382_v5   ;;  %v99_v11 = vld [vmem:[%s5043_s0 + $0x8] sm:$0xff]  ;;  %v100_v12 = vld [vmem:[%s5043_s0 + $0x10] sm:$0xff] }
   0x7   :  { %29 = vst.msk [vmem:[#allocation2 + $0x348] sm:$0xff] %vm17_vm0, %v2252_v3  ;;  %30 = vst.msk [vmem:[#allocation2 + $0x350] sm:$0xff] %vm17_vm0, %v2252_v3  ;;  %v101_v13 = vld [vmem:[%s5043_s0 + $0x18] sm:$0xff]  ;;  %v1390_v14 = vld [vmem:[%s5042_s1 + $0x48] sm:$0xff] }
   0x8   :  { %37 = vst.msk [vmem:[#allocation2 + $0x60] sm:$0x1] %vm33_vm1, %v2252_v3  ;;  %38 = vst.msk [vmem:[#allocation2 + $0x78] sm:$0x1] %vm33_vm1, %v2252_v3  ;;  %v102_v15 = vld [vmem:[%s5043_s0 + $0x20] sm:$0xff]  ;;  %v103_v16 = vld [vmem:[%s5043_s0 + $0x28] sm:$0xff] }
   0x9   :  { %39 = vst.msk [vmem:[#allocation2 + $0x90] sm:$0x1] %vm33_vm1, %v2252_v3  ;;  %40 = vst.msk [vmem:[#allocation2 + $0xa8] sm:$0x1] %vm33_vm1, %v2252_v3  ;;  %v130_v17 = vld [vmem:[%s5043_s0 + $0x100] sm:$0xff]  ;;  %v131_v18 = vld [vmem:[%s5043_s0 + $0x108] sm:$0xff] }
   0xa   :  { %41 = vst.msk [vmem:[#allocation2 + $0xc0] sm:$0x1] %vm33_vm1, %v2252_v3  ;;  %42 = vst.msk [vmem:[#allocation2 + $0xd8] sm:$0x1] %vm33_vm1, %v2252_v3  ;;  %1440 = vperm.xlu1 %2248, %v1386_v6   ;;  %1435 = vperm.xlu0 %2247, %v1385_v7   ;;  %v132_v19 = vld [vmem:[%s5043_s0 + $0x110] sm:$0xff]  ;;  %v133_v20 = vld [vmem:[%s5043_s0 + $0x118] sm:$0xff] }
   0xb   :  { %43 = vst.msk [vmem:[#allocation2 + $0xf0] sm:$0x1] %vm33_vm1, %v2252_v3  ;;  %44 = vst.msk [vmem:[#allocation2 + $0x108] sm:$0x1] %vm33_vm1, %v2252_v3  ;;  %v1389_v21 = vld [vmem:[%s5042_s1 + $0x40] sm:$0xff]  ;;  %v135_v23 = vld [vmem:[%s5043_s0 + $0x128] sm:$0xff] }
   0xc   :  { %45 = vst.msk [vmem:[#allocation2 + $0x120] sm:$0x1] %vm33_vm1, %v2252_v3  ;;  %46 = vst.msk [vmem:[#allocation2 + $0x138] sm:$0x1] %vm33_vm1, %v2252_v3  ;;  %v134_v22 = vld [vmem:[%s5043_s0 + $0x120] sm:$0xff]  ;;  %v1392_v24 = vld [vmem:[%s5042_s1 + $0x58] sm:$0xff] }
   0xd   :  { %47 = vst.msk [vmem:[#allocation2 + $0x150] sm:$0x1] %vm33_vm1, %v2252_v3  ;;  %48 = vst.msk [vmem:[#allocation2 + $0x168] sm:$0x1] %vm33_vm1, %v2252_v3  ;;  %v104_v25 = vld [vmem:[%s5043_s0 + $0x30] sm:$0xff]  ;;  %v105_v26 = vld [vmem:[%s5043_s0 + $0x38] sm:$0xff] }
   0xe   :  { %49 = vst.msk [vmem:[#allocation2 + $0x180] sm:$0x1] %vm33_vm1, %v2252_v3  ;;  %53 = vst.msk [vmem:[#allocation2 + $0x210] sm:$0x1] %vm33_vm1, %v2252_v3  ;;  %1450 = vperm.xlu1 %2248, %v1388_v8   ;;  %1445 = vperm.xlu0 %2247, %v1387_v9   ;;  %v136_v27 = vld [vmem:[%s5043_s0 + $0x130] sm:$0xff]  ;;  %v137_v28 = vld [vmem:[%s5043_s0 + $0x138] sm:$0xff] }
   0xf   :  { %54 = vst.msk [vmem:[#allocation2 + $0x228] sm:$0x1] %vm33_vm1, %v2252_v3  ;;  %55 = vst.msk [vmem:[#allocation2 + $0x240] sm:$0x1] %vm33_vm1, %v2252_v3  ;;  %v1391_v29 = vld [vmem:[%s5042_s1 + $0x50] sm:$0xff]  ;;  %v106_v30 = vld [vmem:[%s5043_s0 + $0x40] sm:$0xff] }
  0x10   :  { %56 = vst.msk [vmem:[#allocation2 + $0x258] sm:$0x1] %vm33_vm1, %v2252_v3  ;;  %57 = vst.msk [vmem:[#allocation2 + $0x270] sm:$0x1] %vm33_vm1, %v2252_v3  ;;  %v107_v31 = vld [vmem:[%s5043_s0 + $0x48] sm:$0xff]  ;;  %v1393_v33 = vld [vmem:[%s5042_s1 + $0x60] sm:$0xff] }
  0x11   :  { %58 = vst.msk [vmem:[#allocation2 + $0x288] sm:$0x1] %vm33_vm1, %v2252_v3  ;;  %59 = vst.msk [vmem:[#allocation2 + $0x2a0] sm:$0x1] %vm33_vm1, %v2252_v3  ;;  %v1394_v32 = vld [vmem:[%s5042_s1 + $0x68] sm:$0xff]  ;;  %v138_v34 = vld [vmem:[%s5043_s0 + $0x140] sm:$0xff] }
  0x12   :  { %60 = vst.msk [vmem:[#allocation2 + $0x2b8] sm:$0x1] %vm33_vm1, %v2252_v3  ;;  %61 = vst.msk [vmem:[#allocation2 + $0x2d0] sm:$0x1] %vm33_vm1, %v2252_v3  ;;  %1460 = vperm.xlu1 %2248, %v1390_v14   ;;  %1455 = vperm.xlu0 %2247, %v1389_v21   ;;  %v1396_v35 = vld [vmem:[%s5042_s1 + $0x78] sm:$0xff]  ;;  %v1395_v36 = vld [vmem:[%s5042_s1 + $0x70] sm:$0xff] }
  0x13   :  { %62 = vst.msk [vmem:[#allocation2 + $0x2e8] sm:$0x1] %vm33_vm1, %v2252_v3  ;;  %63 = vst.msk [vmem:[#allocation2 + $0x300] sm:$0x1] %vm33_vm1, %v2252_v3  ;;  %v1398_v37 = vld [vmem:[%s5042_s1 + $0x88] sm:$0xff]  ;;  %v1397_v38 = vld [vmem:[%s5042_s1 + $0x80] sm:$0xff] }
  0x14   :  { %64 = vst.msk [vmem:[#allocation2 + $0x318] sm:$0x1] %vm33_vm1, %v2252_v3  ;;  %65 = vst.msk [vmem:[#allocation2 + $0x330] sm:$0x1] %vm33_vm1, %v2252_v3  ;;  %v139_v39 = vld [vmem:[%s5043_s0 + $0x148] sm:$0xff]  ;;  %v1400_v40 = vld [vmem:[%s5042_s1 + $0x98] sm:$0xff] }
  0x15   :  { %66 = vst.msk [vmem:[#allocation2 + $0x29] sm:$0x1] %vm33_vm1, %v2252_v3  ;;  %67 = vst.msk [vmem:[#allocation2 + $0x41] sm:$0x1] %vm33_vm1, %v2252_v3  ;;  %v1399_v41 = vld [vmem:[%s5042_s1 + $0x90] sm:$0xff]  ;;  %v109_v43 = vld [vmem:[%s5043_s0 + $0x58] sm:$0xff] }
  0x16   :  { %68 = vst.msk [vmem:[#allocation2 + $0x59] sm:$0x1] %vm33_vm1, %v2252_v3  ;;  %69 = vst.msk [vmem:[#allocation2 + $0x71] sm:$0x1] %vm33_vm1, %v2252_v3  ;;  %1470 = vperm.xlu1 %2248, %v1392_v24   ;;  %1465 = vperm.xlu0 %2247, %v1391_v29   ;;  %v108_v42 = vld [vmem:[%s5043_s0 + $0x50] sm:$0xff]  ;;  %v141_v45 = vld [vmem:[%s5043_s0 + $0x158] sm:$0xff] }
  0x17   :  { %70 = vst.msk [vmem:[#allocation2 + $0x89] sm:$0x1] %vm33_vm1, %v2252_v3  ;;  %71 = vst.msk [vmem:[#allocation2 + $0xa1] sm:$0x1] %vm33_vm1, %v2252_v3  ;;  %v140_v44 = vld [vmem:[%s5043_s0 + $0x150] sm:$0xff]  ;;  %v110_v46 = vld [vmem:[%s5043_s0 + $0x60] sm:$0xff] }
  0x18   :  { %72 = vst.msk [vmem:[#allocation2 + $0xb9] sm:$0x1] %vm33_vm1, %v2252_v3  ;;  %73 = vst.msk [vmem:[#allocation2 + $0xd1] sm:$0x1] %vm33_vm1, %v2252_v3  ;;  %v111_v47 = vld [vmem:[%s5043_s0 + $0x68] sm:$0xff]  ;;  %v1401_v49 = vld [vmem:[%s5042_s1 + $0xa0] sm:$0xff] }
  0x19   :  { %74 = vst.msk [vmem:[#allocation2 + $0xe9] sm:$0x1] %vm33_vm1, %v2252_v3  ;;  %75 = vst.msk [vmem:[#allocation2 + $0x101] sm:$0x1] %vm33_vm1, %v2252_v3  ;;  %v1402_v48 = vld [vmem:[%s5042_s1 + $0xa8] sm:$0xff]  ;;  %v142_v50 = vld [vmem:[%s5043_s0 + $0x160] sm:$0xff] }
  0x1a   :  { %76 = vst.msk [vmem:[#allocation2 + $0x119] sm:$0x1] %vm33_vm1, %v2252_v3  ;;  %77 = vst.msk [vmem:[#allocation2 + $0x131] sm:$0x1] %vm33_vm1, %v2252_v3  ;;  %1480 = vperm.xlu1 %2248, %v1394_v32   ;;  %1475 = vperm.xlu0 %2247, %v1393_v33   ;;  %v143_v51 = vld [vmem:[%s5043_s0 + $0x168] sm:$0xff]  ;;  %v112_v52 = vld [vmem:[%s5043_s0 + $0x70] sm:$0xff] }
  0x1b   :  { %78 = vst.msk [vmem:[#allocation2 + $0x149] sm:$0x1] %vm33_vm1, %v2252_v3  ;;  %79 = vst.msk [vmem:[#allocation2 + $0x161] sm:$0x1] %vm33_vm1, %v2252_v3  ;;  %v113_v53 = vld [vmem:[%s5043_s0 + $0x78] sm:$0xff]  ;;  %v144_v54 = vld [vmem:[%s5043_s0 + $0x170] sm:$0xff] }
  0x1c   :  { %80 = vst.msk [vmem:[#allocation2 + $0x179] sm:$0x1] %vm33_vm1, %v2252_v3  ;;  %81 = vst.msk [vmem:[#allocation2 + $0x191] sm:$0x1] %vm33_vm1, %v2252_v3  ;;  %v145_v55 = vld [vmem:[%s5043_s0 + $0x178] sm:$0xff]  ;;  %v114_v56 = vld [vmem:[%s5043_s0 + $0x80] sm:$0xff] }
  0x1d   :  { %82 = vst.msk [vmem:[#allocation2 + $0x1d9] sm:$0x1] %vm33_vm1, %v2252_v3  ;;  %83 = vst.msk [vmem:[#allocation2 + $0x1f1] sm:$0x1] %vm33_vm1, %v2252_v3  ;;  %v1404_v57 = vld [vmem:[%s5042_s1 + $0xb8] sm:$0xff]  ;;  %v1403_v58 = vld [vmem:[%s5042_s1 + $0xb0] sm:$0xff] }
  0x1e   :  { %84 = vst.msk [vmem:[#allocation2 + $0x209] sm:$0x1] %vm33_vm1, %v2252_v3  ;;  %85 = vst.msk [vmem:[#allocation2 + $0x221] sm:$0x1] %vm33_vm1, %v2252_v3  ;;  %1490 = vperm.xlu1 %2248, %v1396_v35   ;;  %1485 = vperm.xlu0 %2247, %v1395_v36   ;;  %v115_v59 = vld [vmem:[%s5043_s0 + $0x88] sm:$0xff]  ;;  %v1405_v61 = vld [vmem:[%s5042_s1 + $0xc0] sm:$0xff] }
  0x1f   :  { %86 = vst.msk [vmem:[#allocation2 + $0x239] sm:$0x1] %vm33_vm1, %v2252_v3  ;;  %87 = vst.msk [vmem:[#allocation2 + $0x251] sm:$0x1] %vm33_vm1, %v2252_v3  ;;  %v1406_v60 = vld [vmem:[%s5042_s1 + $0xc8] sm:$0xff]  ;;  %v1408_v62 = vld [vmem:[%s5042_s1 + $0xd8] sm:$0xff] }
  0x20   :  { %88 = vst.msk [vmem:[#allocation2 + $0x269] sm:$0x1] %vm33_vm1, %v2252_v3  ;;  %89 = vst.msk [vmem:[#allocation2 + $0x281] sm:$0x1] %vm33_vm1, %v2252_v3  ;;  %v1407_v63 = vld [vmem:[%s5042_s1 + $0xd0] sm:$0xff]  ;;  %v146_v0 = vld [vmem:[%s5043_s0 + $0x180] sm:$0xff] }
  0x21   :  { %90 = vst.msk [vmem:[#allocation2 + $0x299] sm:$0x1] %vm33_vm1, %v2252_v3  ;;  %91 = vst.msk [vmem:[#allocation2 + $0x2b1] sm:$0x1] %vm33_vm1, %v2252_v3  ;;  %v147_v1 = vld [vmem:[%s5043_s0 + $0x188] sm:$0xff]  ;;  %v116_v4 = vld [vmem:[%s5043_s0 + $0x90] sm:$0xff] }
  0x22   :  { %92 = vst.msk [vmem:[#allocation2 + $0x2c9] sm:$0x1] %vm33_vm1, %v2252_v3  ;;  %93 = vst.msk [vmem:[#allocation2 + $0x2e1] sm:$0x1] %vm33_vm1, %v2252_v3  ;;  %1500 = vperm.xlu1 %2248, %v1398_v37   ;;  %1495 = vperm.xlu0 %2247, %v1397_v38   ;;  %v1410_v2 = vld [vmem:[%s5042_s1 + $0xe8] sm:$0xff]  ;;  %v117_v5 = vld [vmem:[%s5043_s0 + $0x98] sm:$0xff] }
  0x23   :  { %94 = vst.msk [vmem:[#allocation2 + $0x2f9] sm:$0x1] %vm33_vm1, %v2252_v3  ;;  %95 = vst.msk [vmem:[#allocation2 + $0x311] sm:$0x1] %vm33_vm1, %v2252_v3  ;;  %v148_v6 = vld [vmem:[%s5043_s0 + $0x190] sm:$0xff]  ;;  %v149_v7 = vld [vmem:[%s5043_s0 + $0x198] sm:$0xff] }
  0x24   :  { %96 = vst.msk [vmem:[#allocation2 + $0x329] sm:$0x1] %vm33_vm1, %v2252_v3  ;;  %97 = vst.msk [vmem:[#allocation2 + $0x341] sm:$0x1] %vm33_vm1, %v2252_v3  ;;  %v1412_v8 = vld [vmem:[%s5042_s1 + $0xf8] sm:$0xff]  ;;  %v1411_v9 = vld [vmem:[%s5042_s1 + $0xf0] sm:$0xff] }
  0x25   :  { %21 = vst.msk [vmem:[#allocation2 + $0x10] sm:$0x3] %vm20_vm2, %v2252_v3  ;;  %24 = vst.msk [vmem:[#allocation2 + $0x1c0] sm:$0x3] %vm20_vm2, %v2252_v3  ;;  %v120_v14 = vld [vmem:[%s5043_s0 + $0xb0] sm:$0xff]  ;;  %v226_v21 = vld [vmem:[#allocation2] sm:$0xff] }
  0x26   :  { %28 = vst.msk [vmem:[#allocation2 + $0x1a8] sm:$0x3] %vm20_vm2, %v2252_v3  ;;  %31 = vst.msk [vmem:[#allocation2 + $0x358] sm:$0x3] %vm20_vm2, %v2252_v3  ;;  %1510 = vperm.xlu1 %2248, %v1400_v40   ;;  %1505 = vperm.xlu0 %2247, %v1399_v41   ;;  %v1409_v3 = vld [vmem:[%s5042_s1 + $0xe0] sm:$0xff]  ;;  %v274_v32 = vld [vmem:[#allocation2 + $0x1b0] sm:$0xff] }
  0x27   :  { %162 = vst.msk [vmem:[#allocation2 + $0x19] sm:$0xff] %vm17_vm0, %v98_v10  ;;  %163 = vst.msk [vmem:[#allocation2 + $0x21] sm:$0xff] %vm17_vm0, %v99_v11  ;;  %v118_v10 = vld [vmem:[%s5043_s0 + $0xa0] sm:$0xff]  ;;  %v119_v11 = vld [vmem:[%s5043_s0 + $0xa8] sm:$0xff] }
  0x28   :  { %164 = vst.msk [vmem:[#allocation2 + $0x31] sm:$0xff] %vm17_vm0, %v100_v12  ;;  %165 = vst.msk [vmem:[#allocation2 + $0x39] sm:$0xff] %vm17_vm0, %v101_v13  ;;  %v150_v12 = vld [vmem:[%s5043_s0 + $0x1a0] sm:$0xff]  ;;  %v151_v13 = vld [vmem:[%s5043_s0 + $0x1a8] sm:$0xff] }
  0x29   :  { %166 = vst.msk [vmem:[#allocation2 + $0x49] sm:$0xff] %vm17_vm0, %v102_v15  ;;  %167 = vst.msk [vmem:[#allocation2 + $0x51] sm:$0xff] %vm17_vm0, %v103_v16  ;;  %v121_v15 = vld [vmem:[%s5043_s0 + $0xb8] sm:$0xff]  ;;  %v152_v16 = vld [vmem:[%s5043_s0 + $0x1b0] sm:$0xff] }
  0x2a   :  { %194 = vst.msk [vmem:[#allocation2 + $0x1c9] sm:$0xff] %vm17_vm0, %v130_v17  ;;  %195 = vst.msk [vmem:[#allocation2 + $0x1d1] sm:$0xff] %vm17_vm0, %v131_v18  ;;  %1520 = vperm.xlu1 %2248, %v1402_v48   ;;  %1515 = vperm.xlu0 %2247, %v1401_v49   ;;  %v153_v17 = vld [vmem:[%s5043_s0 + $0x1b8] sm:$0xff]  ;;  %v122_v18 = vld [vmem:[%s5043_s0 + $0xc0] sm:$0xff] }
  0x2b   :  { %196 = vst.msk [vmem:[#allocation2 + $0x1e1] sm:$0xff] %vm17_vm0, %v132_v19  ;;  %197 = vst.msk [vmem:[#allocation2 + $0x1e9] sm:$0xff] %vm17_vm0, %v133_v20  ;;  %v154_v24 = vld [vmem:[%s5043_s0 + $0x1c0] sm:$0xff]  ;;  %v125_v33 = vld [vmem:[%s5043_s0 + $0xd8] sm:$0xff] }
  0x2c   :  { %198 = vst.msk [vmem:[#allocation2 + $0x1f9] sm:$0xff] %vm17_vm0, %v134_v22  ;;  %199 = vst.msk [vmem:[#allocation2 + $0x201] sm:$0xff] %vm17_vm0, %v135_v23  ;;  %v227_v22 = vld [vmem:[#allocation2 + $0x8] sm:$0xff]  ;;  %v157_v38 = vld [vmem:[%s5043_s0 + $0x1d8] sm:$0xff] }
  0x2d   :  { %168 = vst.msk [vmem:[#allocation2 + $0x61] sm:$0xff] %vm17_vm0, %v104_v25  ;;  %169 = vst.msk [vmem:[#allocation2 + $0x69] sm:$0xff] %vm17_vm0, %v105_v26  ;;  %v123_v23 = vld [vmem:[%s5043_s0 + $0xc8] sm:$0xff] }
  0x2e   :  { %200 = vst.msk [vmem:[#allocation2 + $0x211] sm:$0xff] %vm17_vm0, %v136_v27  ;;  %201 = vst.msk [vmem:[#allocation2 + $0x219] sm:$0xff] %vm17_vm0, %v137_v28  ;;  %1530 = vperm.xlu1 %2248, %v1404_v57   ;;  %1525 = vperm.xlu0 %2247, %v1403_v58   ;;  %v229_v19 = vld [vmem:[#allocation2 + $0x18] sm:$0xff]  ;;  %v230_v20 = vld [vmem:[#allocation2 + $0x20] sm:$0xff] }
  0x2f   :  { %170 = vst.msk [vmem:[#allocation2 + $0x79] sm:$0xff] %vm17_vm0, %v106_v30  ;;  %171 = vst.msk [vmem:[#allocation2 + $0x81] sm:$0xff] %vm17_vm0, %v107_v31  ;;  %v2730_v25 = vld [vmem:[#allocation2 + $0x30] sm:$0xff]  ;;  %v155_v26 = vld [vmem:[%s5043_s0 + $0x1c8] sm:$0xff] }
  0x30   :  { %202 = vst.msk [vmem:[#allocation2 + $0x229] sm:$0xff] %vm17_vm0, %v138_v34  ;;  %203 = vst.msk [vmem:[#allocation2 + $0x231] sm:$0xff] %vm17_vm0, %v139_v39  ;;  %v124_v27 = vld [vmem:[%s5043_s0 + $0xd0] sm:$0xff]  ;;  %v2740_v30 = vld [vmem:[#allocation2 + $0x38] sm:$0xff]  ;;  %v421_v36 = vadd.f32 %v2730_v25, %v229_v19 }
  0x31   :  { %172 = vst.msk [vmem:[#allocation2 + $0x91] sm:$0xff] %vm17_vm0, %v108_v42  ;;  %173 = vst.msk [vmem:[#allocation2 + $0x99] sm:$0xff] %vm17_vm0, %v109_v43  ;;  %v277_v28 = vld [vmem:[#allocation2 + $0x1c8] sm:$0xff]  ;;  %v278_v29 = vld [vmem:[#allocation2 + $0x1d0] sm:$0xff]  ;;  %v422_v37 = vadd.f32 %v2740_v30, %v230_v20 }
  0x32   :  { %204 = vst.msk [vmem:[#allocation2 + $0x241] sm:$0xff] %vm17_vm0, %v140_v44  ;;  %205 = vst.msk [vmem:[#allocation2 + $0x249] sm:$0xff] %vm17_vm0, %v141_v45  ;;  %1540 = vperm.xlu1 %2248, %v1406_v60   ;;  %1535 = vperm.xlu0 %2247, %v1405_v61   ;;  %v2744_v31 = vld [vmem:[#allocation2 + $0x1e0] sm:$0xff]  ;;  %v156_v34 = vld [vmem:[%s5043_s0 + $0x1d0] sm:$0xff]  ;;  %v418_v45 = vadd.f32 %v229_v19, %v226_v21 }
  0x33   :  { %174 = vst.msk [vmem:[#allocation2 + $0xa9] sm:$0xff] %vm17_vm0, %v110_v46  ;;  %175 = vst.msk [vmem:[#allocation2 + $0xb1] sm:$0xff] %vm17_vm0, %v111_v47  ;;  %v2752_v35 = vld [vmem:[#allocation2 + $0x1e8] sm:$0xff]  ;;  %v126_v39 = vld [vmem:[%s5043_s0 + $0xe0] sm:$0xff]  ;;  %v469_v40 = vadd.f32 %v2744_v31, %v277_v28  ;;  %v419_v46 = vadd.f32 %v230_v20, %v227_v22 }
  0x34   :  { %206 = vst.msk [vmem:[#allocation2 + $0x259] sm:$0xff] %vm17_vm0, %v142_v50  ;;  %207 = vst.msk [vmem:[#allocation2 + $0x261] sm:$0xff] %vm17_vm0, %v143_v51  ;;  %v470_v41 = vadd.f32 %v2752_v35, %v278_v29  ;;  %v2766_v42 = vld [vmem:[#allocation2 + $0x48] sm:$0xff]  ;;  %v2768_v43 = vld [vmem:[#allocation2 + $0x50] sm:$0xff] }
  0x35   :  { %176 = vst.msk [vmem:[#allocation2 + $0xc1] sm:$0xff] %vm17_vm0, %v112_v52  ;;  %177 = vst.msk [vmem:[#allocation2 + $0xc9] sm:$0xff] %vm17_vm0, %v113_v53  ;;  %v275_v44 = vld [vmem:[#allocation2 + $0x1b8] sm:$0xff]  ;;  %v2774_v48 = vld [vmem:[#allocation2 + $0x200] sm:$0xff]  ;;  %v614_v53 = vadd.f32 %v2766_v42, %v421_v36  ;;  %v2802_v60 = vadd.f32 %v419_v46, %v2740_v30 }
  0x36   :  { %208 = vst.msk [vmem:[#allocation2 + $0x271] sm:$0xff] %vm17_vm0, %v144_v54  ;;  %209 = vst.msk [vmem:[#allocation2 + $0x279] sm:$0xff] %vm17_vm0, %v145_v55  ;;  %1550 = vperm.xlu1 %2248, %v1408_v62   ;;  %1545 = vperm.xlu0 %2247, %v1407_v63   ;;  %v2772_v47 = vld [vmem:[#allocation2 + $0x1f8] sm:$0xff]  ;;  %v127_v49 = vld [vmem:[%s5043_s0 + $0xe8] sm:$0xff]  ;;  %v2791_v54 = vadd.f32 %v2768_v43, %v422_v37  ;;  %v466_v55 = vadd.f32 %v277_v28, %v274_v32 }
  0x37   :  { %178 = vst.msk [vmem:[#allocation2 + $0xd9] sm:$0xff] %vm17_vm0, %v114_v56  ;;  %179 = vst.msk [vmem:[#allocation2 + $0xe1] sm:$0xff] %vm17_vm0, %v115_v59  ;;  %v158_v50 = vld [vmem:[%s5043_s0 + $0x1e0] sm:$0xff]  ;;  %v159_v51 = vld [vmem:[%s5043_s0 + $0x1e8] sm:$0xff]  ;;  %v467_v56 = vadd.f32 %v278_v29, %v275_v44  ;;  %v662_v57 = vadd.f32 %v2772_v47, %v469_v40  ;;  %v2798_v58 = vadd.f32 %v2774_v48, %v470_v41 }
  0x38   :  { %210 = vst.msk [vmem:[#allocation2 + $0x289] sm:$0xff] %vm17_vm0, %v146_v0  ;;  %211 = vst.msk [vmem:[#allocation2 + $0x291] sm:$0xff] %vm17_vm0, %v147_v1  ;;  %v128_v52 = vld [vmem:[%s5043_s0 + $0xf0] sm:$0xff]  ;;  %v611_v59 = vadd.f32 %v418_v45, %v2730_v25  ;;  %v231_v61 = vld [vmem:[#allocation2 + $0x28] sm:$0x3]  ;;  %v809_v1 = vrot.slane %v614_v53, 1 }
  0x39   :  { %180 = vst.msk [vmem:[#allocation2 + $0xf1] sm:$0xff] %vm17_vm0, %v116_v4  ;;  %181 = vst.msk [vmem:[#allocation2 + $0xf9] sm:$0xff] %vm17_vm0, %v117_v5  ;;  %v279_v62 = vld [vmem:[#allocation2 + $0x1d8] sm:$0x3]  ;;  %v327_v63 = vld [vmem:[#allocation2 + $0x40] sm:$0x3]  ;;  %v2809_v4 = vadd.f32 %v467_v56, %v2752_v35 }
  0x3a   :  { %1560 = vperm.xlu1 %2248, %v1410_v2   ;;  %1555 = vperm.xlu0 %2247, %v1409_v3   ;;  %212 = vst.msk [vmem:[#allocation2 + $0x2a1] sm:$0xff] %vm17_vm0, %v148_v6  ;;  %213 = vst.msk [vmem:[#allocation2 + $0x2a9] sm:$0xff] %vm17_vm0, %v149_v7  ;;  %v375_v0 = vld [vmem:[#allocation2 + $0x1f0] sm:$0x3]  ;;  %v810_v2 = vrot.slane %v2791_v54, 1  ;;  %v2806_v3 = vadd.f32 %v466_v55, %v2744_v31  ;;  %v889_v7 = vrot.slane %v662_v57, 1 }
  0x3b   :  { %182 = vst.msk [vmem:[#allocation2 + $0x109] sm:$0xff] %vm17_vm0, %v118_v10  ;;  %183 = vst.msk [vmem:[#allocation2 + $0x111] sm:$0xff] %vm17_vm0, %v119_v11  ;;  %v228_v5 = vld [vmem:[#allocation2 + $0x10] sm:$0x3]  ;;  %v324_v6 = vld [vmem:[#allocation2 + $0x28] sm:$0x3] }
  0x3c   :  { %214 = vst.msk [vmem:[#allocation2 + $0x2b9] sm:$0xff] %vm17_vm0, %v150_v12  ;;  %215 = vst.msk [vmem:[#allocation2 + $0x2c1] sm:$0xff] %vm17_vm0, %v151_v13  ;;  %v805_v10 = vrot.slane %v2802_v60, 1  ;;  %v276_v11 = vld [vmem:[#allocation2 + $0x1c0] sm:$0x3]  ;;  %v1098_v12 = vrot.slane %v614_v53, 2  ;;  %v423_v13 = vadd.f32 %v327_v63, %v231_v61  ;;  %v420_v20 = vadd.f32 %v324_v6, %v228_v5 }
  0x3d   :  { %184 = vst.msk [vmem:[#allocation2 + $0x121] sm:$0xff] %vm17_vm0, %v120_v14  ;;  %185 = vst.msk [vmem:[#allocation2 + $0x129] sm:$0xff] %vm17_vm0, %v121_v15  ;;  %v471_v14 = vadd.f32 %v375_v0, %v279_v62  ;;  %v520_v15 = vld [vmem:[#allocation2 + $0x58] sm:$0x3]  ;;  %v517_v21 = vld [vmem:[#allocation2 + $0x40] sm:$0x3]  ;;  %v811_v22 = vsel %vm803_vm3, %v809_v1, %v810_v2 }
  0x3e   :  { %1570 = vperm.xlu1 %2248, %v1412_v8   ;;  %1565 = vperm.xlu0 %2247, %v1411_v9   ;;  %216 = vst.msk [vmem:[#allocation2 + $0x2d1] sm:$0xff] %vm17_vm0, %v152_v16  ;;  %217 = vst.msk [vmem:[#allocation2 + $0x2d9] sm:$0xff] %vm17_vm0, %v153_v17  ;;  %v890_v8 = vrot.slane %v2798_v58, 1  ;;  %v804_v9 = vrot.slane %v611_v59, 1  ;;  %v568_v16 = vld [vmem:[#allocation2 + $0x208] sm:$0x3]  ;;  %v1030_v44 = vadd.f32 %v811_v22, %v614_v53 }
  0x3f   :  { %186 = vst.msk [vmem:[#allocation2 + $0x139] sm:$0xff] %vm17_vm0, %v122_v18  ;;  %187 = vst.msk [vmem:[#allocation2 + $0x141] sm:$0xff] %vm17_vm0, %v123_v23  ;;  %v1099_v17 = vrot.slane %v2791_v54, 2  ;;  %v1178_v18 = vrot.slane %v662_v57, 2  ;;  %v372_v19 = vld [vmem:[#allocation2 + $0x1d8] sm:$0x3]  ;;  %v664_v40 = vadd.f32 %v568_v16, %v471_v14 }
  0x40   :  { %218 = vst.msk [vmem:[#allocation2 + $0x2e9] sm:$0xff] %vm17_vm0, %v154_v24  ;;  %219 = vst.msk [vmem:[#allocation2 + $0x2f1] sm:$0xff] %vm17_vm0, %v155_v26  ;;  %v1179_v23 = vrot.slane %v2798_v58, 2  ;;  %v884_v24 = vrot.slane %v2806_v3, 1  ;;  %v885_v26 = vrot.slane %v2809_v4, 1  ;;  %v129_v28 = vld [vmem:[%s5043_s0 + $0xf8] sm:$0xff]  ;;  %v891_v29 = vsel %vm803_vm3, %v889_v7, %v890_v8 }
  0x41   :  { %188 = vst.msk [vmem:[#allocation2 + $0x151] sm:$0xff] %vm17_vm0, %v124_v27  ;;  %189 = vst.msk [vmem:[#allocation2 + $0x159] sm:$0xff] %vm17_vm0, %v125_v33  ;;  %v234_v27 = vld [vmem:[#allocation2 + $0x40] sm:$0x3]  ;;  %v806_v32 = vsel %vm803_vm3, %v804_v9, %v805_v10  ;;  %v1093_v33 = vrot.slane %v611_v59, 2  ;;  %v160_v37 = vld [vmem:[%s5043_s0 + $0x1f0] sm:$0xff]  ;;  %v468_v41 = vadd.f32 %v372_v19, %v276_v11  ;;  %v1100_v45 = vsel %vm1092_vm4, %v1098_v12, %v1099_v17 }
  0x42   :  { %220 = vst.msk [vmem:[#allocation2 + $0x301] sm:$0xff] %vm17_vm0, %v156_v34  ;;  %221 = vst.msk [vmem:[#allocation2 + $0x309] sm:$0xff] %vm17_vm0, %v157_v38  ;;  %v1094_v34 = vrot.slane %v2802_v60, 2  ;;  %v330_v36 = vld [vmem:[#allocation2 + $0x58] sm:$0x3]  ;;  %v1028_v55 = vadd.f32 %v806_v32, %v611_v59  ;;  %v886_v53 = vsel %vm803_vm3, %v884_v24, %v885_v26  ;;  %v1173_v0 = vrot.slane %v2806_v3, 2 }
  0x43   :  { %190 = vst.msk [vmem:[#allocation2 + $0x169] sm:$0xff] %vm17_vm0, %v126_v39  ;;  %191 = vst.msk [vmem:[#allocation2 + $0x171] sm:$0xff] %vm17_vm0, %v127_v49  ;;  %v161_v38 = vld [vmem:[%s5043_s0 + $0x1f8] sm:$0xff]  ;;  %v616_v39 = vadd.f32 %v520_v15, %v423_v13  ;;  %v565_v46 = vld [vmem:[#allocation2 + $0x1f0] sm:$0x3]  ;;  %v2840_v49 = vadd.f32 %v517_v21, %v420_v20  ;;  %v426_v62 = vadd.f32 %v330_v36, %v234_v27  ;;  %v892_v59 = vrot.slane %v664_v40, 1 }
  0x44   :  { %222 = vst.msk [vmem:[#allocation2 + $0x319] sm:$0xff] %vm17_vm0, %v158_v50  ;;  %223 = vst.msk [vmem:[#allocation2 + $0x321] sm:$0xff] %vm17_vm0, %v159_v51  ;;  %v425_v50 = vadd.f32 %v2768_v43, %v2740_v30  ;;  %v1062_v51 = vadd.f32 %v891_v29, %v662_v57  ;;  %v282_v56 = vld [vmem:[#allocation2 + $0x1f0] sm:$0x3]  ;;  %v378_v61 = vld [vmem:[#allocation2 + $0x208] sm:$0x3]  ;;  %v1095_v63 = vsel %vm1092_vm4, %v1093_v33, %v1094_v34 }
  0x45   :  { %192 = vst.msk [vmem:[#allocation2 + $0x181] sm:$0xff] %vm17_vm0, %v128_v52  ;;  %193 = vst.msk [vmem:[#allocation2 + $0x189] sm:$0xff] %vm17_vm0, %v129_v28  ;;  %v1180_v52 = vsel %vm1092_vm4, %v1178_v18, %v1179_v23  ;;  %v1174_v30 = vrot.slane %v2809_v4, 2  ;;  %v2855_v57 = vld [vmem:[#allocation2 + $0x68] sm:$0xff]  ;;  %v523_v1 = vld [vmem:[#allocation2 + $0x70] sm:$0x3]  ;;  %v661_v7 = vadd.f32 %v565_v46, %v468_v41  ;;  %v473_v11 = vadd.f32 %v2774_v48, %v2752_v35 }
  0x46   :  { %224 = vst.msk [vmem:[#allocation2 + $0x331] sm:$0xff] %vm17_vm0, %v160_v37  ;;  %225 = vst.msk [vmem:[#allocation2 + $0x339] sm:$0xff] %vm17_vm0, %v161_v38  ;;  %v812_v5 = vrot.slane %v616_v39, 1  ;;  %v1101_v6 = vrot.slane %v616_v39, 2  ;;  %v807_v9 = vrot.slane %v2840_v49, 1  ;;  %v474_v12 = vadd.f32 %v378_v61, %v282_v56  ;;  %v2864_v15 = vld [vmem:[#allocation2 + $0x218] sm:$0xff] }
  0x47   :  { %v2860_v13 = vadd.f32 %v1100_v45, %v1030_v44  ;;  %v2862_v14 = vadd.f32 %v1180_v52, %v1062_v51  ;;  %v571_v16 = vld [vmem:[#allocation2 + $0x220] sm:$0x3]  ;;  %v2867_v18 = vadd.f32 %v2855_v57, %v425_v50  ;;  %v619_v19 = vadd.f32 %v523_v1, %v426_v62  ;;  %v237_v37 = vld [vmem:[#allocation2 + $0x58] sm:$0x3]  ;;  %v285_v45 = vld [vmem:[#allocation2 + $0x208] sm:$0x3] }
  0x48   :  { %v1060_v20 = vadd.f32 %v886_v53, %v2806_v3  ;;  %v1175_v21 = vsel %vm1092_vm4, %v1173_v0, %v1174_v30  ;;  %v2871_v22 = vadd.f32 %v1095_v63, %v1028_v55  ;;  %v1181_v24 = vrot.slane %v664_v40, 2  ;;  %v2890_v40 = vld [vmem:[#allocation2 + $0x60] sm:$0xff]  ;;  %v2903_v51 = vld [vmem:[#allocation2 + $0x210] sm:$0xff]  ;;  %v526_v61 = vld [vmem:[#allocation2 + $0x88] sm:$0x3] }
  0x49   :  { %v813_v35 = vsel %vm803_vm3, %v810_v2, %v812_v5  ;;  %v893_v27 = vsel %vm803_vm3, %v890_v8, %v892_v59  ;;  %v1102_v28 = vsel %vm1092_vm4, %v1099_v17, %v1101_v6  ;;  %v887_v29 = vrot.slane %v661_v7, 1  ;;  %v333_v2 = vld [vmem:[#allocation2 + $0x70] sm:$0x3]  ;;  %v381_v46 = vld [vmem:[#allocation2 + $0x220] sm:$0x3] }
  0x4a   :  { %v808_v3 = vsel %vm803_vm3, %v805_v10, %v807_v9  ;;  %v2884_v32 = vadd.f32 %v2864_v15, %v473_v11  ;;  %v667_v33 = vadd.f32 %v571_v16, %v474_v12  ;;  %v424_v36 = vadd.f32 %v2766_v42, %v2730_v25  ;;  %v525_v56 = vld [vmem:[#allocation2 + $0x80] sm:$0xff]  ;;  %v2923_v59 = vld [vmem:[#allocation2 + $0x230] sm:$0xff]  ;;  %v574_v6 = vld [vmem:[#allocation2 + $0x238] sm:$0x3] }
  0x4b   :  { %v1096_v38 = vrot.slane %v2840_v49, 2  ;;  %v1176_v39 = vrot.slane %v661_v7, 2  ;;  %v815_v8 = vrot.slane %v2867_v18, 1  ;;  %v817_v17 = vrot.slane %v619_v19, 1 }
  0x4c   :  { %v1031_v41 = vadd.f32 %v813_v35, %v2791_v54  ;;  %v1063_v10 = vadd.f32 %v893_v27, %v2798_v58  ;;  %v1182_v44 = vsel %vm1092_vm4, %v1179_v23, %v1181_v24  ;;  %v472_v25 = vadd.f32 %v2772_v47, %v2744_v31 }
  0x4d   :  { %v888_v49 = vsel %vm803_vm3, %v885_v26, %v887_v29  ;;  %v1029_v50 = vadd.f32 %v808_v3, %v2802_v60  ;;  %v428_v54 = vadd.f32 %v2855_v57, %v2768_v43  ;;  %v429_v52 = vadd.f32 %v333_v2, %v237_v37  ;;  %v240_v29 = vld [vmem:[#allocation2 + $0x70] sm:$0x3]  ;;  %v336_v3 = vld [vmem:[#allocation2 + $0x88] sm:$0x3] }
  0x4e   :  { %v895_v58 = vrot.slane %v2884_v32, 1  ;;  %v897_v23 = vrot.slane %v667_v33, 1  ;;  %v1104_v55 = vrot.slane %v2867_v18, 2  ;;  %v2910_v31 = vadd.f32 %v2890_v40, %v424_v36 }
  0x4f   :  { %v818_v26 = vsel %vm803_vm3, %v815_v8, %v817_v17  ;;  %v1106_v62 = vrot.slane %v619_v19, 2  ;;  %v476_v53 = vadd.f32 %v2864_v15, %v2774_v48  ;;  %v477_v63 = vadd.f32 %v381_v46, %v285_v45 }
  0x50   :  { %v1061_v43 = vadd.f32 %v888_v49, %v2809_v4  ;;  %v1097_v0 = vsel %vm1092_vm4, %v1094_v34, %v1096_v38  ;;  %v1177_v1 = vsel %vm1092_vm4, %v1174_v30, %v1176_v39  ;;  %v2921_v5 = vadd.f32 %v2903_v51, %v472_v25 }
  0x51   :  { %v1184_v7 = vrot.slane %v2884_v32, 2  ;;  %v1186_v9 = vrot.slane %v667_v33, 2  ;;  %v2926_v11 = vadd.f32 %v525_v56, %v428_v54  ;;  %v622_v48 = vadd.f32 %v526_v61, %v429_v52  ;;  %v2962_v54 = vld [vmem:[#allocation2 + $0x98] sm:$0xff]  ;;  %v529_v52 = vld [vmem:[#allocation2 + $0xa0] sm:$0x3] }
  0x52   :  { %v2928_v12 = vadd.f32 %v1175_v21, %v1060_v20  ;;  %v898_v60 = vsel %vm803_vm3, %v895_v58, %v897_v23  ;;  %v1033_v4 = vadd.f32 %v818_v26, %v2867_v18  ;;  %v814_v34 = vrot.slane %v2910_v31, 1  ;;  %v2968_v26 = vld [vmem:[#allocation2 + $0x90] sm:$0xff] }
  0x53   :  { %v2933_v30 = vadd.f32 %v1102_v28, %v1031_v41  ;;  %v1107_v16 = vsel %vm1092_vm4, %v1104_v55, %v1106_v62  ;;  %v2939_v19 = vadd.f32 %v2923_v59, %v476_v53  ;;  %v670_v24 = vadd.f32 %v574_v6, %v477_v63  ;;  %v243_v41 = vld [vmem:[#allocation2 + $0x88] sm:$0x3] }
  0x54   :  { %v2941_v35 = vadd.f32 %v1182_v44, %v1063_v10  ;;  %v2943_v20 = vadd.f32 %v1097_v0, %v1029_v50  ;;  %v2945_v21 = vadd.f32 %v1177_v1, %v1061_v43  ;;  %v894_v27 = vrot.slane %v2921_v5, 1  ;;  %v339_v10 = vld [vmem:[#allocation2 + $0xa0] sm:$0x3]  ;;  %v532_v0 = vld [vmem:[#allocation2 + $0xb8] sm:$0x3] }
  0x55   :  { %v1065_v28 = vadd.f32 %v898_v60, %v2884_v32  ;;  %v1187_v33 = vsel %vm1092_vm4, %v1184_v7, %v1186_v9  ;;  %v820_v36 = vrot.slane %v2926_v11, 1  ;;  %v822_v37 = vrot.slane %v622_v48, 1  ;;  %v524_v32 = vld [vmem:[#allocation2 + $0x78] sm:$0xff]  ;;  %v2982_v9 = vld [vmem:[#allocation2 + $0x228] sm:$0xff] }
  0x56   :  { %v2951_v2 = vadd.f32 %v1107_v16, %v1033_v4  ;;  %v816_v38 = vsel %vm803_vm3, %v814_v34, %v815_v8  ;;  %v1103_v39 = vrot.slane %v2910_v31, 2  ;;  %v427_v17 = vadd.f32 %v2890_v40, %v2766_v42 }
  0x57   :  { %v900_v44 = vrot.slane %v2939_v19, 1  ;;  %v902_v25 = vrot.slane %v670_v24, 1  ;;  %v431_v45 = vadd.f32 %v525_v56, %v2855_v57  ;;  %v432_v46 = vadd.f32 %v336_v3, %v240_v29  ;;  %v288_v3 = vld [vmem:[#allocation2 + $0x220] sm:$0x3] }
  0x58   :  { %v896_v49 = vsel %vm803_vm3, %v894_v27, %v895_v58  ;;  %v1183_v50 = vrot.slane %v2921_v5, 2  ;;  %v1109_v8 = vrot.slane %v2926_v11, 2  ;;  %v430_v42 = vadd.f32 %v524_v32, %v2890_v40  ;;  %v2977_v40 = vld [vmem:[#allocation2 + $0xb0] sm:$0xff] }
  0x59   :  { %v823_v23 = vsel %vm803_vm3, %v820_v36, %v822_v37  ;;  %v1111_v61 = vrot.slane %v622_v48, 2  ;;  %v434_v57 = vadd.f32 %v2962_v54, %v525_v56  ;;  %v435_v62 = vadd.f32 %v339_v10, %v243_v41  ;;  %v384_v37 = vld [vmem:[#allocation2 + $0x238] sm:$0x3] }
  0x5a   :  { %v1032_v58 = vadd.f32 %v816_v38, %v2910_v31  ;;  %v5047_v53 = vrot.slane %v2939_v19, 2  ;;  %v475_v63 = vadd.f32 %v2903_v51, %v2772_v47  ;;  %v2975_v43 = vadd.f32 %v524_v32, %v427_v17 }
  0x5b   :  { %v903_v1 = vsel %vm803_vm3, %v900_v44, %v902_v25  ;;  %v1191_v6 = vrot.slane %v670_v24, 2  ;;  %v2985_v56 = vadd.f32 %v2962_v54, %v431_v45  ;;  %v625_v31 = vadd.f32 %v529_v52, %v432_v46 }
  0x5c   :  { %v1064_v48 = vadd.f32 %v896_v49, %v2921_v5  ;;  %v1105_v47 = vsel %vm1092_vm4, %v1103_v39, %v1104_v55  ;;  %v1035_v60 = vadd.f32 %v823_v23, %v2926_v11  ;;  %v623_v4 = vadd.f32 %v2968_v26, %v430_v42 }
  0x5d   :  { %v1185_v34 = vsel %vm1092_vm4, %v1183_v50, %v1184_v7  ;;  %v1112_v16 = vsel %vm1092_vm4, %v1109_v8, %v1111_v61  ;;  %v2998_v24 = vadd.f32 %v2977_v40, %v434_v57  ;;  %v628_v27 = vadd.f32 %v532_v0, %v435_v62  ;;  %v3023_v50 = vld [vmem:[#allocation2 + $0xa8] sm:$0xff]  ;;  %v246_v61 = vld [vmem:[#allocation2 + $0xa0] sm:$0x3]  ;;  %v342_v57 = vld [vmem:[#allocation2 + $0xb8] sm:$0x3] }
  0x5e   :  { %v3000_v29 = vadd.f32 %v1187_v33, %v1065_v28  ;;  %v1067_v18 = vadd.f32 %v903_v1, %v2939_v19  ;;  %v3004_v55 = vadd.f32 %v2982_v9, %v475_v63  ;;  %v819_v5 = vrot.slane %v2975_v43, 1 }
  0x5f   :  { %v3007_v7 = vadd.f32 %v1105_v47, %v1032_v58  ;;  %v1192_v38 = vsel %vm1092_vm4, %v5047_v53, %v1191_v6  ;;  %v825_v39 = vrot.slane %v2985_v56, 1  ;;  %v827_v17 = vrot.slane %v625_v31, 1 }
  0x60   :  { %v3013_v28 = vadd.f32 %v1185_v34, %v1064_v48  ;;  %v3015_v33 = vadd.f32 %v1112_v16, %v1035_v60  ;;  %v824_v41 = vrot.slane %v623_v4, 1  ;;  %v433_v10 = vadd.f32 %v2968_v26, %v524_v32  ;;  %v538_v34 = vld [vmem:[#allocation2 + $0xe8] sm:$0x3] }
  0x61   :  { %v479_v25 = vadd.f32 %v2923_v59, %v2864_v15  ;;  %v3020_v45 = vadd.f32 %v384_v37, %v288_v3  ;;  %v830_v46 = vrot.slane %v2998_v24, 1  ;;  %v832_v49 = vrot.slane %v628_v27, 1  ;;  %v3032_v15 = vld [vmem:[#allocation2 + $0x248] sm:$0xff] }
  0x62   :  { %v3025_v52 = vadd.f32 %v1192_v38, %v1067_v18  ;;  %v821_v42 = vsel %vm803_vm3, %v819_v5, %v820_v36  ;;  %v899_v23 = vrot.slane %v3004_v55, 1  ;;  %v1108_v32 = vrot.slane %v2975_v43, 2  ;;  %v3052_v38 = vld [vmem:[#allocation2 + $0xc8] sm:$0xff] }
  0x63   :  { %v828_v62 = vsel %vm803_vm3, %v825_v39, %v827_v17  ;;  %v1114_v58 = vrot.slane %v2985_v56, 2  ;;  %v1116_v63 = vrot.slane %v625_v31, 2  ;;  %v1113_v0 = vrot.slane %v623_v4, 2 }
  0x64   :  { %v826_v36 = vsel %vm803_vm3, %v824_v41, %v825_v39  ;;  %v1119_v48 = vrot.slane %v2998_v24, 2  ;;  %v1121_v47 = vrot.slane %v628_v27, 2  ;;  %v626_v60 = vadd.f32 %v3023_v50, %v433_v10  ;;  %v535_v27 = vld [vmem:[#allocation2 + $0xd0] sm:$0x3]  ;;  %v3064_v10 = vld [vmem:[#allocation2 + $0xc0] sm:$0xff] }
  0x65   :  { %v833_v16 = vsel %vm803_vm3, %v830_v46, %v832_v49  ;;  %v437_v18 = vadd.f32 %v2977_v40, %v2962_v54  ;;  %v438_v31 = vadd.f32 %v342_v57, %v246_v61  ;;  %v1034_v5 = vadd.f32 %v821_v42, %v2975_v43 }
  0x66   :  { %v3049_v3 = vadd.f32 %v3032_v15, %v479_v25  ;;  %v1037_v37 = vadd.f32 %v828_v62, %v2985_v56  ;;  %v436_v39 = vadd.f32 %v3023_v50, %v2968_v26  ;;  %v1110_v54 = vsel %vm1092_vm4, %v1108_v32, %v1109_v8 }
  0x67   :  { %v1117_v43 = vsel %vm1092_vm4, %v1114_v58, %v1116_v63  ;;  %v1036_v41 = vadd.f32 %v826_v36, %v623_v4  ;;  %v1115_v49 = vsel %vm1092_vm4, %v1113_v0, %v1114_v58  ;;  %v1039_v26 = vadd.f32 %v833_v16, %v2998_v24 }
  0x68   :  { %v829_v42 = vrot.slane %v626_v60, 1  ;;  %v3082_v4 = vadd.f32 %v3052_v38, %v437_v18  ;;  %v631_v32 = vadd.f32 %v535_v27, %v438_v31  ;;  %v3087_v61 = vsel %vm803_vm3, %v899_v23, %v900_v44  ;;  %v249_v18 = vld [vmem:[#allocation2 + $0xb8] sm:$0x3]  ;;  %v345_v31 = vld [vmem:[#allocation2 + $0xd0] sm:$0x3] }
  0x69   :  { %v1323_v24 = vadd.f32 %v1110_v54, %v1034_v5  ;;  %v3089_v57 = vadd.f32 %v1117_v43, %v1037_v37  ;;  %v3092_v62 = vadd.f32 %v3064_v10, %v436_v39  ;;  %v1325_v63 = vadd.f32 %v1115_v49, %v1036_v41 }
  0x6a   :  { %v1118_v16 = vrot.slane %v626_v60, 2  ;;  %v835_v37 = vrot.slane %v3082_v4, 1  ;;  %v837_v27 = vrot.slane %v631_v32, 1  ;;  %v440_v43 = vadd.f32 %v3052_v38, %v2977_v40 }
  0x6b   :  { %v834_v54 = vrot.slane %v3092_v62, 1 }
  0x7d   :  { %v3036_v1 = vpop.permute.xlu1 %1425  ;;  %v3038_v6 = vpop.permute.xlu0 %1415 }
  0x7e   :  { %v3058_v17 = vmul.f32 %v3038_v6, %v2871_v22  ;;  %v1122_v22 = vsel %vm1092_vm4, %v1119_v48, %v1121_v47  ;;  %v3075_v11 = vmul.f32 %v3036_v1, %v2860_v13  ;;  %v831_v47 = vsel %vm803_vm3, %v829_v42, %v830_v46  ;;  %v3129_v42 = vld [vmem:[#allocation2 + $0xd8] sm:$0xff] }
  0x7f   :  { %v3106_v36 = vadd.f32 %v1122_v22, %v1039_v26  ;;  %v439_v46 = vadd.f32 %v3064_v10, %v3023_v50  ;;  %v441_v26 = vadd.f32 %v345_v31, %v249_v18  ;;  %v3127_v22 = vld [vmem:[#allocation2 + $0xe0] sm:$0xff]  ;;  %v1120_v50 = vsel %vm1092_vm4, %v1118_v16, %v1119_v48 }
  0x80   :  { %5129 = vst [vmem:[#allocation3_spill] sm:$0xff] %v3058_v17  ;;  %5130 = vst [vmem:[#allocation4_spill] sm:$0xff] %v3075_v11  ;;  %v1637_v13 = vsel %vm17_vm0, %v3058_v17, 0.0  ;;  %v1123_v18 = vrot.slane %v3092_v62, 2 }
  0x81   :  { %v3066_v56 = vpop.permute.xlu1 %1430  ;;  %v3068_v25 = vpop.permute.xlu0 %1420  ;;  %v3149_v48 = vadd.f32 %v3129_v42, %v439_v46  ;;  %v443_v46 = vadd.f32 %v3127_v22, %v3052_v38 }
  0x82   :  { %v3079_v8 = vmul.f32 %v3068_v25, %v2943_v20  ;;  %v3098_v20 = vmul.f32 %v3066_v56, %v2933_v30  ;;  %v1640_v30 = vsel %vm17_vm0, %v3075_v11, 0.0  ;;  %v577_v11 = vld [vmem:[#allocation2 + $0x250] sm:$0x3] }
  0x84   :  { %5131 = vst [vmem:[#allocation5_spill] sm:$0xff] %v3079_v8  ;;  %5132 = vst [vmem:[#allocation6_spill] sm:$0xff] %v3098_v20  ;;  %v1638_v58 = vsel %vm17_vm0, %v3079_v8, 0.0  ;;  %v1642_v41 = vsel %vm17_vm0, %v3098_v20, 0.0 }
  0x85   :  { %v1639_v0 = vadd.f32 %v1638_v58, %v1637_v13  ;;  %v3102_v44 = vpop.permute.xlu1 %1440  ;;  %v3104_v23 = vpop.permute.xlu0 %1435 }
  0x86   :  { %v3113_v5 = vmul.f32 %v3104_v23, %v3007_v7  ;;  %v3125_v49 = vmul.f32 %v3102_v44, %v2951_v2  ;;  %v1038_v7 = vadd.f32 %v831_v47, %v626_v60  ;;  %v838_v47 = vsel %vm803_vm3, %v835_v37, %v837_v27 }
  0x87   :  { %v1641_v39 = vadd.f32 %v1640_v30, %v1639_v0  ;;  %v1124_v0 = vrot.slane %v3082_v4, 2  ;;  %v1126_v30 = vrot.slane %v631_v32, 2  ;;  %v634_v27 = vadd.f32 %v538_v34, %v441_v26 }
  0x88   :  { %5133 = vst [vmem:[#allocation7_spill] sm:$0xff] %v3113_v5  ;;  %5134 = vst [vmem:[#allocation8_spill] sm:$0xff] %v3125_v49  ;;  %v1644_v2 = vsel %vm17_vm0, %v3113_v5, 0.0  ;;  %v1646_v32 = vsel %vm17_vm0, %v3125_v49, 0.0  ;;  %v1327_v16 = vadd.f32 %v1120_v50, %v1038_v7  ;;  %v3173_v50 = vld [vmem:[#allocation2 + $0xf8] sm:$0xff] }
  0x89   :  { %v1643_v13 = vadd.f32 %v1642_v41, %v1641_v39  ;;  %v3131_v58 = vpop.permute.xlu1 %1450  ;;  %v3133_v40 = vpop.permute.xlu0 %1445  ;;  %v836_v39 = vsel %vm803_vm3, %v834_v54, %v835_v37  ;;  %v3146_v41 = vadd.f32 %v3127_v22, %v440_v43  ;;  %v1041_v37 = vadd.f32 %v838_v47, %v3082_v4  ;;  %v252_v54 = vld [vmem:[#allocation2 + $0xd0] sm:$0x3]  ;;  %v348_v43 = vld [vmem:[#allocation2 + $0xe8] sm:$0x3] }
  0x8a   :  { %v3140_v60 = vmul.f32 %v3133_v40, %v1323_v24  ;;  %v3155_v24 = vmul.f32 %v3131_v58, %v3015_v33  ;;  %v1127_v7 = vsel %vm1092_vm4, %v1124_v0, %v1126_v30  ;;  %v1040_v26 = vadd.f32 %v836_v39, %v3092_v62  ;;  %v3175_v4 = vld [vmem:[#allocation2 + $0xf0] sm:$0xff] }
  0x8b   :  { %v1645_v31 = vadd.f32 %v1644_v2, %v1643_v13  ;;  %v442_v2 = vadd.f32 %v3129_v42, %v3064_v10  ;;  %v1125_v38 = vsel %vm1092_vm4, %v1123_v18, %v1124_v0  ;;  %v839_v10 = vrot.slane %v3149_v48, 1  ;;  %v541_v0 = vld [vmem:[#allocation2 + $0x100] sm:$0x3] }
  0x8c   :  { %5135 = vst [vmem:[#allocation9_spill] sm:$0xff] %v3140_v60  ;;  %5136 = vst [vmem:[#allocation10_spill] sm:$0xff] %v3155_v24  ;;  %v1648_v33 = vsel %vm17_vm0, %v3140_v60, 0.0  ;;  %v842_v30 = vrot.slane %v634_v27, 1  ;;  %v444_v62 = vadd.f32 %v348_v43, %v252_v54  ;;  %v3191_v18 = vadd.f32 %v3173_v50, %v443_v46 }
  0x8d   :  { %v1647_v53 = vadd.f32 %v1646_v32, %v1645_v31  ;;  %v3157_v5 = vpop.permute.xlu1 %1460  ;;  %v3159_v13 = vpop.permute.xlu0 %1455  ;;  %v840_v31 = vrot.slane %v3146_v41, 1  ;;  %v1650_v32 = vsel %vm17_vm0, %v3155_v24, 0.0  ;;  %v1329_v20 = vadd.f32 %v1125_v38, %v1040_v26 }
  0x8e   :  { %5137 = vst [vmem:[#allocation11_spill] sm:$0xff] %v3157_v5  ;;  %5138 = vst [vmem:[#allocation12_spill] sm:$0xff] %v3159_v13  ;;  %v3169_v34 = vmul.f32 %v3159_v13, %v1325_v63  ;;  %v3184_v63 = vmul.f32 %v3157_v5, %v3089_v57  ;;  %v1129_v54 = vrot.slane %v3146_v41, 2  ;;  %v446_v38 = vadd.f32 %v3173_v50, %v3127_v22  ;;  %v559_v5 = vld [vmem:[#allocation2 + $0x190] sm:$0x3] }
  0x8f   :  { %v1649_v47 = vadd.f32 %v1648_v33, %v1647_v53  ;;  %v1330_v53 = vadd.f32 %v1127_v7, %v1041_v37  ;;  %v635_v33 = vadd.f32 %v3175_v4, %v442_v2  ;;  %v1128_v37 = vrot.slane %v3149_v48, 2 }
  0x90   :  { %5139 = vst [vmem:[#allocation13_spill] sm:$0xff] %v3169_v34  ;;  %5140 = vst [vmem:[#allocation14_spill] sm:$0xff] %v3184_v63  ;;  %v1652_v24 = vsel %vm17_vm0, %v3169_v34, 0.0  ;;  %v1654_v46 = vsel %vm17_vm0, %v3184_v63, 0.0  ;;  %v843_v7 = vsel %vm803_vm3, %v840_v31, %v842_v30  ;;  %v255_v63 = vld [vmem:[#allocation2 + $0xe8] sm:$0x3] }
  0x91   :  { %v1651_v39 = vadd.f32 %v1650_v32, %v1649_v47  ;;  %v3186_v60 = vpop.permute.xlu1 %1470  ;;  %v3188_v49 = vpop.permute.xlu0 %1465  ;;  %v1131_v47 = vrot.slane %v634_v27, 2  ;;  %v841_v32 = vsel %vm803_vm3, %v839_v10, %v840_v31  ;;  %v844_v27 = vrot.slane %v635_v33, 1  ;;  %v351_v31 = vld [vmem:[#allocation2 + $0x100] sm:$0x3]  ;;  %v3220_v30 = vld [vmem:[#allocation2 + $0x110] sm:$0xff] }
  0x92   :  { %5141 = vst [vmem:[#allocation15_spill] sm:$0xff] %v3186_v60  ;;  %5142 = vst [vmem:[#allocation16_spill] sm:$0xff] %v3188_v49  ;;  %v3197_v57 = vmul.f32 %v3188_v49, %v1327_v16  ;;  %v3206_v2 = vmul.f32 %v3186_v60, %v3106_v36  ;;  %v637_v16 = vadd.f32 %v541_v0, %v444_v62  ;;  %v1134_v8 = vrot.slane %v3191_v18, 2 }
  0x93   :  { %v1653_v43 = vadd.f32 %v1652_v24, %v1651_v39  ;;  %v845_v24 = vrot.slane %v3191_v18, 1  ;;  %v1042_v36 = vadd.f32 %v841_v32, %v3149_v48  ;;  %v445_v62 = vadd.f32 %v3175_v4, %v3129_v42 }
  0x94   :  { %5143 = vst [vmem:[#allocation17_spill] sm:$0xff] %v3197_v57  ;;  %5144 = vst [vmem:[#allocation18_spill] sm:$0xff] %v3206_v2  ;;  %v1656_v10 = vsel %vm17_vm0, %v3197_v57, 0.0  ;;  %v1043_v22 = vadd.f32 %v843_v7, %v3146_v41  ;;  %v1130_v57 = vsel %vm1092_vm4, %v1128_v37, %v1129_v54  ;;  %v1658_v48 = vsel %vm17_vm0, %v3206_v2, 0.0  ;;  %v544_v7 = vld [vmem:[#allocation2 + $0x118] sm:$0x3] }
  0x95   :  { %v1655_v34 = vadd.f32 %v1654_v46, %v1653_v43  ;;  %v3209_v26 = vpop.permute.xlu0 %1475  ;;  %v3224_v43 = vpop.permute.xlu1 %1480  ;;  %v1132_v46 = vsel %vm1092_vm4, %v1129_v54, %v1131_v47  ;;  %v847_v32 = vrot.slane %v637_v16, 1  ;;  %v1133_v17 = vrot.slane %v635_v33, 2 }
  0x96   :  { %5145 = vst [vmem:[#allocation19_spill] sm:$0xff] %v3209_v26  ;;  %v3217_v39 = vmul.f32 %v3209_v26, %v1329_v20  ;;  %5147 = vst [vmem:[#allocation21_spill] sm:$0xff] %v3224_v43  ;;  %v3229_v20 = vld [vmem:[#allocation2 + $0x108] sm:$0xff]  ;;  %v3236_v41 = vadd.f32 %v3220_v30, %v446_v38  ;;  %v3239_v47 = vmul.f32 %v3224_v43, %v1330_v53  ;;  %v258_v43 = vld [vmem:[#allocation2 + $0x100] sm:$0x3] }
  0x97   :  { %v1657_v0 = vadd.f32 %v1656_v10, %v1655_v34  ;;  %v846_v34 = vsel %vm803_vm3, %v844_v27, %v845_v24  ;;  %v447_v10 = vadd.f32 %v351_v31, %v255_v63  ;;  %v1331_v37 = vadd.f32 %v1130_v57, %v1042_v36 }
  0x98   :  { %5146 = vst [vmem:[#allocation20_spill] sm:$0xff] %v3217_v39  ;;  %5148 = vst [vmem:[#allocation22_spill] sm:$0xff] %v3239_v47  ;;  %v1660_v54 = vsel %vm17_vm0, %v3217_v39, 0.0  ;;  %v638_v2 = vadd.f32 %v3229_v20, %v445_v62  ;;  %v1066_v26 = vadd.f32 %v3087_v61, %v3004_v55  ;;  %v5150_v63 = vrot.slane %v3004_v55, 2 }
  0x99   :  { %v1659_v42 = vadd.f32 %v1658_v48, %v1657_v0  ;;  %v5149_v0 = vrot.slane %v2939_v19, 2  ;;  %v3252_v38 = vadd.f32 %v577_v11, %v3020_v45  ;;  %v3254_v31 = vpop.permute.xlu0 %1485  ;;  %v1332_v48 = vadd.f32 %v1132_v46, %v1043_v22  ;;  %v354_v46 = vld [vmem:[#allocation2 + $0x118] sm:$0x3] }
  0x9a   :  { %5151 = vst [vmem:[#allocation23_spill] sm:$0xff] %v3254_v31  ;;  %v848_v57 = vsel %vm803_vm3, %v845_v24, %v847_v32  ;;  %v1136_v36 = vrot.slane %v637_v16, 2  ;;  %v1044_v62 = vadd.f32 %v846_v34, %v635_v33  ;;  %v1135_v39 = vsel %vm1092_vm4, %v1133_v17, %v1134_v8  ;;  %v3266_v24 = vld [vmem:[#allocation2 + $0x128] sm:$0xff]  ;;  %v3274_v32 = vpop.permute.xlu1 %1490  ;;  %v3276_v34 = vld [vmem:[#allocation2 + $0x120] sm:$0xff] }
  0x9b   :  { %v1190_v27 = vsel %vm1092_vm4, %v5150_v63, %v5149_v0  ;;  %v1661_v53 = vadd.f32 %v1660_v54, %v1659_v42  ;;  %v640_v61 = vadd.f32 %v544_v7, %v447_v10  ;;  %v850_v19 = vrot.slane %v3236_v41, 1  ;;  %5153 = vst [vmem:[#allocation25_spill] sm:$0xff] %v3274_v32 }
  0x9c   :  { %v449_v55 = vadd.f32 %v3220_v30, %v3173_v50  ;;  %v1662_v45 = vsel %vm17_vm0, %v3239_v47, 0.0  ;;  %v3264_v11 = vmul.f32 %v3254_v31, %v1331_v37  ;;  %v849_v22 = vrot.slane %v638_v2, 1 }
  0x9d   :  { %v448_v17 = vadd.f32 %v3229_v20, %v3175_v4  ;;  %v907_v16 = vrot.slane %v3252_v38, 1  ;;  %v478_v50 = vadd.f32 %v2982_v9, %v2903_v51  ;;  %v1663_v42 = vadd.f32 %v1662_v45, %v1661_v53  ;;  %v3281_v4 = vld [vmem:[#allocation2 + $0x240] sm:$0xff] }
  0x9e   :  { %5152 = vst [vmem:[#allocation24_spill] sm:$0xff] %v3264_v11  ;;  %v1045_v10 = vadd.f32 %v848_v57, %v3191_v18  ;;  %v1137_v54 = vsel %vm1092_vm4, %v1134_v8, %v1136_v36  ;;  %v1333_v37 = vadd.f32 %v1135_v39, %v1044_v62  ;;  %v1139_v7 = vrot.slane %v3236_v41, 2  ;;  %v547_v8 = vld [vmem:[#allocation2 + $0x130] sm:$0x3] }
  0x9f   :  { %v852_v0 = vrot.slane %v640_v61, 1  ;;  %v1138_v63 = vrot.slane %v638_v2, 2  ;;  %v450_v33 = vadd.f32 %v354_v46, %v258_v43  ;;  %v3284_v47 = vadd.f32 %v3266_v24, %v449_v55  ;;  %v3297_v55 = vpop.permute.xlu0 %1495 }
  0xa0   :  { %v3287_v51 = vmul.f32 %v3274_v32, %v1332_v48  ;;  %v1664_v53 = vsel %vm17_vm0, %v3264_v11, 0.0  ;;  %v851_v18 = vsel %vm803_vm3, %v849_v22, %v850_v19  ;;  %v641_v39 = vadd.f32 %v3276_v34, %v448_v17  ;;  %5155 = vst [vmem:[#allocation27_spill] sm:$0xff] %v3297_v55 }
  0xa1   :  { %v3293_v57 = vadd.f32 %v1190_v27, %v1066_v26  ;;  %v1196_v43 = vrot.slane %v3252_v38, 2  ;;  %v1665_v62 = vadd.f32 %v1664_v53, %v1663_v42  ;;  %v5156_v48 = vrot.slane %v3049_v3, 1 }
  0xa2   :  { %5154 = vst [vmem:[#allocation26_spill] sm:$0xff] %v3287_v51  ;;  %v3303_v46 = vadd.f32 %v3281_v4, %v478_v50  ;;  %v1334_v22 = vadd.f32 %v1137_v54, %v1045_v10  ;;  %v1141_v11 = vrot.slane %v640_v61, 2  ;;  %v853_v17 = vsel %vm803_vm3, %v850_v19, %v852_v0  ;;  %v3316_v10 = vpop.permute.xlu1 %1500  ;;  %v261_v19 = vld [vmem:[#allocation2 + $0x118] sm:$0x3] }
  0xa3   :  { %v908_v45 = vsel %vm803_vm3, %v5156_v48, %v907_v16  ;;  %v1046_v26 = vadd.f32 %v851_v18, %v638_v2  ;;  %v1140_v27 = vsel %vm1092_vm4, %v1138_v63, %v1139_v7  ;;  %v3307_v36 = vadd.f32 %v547_v8, %v450_v33  ;;  %5158 = vst [vmem:[#allocation29_spill] sm:$0xff] %v3316_v10  ;;  %v357_v2 = vld [vmem:[#allocation2 + $0x130] sm:$0x3]  ;;  %v291_v18 = vld [vmem:[#allocation2 + $0x238] sm:$0x3]  ;;  %v3342_v31 = vpop.permute.xlu0 %1505 }
  0xa4   :  { %v1666_v38 = vsel %vm17_vm0, %v3287_v51, 0.0  ;;  %v3312_v42 = vmul.f32 %v3297_v55, %v1333_v37  ;;  %v855_v16 = vrot.slane %v3284_v47, 1  ;;  %v854_v53 = vrot.slane %v641_v39, 1  ;;  %5161 = vst [vmem:[#allocation31_spill] sm:$0xff] %v3342_v31 }
  0xa5   :  { %v1069_v50 = vadd.f32 %v908_v45, %v3049_v3  ;;  %v1667_v61 = vadd.f32 %v1666_v38, %v1665_v62  ;;  %v452_v33 = vadd.f32 %v3266_v24, %v3220_v30  ;;  %v451_v54 = vadd.f32 %v3276_v34, %v3229_v20  ;;  %v3328_v62 = vld [vmem:[#allocation2 + $0x140] sm:$0xff]  ;;  %v3330_v45 = vld [vmem:[#allocation2 + $0x138] sm:$0xff]  ;;  %v387_v38 = vld [vmem:[#allocation2 + $0x250] sm:$0x3] }
  0xa6   :  { %5157 = vst [vmem:[#allocation28_spill] sm:$0xff] %v3312_v42  ;;  %v5159_v0 = vrot.slane %v3049_v3, 2  ;;  %v904_v63 = vrot.slane %v3303_v46, 1  ;;  %v1047_v8 = vadd.f32 %v853_v17, %v3236_v41  ;;  %v1142_v48 = vsel %vm1092_vm4, %v1139_v7, %v1141_v11 }
  0xa7   :  { %v1335_v30 = vadd.f32 %v1140_v27, %v1046_v26  ;;  %v857_v51 = vrot.slane %v3307_v36, 1  ;;  %v1144_v20 = vrot.slane %v3284_v47, 2  ;;  %v1143_v55 = vrot.slane %v641_v39, 2  ;;  %v550_v26 = vld [vmem:[#allocation2 + $0x148] sm:$0x3] }
  0xa8   :  { %v1197_v37 = vsel %vm1092_vm4, %v5159_v0, %v1196_v43  ;;  %v3335_v43 = vmul.f32 %v3316_v10, %v1334_v22  ;;  %v1668_v0 = vsel %vm17_vm0, %v3312_v42, 0.0  ;;  %v856_v41 = vsel %vm803_vm3, %v854_v53, %v855_v16 }
  0xa9   :  { %v453_v11 = vadd.f32 %v357_v2, %v261_v19  ;;  %v482_v7 = vadd.f32 %v3032_v15, %v2923_v59  ;;  %v1669_v17 = vadd.f32 %v1668_v0, %v1667_v61  ;;  %v3345_v27 = vadd.f32 %v3328_v62, %v452_v33  ;;  %v3354_v2 = vld [vmem:[#allocation2 + $0x260] sm:$0xff]  ;;  %v580_v59 = vld [vmem:[#allocation2 + $0x268] sm:$0x3] }
  0xaa   :  { %5160 = vst [vmem:[#allocation30_spill] sm:$0xff] %v3335_v43  ;;  %v644_v32 = vadd.f32 %v3330_v45, %v451_v54  ;;  %v3348_v22 = vadd.f32 %v1197_v37, %v1069_v50  ;;  %v5163_v10 = vrot.slane %v3049_v3, 1  ;;  %v1193_v53 = vrot.slane %v3303_v46, 2 }
  0xab   :  { %v483_v19 = vadd.f32 %v387_v38, %v291_v18  ;;  %v1336_v61 = vadd.f32 %v1142_v48, %v1047_v8  ;;  %v858_v0 = vsel %vm803_vm3, %v855_v16, %v857_v51  ;;  %v1146_v33 = vrot.slane %v3307_v36, 2  ;;  %v3369_v18 = vpop.permute.xlu1 %1510  ;;  %v264_v38 = vld [vmem:[#allocation2 + $0x130] sm:$0x3] }
  0xac   :  { %5162 = vst [vmem:[#allocation32_spill] sm:$0xff] %v3348_v22  ;;  %v906_v42 = vsel %vm803_vm3, %v904_v63, %v5163_v10  ;;  %v1048_v49 = vadd.f32 %v856_v41, %v641_v39  ;;  %v1670_v50 = vsel %vm17_vm0, %v3335_v43, 0.0  ;;  %v3361_v54 = vmul.f32 %v3342_v31, %v1335_v30  ;;  %5165 = vst [vmem:[#allocation34_spill] sm:$0xff] %v3369_v18  ;;  %v360_v30 = vld [vmem:[#allocation2 + $0x148] sm:$0x3] }
  0xad   :  { %v1145_v10 = vsel %vm1092_vm4, %v1143_v55, %v1144_v20  ;;  %v3364_v37 = vadd.f32 %v550_v26, %v453_v11  ;;  %v3367_v63 = vadd.f32 %v3354_v2, %v482_v7  ;;  %v1671_v8 = vadd.f32 %v1670_v50, %v1669_v17 }
  0xae   :  { %5164 = vst [vmem:[#allocation33_spill] sm:$0xff] %v3361_v54  ;;  %v860_v51 = vrot.slane %v3345_v27, 1  ;;  %v859_v36 = vrot.slane %v644_v32, 1  ;;  %v5166_v39 = vrot.slane %v3049_v3, 2  ;;  %v3375_v48 = vadd.f32 %v580_v59, %v483_v19  ;;  %v3384_v3 = vld [vmem:[#allocation2 + $0x158] sm:$0xff] }
  0xaf   :  { %v455_v55 = vadd.f32 %v3328_v62, %v3266_v24  ;;  %v454_v41 = vadd.f32 %v3330_v45, %v3276_v34  ;;  %v1068_v11 = vadd.f32 %v906_v42, %v3303_v46  ;;  %v1049_v7 = vadd.f32 %v858_v0, %v3284_v47  ;;  %v3395_v42 = vpop.permute.xlu0 %1515 }
  0xb0   :  { %v1195_v16 = vsel %vm1092_vm4, %v1193_v53, %v5166_v39  ;;  %v1147_v17 = vsel %vm1092_vm4, %v1144_v20, %v1146_v33  ;;  %v1337_v26 = vadd.f32 %v1145_v10, %v1048_v49  ;;  %v3386_v53 = vld [vmem:[#allocation2 + $0x150] sm:$0xff]  ;;  %v3389_v19 = vmul.f32 %v3369_v18, %v1336_v61  ;;  %5168 = vst [vmem:[#allocation36_spill] sm:$0xff] %v3395_v42  ;;  %v553_v61 = vld [vmem:[#allocation2 + $0x160] sm:$0x3]  ;;  %v3416_v39 = vpop.permute.xlu1 %1520 }
  0xb1   :  { %v1672_v24 = vsel %vm17_vm0, %v3361_v54, 0.0  ;;  %v862_v59 = vrot.slane %v3364_v37, 1  ;;  %v1149_v34 = vrot.slane %v3345_v27, 2  ;;  %v861_v47 = vsel %vm803_vm3, %v859_v36, %v860_v51  ;;  %v3408_v54 = vld [vmem:[#allocation2 + $0x258] sm:$0xff]  ;;  %5170 = vst [vmem:[#allocation38_spill] sm:$0xff] %v3416_v39 }
  0xb2   :  { %5167 = vst [vmem:[#allocation35_spill] sm:$0xff] %v3389_v19  ;;  %v1673_v46 = vadd.f32 %v1672_v24, %v1671_v8  ;;  %v1148_v49 = vrot.slane %v644_v32, 2  ;;  %v456_v20 = vadd.f32 %v360_v30, %v264_v38  ;;  %v912_v33 = vrot.slane %v3375_v48, 1  ;;  %v294_v38 = vld [vmem:[#allocation2 + $0x250] sm:$0x3] }
  0xb3   :  { %v3401_v50 = vadd.f32 %v3384_v3, %v455_v55  ;;  %v647_v10 = vadd.f32 %v3386_v53, %v454_v41  ;;  %v1201_v8 = vrot.slane %v3375_v48, 2  ;;  %v481_v24 = vadd.f32 %v3281_v4, %v2982_v9  ;;  %v390_v30 = vld [vmem:[#allocation2 + $0x268] sm:$0x3] }
  0xb4   :  { %v1338_v36 = vadd.f32 %v1147_v17, %v1049_v7  ;;  %v1674_v0 = vsel %vm17_vm0, %v3389_v19, 0.0  ;;  %v3413_v55 = vmul.f32 %v3395_v42, %v1337_v26  ;;  %v863_v41 = vsel %vm803_vm3, %v860_v51, %v862_v59 }
  0xb5   :  { %v1050_v43 = vadd.f32 %v861_v47, %v644_v32  ;;  %v1675_v48 = vadd.f32 %v1674_v0, %v1673_v46  ;;  %v1151_v31 = vrot.slane %v3364_v37, 2  ;;  %v1150_v9 = vsel %vm1092_vm4, %v1148_v49, %v1149_v34  ;;  %v267_v37 = vld [vmem:[#allocation2 + $0x148] sm:$0x3]  ;;  %v363_v46 = vld [vmem:[#allocation2 + $0x160] sm:$0x3]  ;;  %v3441_v0 = vld [vmem:[#allocation2 + $0x170] sm:$0xff] }
  0xb6   :  { %5169 = vst [vmem:[#allocation37_spill] sm:$0xff] %v3413_v55  ;;  %v649_v7 = vadd.f32 %v553_v61, %v456_v20  ;;  %v3420_v17 = vadd.f32 %v1195_v16, %v1068_v11  ;;  %v5172_v18 = vrot.slane %v3367_v63, 1  ;;  %v865_v26 = vrot.slane %v3401_v50, 1  ;;  %v3433_v11 = vld [vmem:[#allocation2 + $0x278] sm:$0xff]  ;;  %v3444_v61 = vpop.permute.xlu0 %1525 }
  0xb7   :  { %v864_v42 = vrot.slane %v647_v10, 1  ;;  %v3427_v51 = vadd.f32 %v3408_v54, %v481_v24  ;;  %v485_v32 = vadd.f32 %v3354_v2, %v3032_v15  ;;  %v486_v59 = vadd.f32 %v390_v30, %v294_v38  ;;  %5174 = vst [vmem:[#allocation41_spill] sm:$0xff] %v3444_v61  ;;  %v3447_v38 = vld [vmem:[#allocation2 + $0x168] sm:$0xff] }
  0xb8   :  { %5171 = vst [vmem:[#allocation39_spill] sm:$0xff] %v3420_v17  ;;  %v913_v19 = vsel %vm803_vm3, %v5172_v18, %v912_v33  ;;  %v458_v16 = vadd.f32 %v3384_v3, %v3328_v62  ;;  %v3436_v47 = vmul.f32 %v3416_v39, %v1338_v36  ;;  %v1676_v18 = vsel %vm17_vm0, %v3413_v55, 0.0 }
  0xb9   :  { %v1051_v49 = vadd.f32 %v863_v41, %v3345_v27  ;;  %v1339_v20 = vadd.f32 %v1150_v9, %v1050_v43  ;;  %v1677_v15 = vadd.f32 %v1676_v18, %v1675_v48  ;;  %v1152_v33 = vsel %vm1092_vm4, %v1149_v34, %v1151_v31  ;;  %v583_v34 = vld [vmem:[#allocation2 + $0x280] sm:$0x3]  ;;  %v556_v9 = vld [vmem:[#allocation2 + $0x178] sm:$0x3] }
  0xba   :  { %5173 = vst [vmem:[#allocation40_spill] sm:$0xff] %v3436_v47  ;;  %v867_v24 = vrot.slane %v649_v7, 1  ;;  %v1154_v62 = vrot.slane %v3401_v50, 2  ;;  %v866_v36 = vsel %vm803_vm3, %v864_v42, %v865_v26  ;;  %v1153_v30 = vrot.slane %v647_v10, 2 }
  0xbb   :  { %v459_v39 = vadd.f32 %v363_v46, %v267_v37  ;;  %v457_v27 = vadd.f32 %v3386_v53, %v3330_v45  ;;  %v5175_v43 = vrot.slane %v3367_v63, 2  ;;  %v909_v31 = vrot.slane %v3427_v51, 1  ;;  %v3470_v46 = vpop.permute.xlu1 %1530 }
  0xbc   :  { %v3459_v48 = vadd.f32 %v3433_v11, %v485_v32  ;;  %v3462_v18 = vadd.f32 %v3441_v0, %v458_v16  ;;  %v1678_v42 = vsel %vm17_vm0, %v3436_v47, 0.0  ;;  %v1340_v37 = vadd.f32 %v1152_v33, %v1051_v49  ;;  %5177 = vst [vmem:[#allocation43_spill] sm:$0xff] %v3470_v46 }
  0xbd   :  { %v3455_v41 = vsel %vm1092_vm4, %v5175_v43, %v1201_v8  ;;  %v3467_v45 = vmul.f32 %v3444_v61, %v1339_v20  ;;  %v650_v8 = vadd.f32 %v3447_v38, %v457_v27  ;;  %v1679_v43 = vadd.f32 %v1678_v42, %v1677_v15  ;;  %v270_v27 = vld [vmem:[#allocation2 + $0x160] sm:$0x3]  ;;  %v366_v61 = vld [vmem:[#allocation2 + $0x178] sm:$0x3]  ;;  %v558_v15 = vld [vmem:[#allocation2 + $0x188] sm:$0xff] }
  0xbe   :  { %v868_v55 = vsel %vm803_vm3, %v865_v26, %v867_v24  ;;  %v1156_v32 = vrot.slane %v649_v7, 2  ;;  %v1052_v60 = vadd.f32 %v866_v36, %v647_v10  ;;  %v3474_v16 = vadd.f32 %v583_v34, %v486_v59 }
  0xbf   :  { %5176 = vst [vmem:[#allocation42_spill] sm:$0xff] %v3467_v45  ;;  %v1155_v22 = vsel %vm1092_vm4, %v1153_v30, %v1154_v62  ;;  %v652_v47 = vadd.f32 %v556_v9, %v459_v39  ;;  %v3478_v49 = vadd.f32 %v913_v19, %v3367_v63  ;;  %v870_v20 = vrot.slane %v3462_v18, 1  ;;  %v3495_v9 = vpop.permute.xlu0 %1535 }
  0xc0   :  { %v869_v33 = vrot.slane %v650_v8, 1  ;;  %v461_v26 = vadd.f32 %v3441_v0, %v3384_v3  ;;  %v5178_v10 = vrot.slane %v3367_v63, 1  ;;  %v3487_v59 = vmul.f32 %v3470_v46, %v1340_v37  ;;  %5180 = vst [vmem:[#allocation45_spill] sm:$0xff] %v3495_v9 }
  0xc1   :  { %v1680_v39 = vsel %vm17_vm0, %v3467_v45, 0.0  ;;  %v1053_v19 = vadd.f32 %v868_v55, %v3401_v50  ;;  %v1157_v30 = vsel %vm1092_vm4, %v1154_v62, %v1156_v32  ;;  %v1341_v34 = vadd.f32 %v1155_v22, %v1052_v60 }
  0xc2   :  { %v911_v7 = vsel %vm803_vm3, %v909_v31, %v5178_v10  ;;  %5179 = vst [vmem:[#allocation44_spill] sm:$0xff] %v3487_v59  ;;  %v1681_v36 = vadd.f32 %v1680_v39, %v1679_v43  ;;  %v917_v3 = vrot.slane %v3474_v16, 1  ;;  %v872_v31 = vrot.slane %v652_v47, 1  ;;  %v3503_v43 = vld [vmem:[#allocation2 + $0x180] sm:$0xff] }
  0xc3   :  { %v462_v42 = vadd.f32 %v366_v61, %v270_v27  ;;  %v460_v37 = vadd.f32 %v3447_v38, %v3386_v53  ;;  %v1159_v10 = vrot.slane %v3462_v18, 2  ;;  %v871_v50 = vsel %vm803_vm3, %v869_v33, %v870_v20  ;;  %v3510_v61 = vld [vmem:[#allocation2 + $0x270] sm:$0xff]  ;;  %v297_v33 = vld [vmem:[#allocation2 + $0x268] sm:$0x3]  ;;  %v393_v27 = vld [vmem:[#allocation2 + $0x280] sm:$0x3] }
  0xc4   :  { %v1158_v55 = vrot.slane %v650_v8, 2  ;;  %v3501_v24 = vadd.f32 %v558_v15, %v461_v26  ;;  %v3506_v60 = vadd.f32 %v911_v7, %v3427_v51  ;;  %v484_v22 = vadd.f32 %v3408_v54, %v3281_v4  ;;  %v3515_v26 = vpop.permute.xlu1 %1540 }
  0xc5   :  { %v1682_v53 = vsel %vm17_vm0, %v3487_v59, 0.0  ;;  %v1342_v62 = vadd.f32 %v1157_v30, %v1053_v19  ;;  %5181 = vst [vmem:[#allocation46_spill] sm:$0xff] %v3515_v26  ;;  %v3518_v39 = vmul.f32 %v3495_v9, %v1341_v34  ;;  %v1161_v45 = vrot.slane %v652_v47, 2 }
  0xc6   :  { %v1683_v7 = vadd.f32 %v1682_v53, %v1681_v36  ;;  %v873_v46 = vsel %vm803_vm3, %v870_v20, %v872_v31  ;;  %v1054_v4 = vadd.f32 %v871_v50, %v650_v8  ;;  %v3521_v13 = vadd.f32 %v559_v5, %v462_v42  ;;  %v273_v20 = vld [vmem:[#allocation2 + $0x178] sm:$0x3]  ;;  %v369_v31 = vld [vmem:[#allocation2 + $0x190] sm:$0x3] }
  0xc7   :  { %5182 = vst [vmem:[#allocation47_spill] sm:$0xff] %v3518_v39  ;;  %v653_v17 = vadd.f32 %v3503_v43, %v460_v37  ;;  %v5183_v19 = vrot.slane %v3459_v48, 1  ;;  %v1206_v32 = vrot.slane %v3474_v16, 2  ;;  %v1160_v59 = vsel %vm1092_vm4, %v1158_v55, %v1159_v10  ;;  %v3538_v42 = vld [vmem:[#allocation2 + $0x290] sm:$0xff] }
  0xc8   :  { %v875_v34 = vrot.slane %v3501_v24, 1  ;;  %v3531_v36 = vadd.f32 %v3510_v61, %v484_v22  ;;  %v488_v47 = vadd.f32 %v3433_v11, %v3354_v2  ;;  %v489_v5 = vadd.f32 %v393_v27, %v297_v33  ;;  %v561_v33 = vld [vmem:[#allocation2 + $0x1a0] sm:$0xff]  ;;  %v3546_v27 = vpop.permute.xlu0 %1545 }
  0xc9   :  { %v918_v30 = vsel %vm803_vm3, %v5183_v19, %v917_v3  ;;  %v3536_v8 = vmul.f32 %v3515_v26, %v1342_v62  ;;  %v586_v3 = vld [vmem:[#allocation2 + $0x298] sm:$0x3]  ;;  %v1684_v16 = vsel %vm17_vm0, %v3518_v39, 0.0  ;;  %v1055_v37 = vadd.f32 %v873_v46, %v3462_v18 }
  0xca   :  { %v1162_v50 = vsel %vm1092_vm4, %v1159_v10, %v1161_v45  ;;  %v874_v55 = vrot.slane %v653_v17, 1  ;;  %v1685_v22 = vadd.f32 %v1684_v16, %v1683_v7  ;;  %v1343_v53 = vadd.f32 %v1160_v59, %v1054_v4  ;;  %v562_v10 = vld [vmem:[#allocation2 + $0x1a8] sm:$0x3] }
  0xcb   :  { %5184 = vst [vmem:[#allocation48_spill] sm:$0xff] %v3536_v8  ;;  %v877_v2 = vrot.slane %v3521_v13, 1  ;;  %v464_v62 = vadd.f32 %v558_v15, %v3441_v0  ;;  %v1164_v19 = vrot.slane %v3501_v24, 2  ;;  %v1163_v9 = vrot.slane %v653_v17, 2 }
  0xcc   :  { %v876_v26 = vsel %vm803_vm3, %v874_v55, %v875_v34  ;;  %v465_v39 = vadd.f32 %v369_v31, %v273_v20  ;;  %v5185_v18 = vrot.slane %v3367_v63, 2  ;;  %v5186_v45 = vrot.slane %v3427_v51, 2  ;;  %v300_v31 = vld [vmem:[#allocation2 + $0x280] sm:$0x3]  ;;  %v3576_v55 = vpop.permute.xlu1 %1550 }
  0xcd   :  { %v3558_v59 = vadd.f32 %v918_v30, %v3459_v48  ;;  %v3561_v0 = vadd.f32 %v3538_v42, %v488_v47  ;;  %v682_v15 = vadd.f32 %v586_v3, %v489_v5  ;;  %v5187_v7 = vrot.slane %v3459_v48, 2  ;;  %v396_v30 = vld [vmem:[#allocation2 + $0x298] sm:$0x3]  ;;  %5189 = vst [vmem:[#allocation50_spill] sm:$0xff] %v3576_v55 }
  0xce   :  { %v3555_v46 = vsel %vm1092_vm4, %v5186_v45, %v5185_v18  ;;  %v914_v63 = vrot.slane %v3531_v36, 1  ;;  %v1686_v51 = vsel %vm17_vm0, %v3536_v8, 0.0  ;;  %v3571_v20 = vadd.f32 %v561_v33, %v464_v62  ;;  %v3603_v8 = vpop.permute.xlu0 %1555 }
  0xcf   :  { %v3566_v4 = vsel %vm1092_vm4, %v5187_v7, %v1206_v32  ;;  %v1344_v16 = vadd.f32 %v1162_v50, %v1055_v37  ;;  %v3574_v47 = vmul.f32 %v3546_v27, %v1343_v53  ;;  %v1687_v5 = vadd.f32 %v1686_v51, %v1685_v22 }
  0xd0   :  { %v1056_v3 = vadd.f32 %v876_v26, %v653_v17  ;;  %v878_v32 = vsel %vm803_vm3, %v875_v34, %v877_v2  ;;  %v1166_v18 = vrot.slane %v3521_v13, 2  ;;  %v1165_v45 = vsel %vm1092_vm4, %v1163_v9, %v1164_v19  ;;  %v3587_v26 = vld [vmem:[#allocation2 + $0x288] sm:$0xff] }
  0xd1   :  { %5188 = vst [vmem:[#allocation49_spill] sm:$0xff] %v3574_v47  ;;  %v658_v7 = vadd.f32 %v562_v10, %v465_v39  ;;  %v922_v62 = vrot.slane %v682_v15, 1  ;;  %v487_v37 = vadd.f32 %v3510_v61, %v3408_v54  ;;  %v491_v50 = vadd.f32 %v3538_v42, %v3433_v11  ;;  %v3589_v34 = vld [vmem:[#allocation2 + $0x2a8] sm:$0xff] }
  0xd2   :  { %v1203_v17 = vrot.slane %v3531_v36, 2  ;;  %v492_v22 = vadd.f32 %v396_v30, %v300_v31  ;;  %v880_v13 = vrot.slane %v3571_v20, 1  ;;  %v3593_v39 = vmul.f32 %v3576_v55, %v1344_v16  ;;  %v589_v31 = vld [vmem:[#allocation2 + $0x2b0] sm:$0x3] }
  0xd3   :  { %v882_v9 = vrot.slane %v658_v7, 1  ;;  %v1688_v53 = vsel %vm17_vm0, %v3574_v47, 0.0  ;;  %v1057_v54 = vadd.f32 %v878_v32, %v3501_v24  ;;  %v1345_v2 = vadd.f32 %v1165_v45, %v1056_v3  ;;  %v560_v32 = vld [vmem:[#allocation2 + $0x198] sm:$0xff] }
  0xd4   :  { %v5190_v11 = vrot.slane %v3459_v48, 1  ;;  %v5094_v51 = vrot.slane %v3561_v0, 2  ;;  %v1689_v30 = vadd.f32 %v1688_v53, %v1687_v5  ;;  %v1167_v33 = vsel %vm1092_vm4, %v1164_v19, %v1166_v18 }
  0xd5   :  { %v5191_v16 = vrot.slane %v3561_v0, 1  ;;  %v1211_v47 = vrot.slane %v682_v15, 2  ;;  %v680_v24 = vadd.f32 %v3587_v26, %v487_v37  ;;  %v3610_v3 = vadd.f32 %v3589_v34, %v491_v50 }
  0xd6   :  { %v916_v10 = vsel %vm803_vm3, %v914_v63, %v5190_v11  ;;  %v883_v63 = vsel %vm803_vm3, %v880_v13, %v882_v9  ;;  %v1169_v45 = vrot.slane %v3571_v20, 2  ;;  %v1171_v5 = vrot.slane %v658_v7, 2  ;;  %v3627_v11 = vpop.permute.xlu1 %1560 }
  0xd7   :  { %v923_v55 = vsel %vm803_vm3, %v5191_v16, %v922_v62  ;;  %v463_v19 = vadd.f32 %v3503_v43, %v3447_v38  ;;  %v3616_v18 = vadd.f32 %v589_v31, %v492_v22  ;;  %v1690_v62 = vsel %vm17_vm0, %v3593_v39, 0.0 }
  0xd8   :  { %v1346_v15 = vadd.f32 %v1167_v33, %v1057_v54  ;;  %v3621_v37 = vmul.f32 %v3603_v8, %v1345_v2  ;;  %v1072_v50 = vadd.f32 %v916_v10, %v3531_v36  ;;  %v5192_v53 = vrot.slane %v3459_v48, 2  ;;  %v587_v54 = vld [vmem:[#allocation2 + $0x2a0] sm:$0xff] }
  0xd9   :  { %v1691_v7 = vadd.f32 %v1690_v62, %v1689_v30  ;;  %v656_v16 = vadd.f32 %v560_v32, %v463_v19  ;;  %v1075_v38 = vadd.f32 %v923_v55, %v3561_v0  ;;  %v1212_v43 = vsel %vm1092_vm4, %v5094_v51, %v1211_v47 }
  0xda   :  { %v1205_v9 = vsel %vm1092_vm4, %v1203_v17, %v5192_v53  ;;  %v490_v33 = vadd.f32 %v3587_v26, %v3510_v61  ;;  %v1059_v22 = vadd.f32 %v883_v63, %v3571_v20  ;;  %v919_v36 = vrot.slane %v680_v24, 1 }
  0xdb   :  { %v1172_v48 = vsel %vm1092_vm4, %v1169_v45, %v1171_v5  ;;  %v879_v17 = vrot.slane %v656_v16, 1  ;;  %v1168_v2 = vrot.slane %v656_v16, 2  ;;  %v925_v10 = vrot.slane %v3610_v3, 1 }
  0xdc   :  { %v927_v31 = vrot.slane %v3616_v18, 1  ;;  %v3640_v55 = vmul.f32 %v3627_v11, %v1346_v15  ;;  %v1692_v47 = vsel %vm17_vm0, %v3621_v37, 0.0  ;;  %v3646_v61 = vadd.f32 %v3455_v41, %v3478_v49  ;;  %v3662_v49 = vpop.permute.xlu1 %1570 }
  0xdd   :  { %v1693_v20 = vadd.f32 %v1692_v47, %v1691_v7  ;;  %v881_v30 = vsel %vm803_vm3, %v879_v17, %v880_v13  ;;  %v1170_v32 = vsel %vm1092_vm4, %v1168_v2, %v1169_v45  ;;  %v1208_v63 = vrot.slane %v680_v24, 2  ;;  %v3664_v13 = vpop.permute.xlu0 %1565  ;;  %v591_v2 = vld [vmem:[#allocation2 + $0x2c0] sm:$0xff] }
  0xde   :  { %v683_v5 = vadd.f32 %v587_v54, %v490_v33  ;;  %v1348_v19 = vadd.f32 %v1172_v48, %v1059_v22  ;;  %v1058_v62 = vadd.f32 %v881_v30, %v656_v16  ;;  %v3652_v15 = vadd.f32 %v3555_v46, %v3506_v60  ;;  %v303_v60 = vld [vmem:[#allocation2 + $0x298] sm:$0x3]  ;;  %v399_v46 = vld [vmem:[#allocation2 + $0x2b0] sm:$0x3]  ;;  %v402_v33 = vld [vmem:[#allocation2 + $0x2c8] sm:$0x3] }
  0xdf   :  { %v3656_v53 = vadd.f32 %v3566_v4, %v3558_v59  ;;  %v3658_v51 = vadd.f32 %v1205_v9, %v1072_v50  ;;  %v3660_v41 = vadd.f32 %v1212_v43, %v1075_v38  ;;  %v5193_v45 = vrot.slane %v3561_v0, 1  ;;  %v306_v43 = vld [vmem:[#allocation2 + $0x2b0] sm:$0x3] }
  0xe0   :  { %v928_v16 = vsel %vm803_vm3, %v925_v10, %v927_v31  ;;  %v1694_v59 = vsel %vm17_vm0, %v3640_v55, 0.0  ;;  %v1347_v4 = vadd.f32 %v1170_v32, %v1058_v62  ;;  %v1214_v50 = vrot.slane %v3610_v3, 2 }
  0xe1   :  { %v921_v7 = vsel %vm803_vm3, %v919_v36, %v5193_v45  ;;  %v1216_v9 = vrot.slane %v3616_v18, 2  ;;  %v494_v38 = vadd.f32 %v3589_v34, %v3538_v42  ;;  %v1695_v22 = vadd.f32 %v1694_v59, %v1693_v20 }
  0xe2   :  { %v5194_v36 = vrot.slane %v3561_v0, 2  ;;  %v924_v17 = vrot.slane %v683_v5, 1  ;;  %v3680_v31 = vmul.f32 %v3662_v49, %v1348_v19  ;;  %v3683_v47 = vmul.f32 %v3664_v13, %v1347_v4  ;;  %v592_v0 = vld [vmem:[#allocation2 + $0x2c8] sm:$0x3] }
  0xe3   :  { %v1074_v30 = vadd.f32 %v921_v7, %v680_v24  ;;  %v1077_v18 = vadd.f32 %v928_v16, %v3610_v3  ;;  %v495_v32 = vadd.f32 %v399_v46, %v303_v60  ;;  %v493_v42 = vadd.f32 %v587_v54, %v3587_v26  ;;  %v3699_v16 = vld [vmem:[#allocation2 + $0x2d8] sm:$0xff]  ;;  %v595_v26 = vld [vmem:[#allocation2 + $0x2e0] sm:$0x3] }
  0xe4   :  { %v1210_v48 = vsel %vm1092_vm4, %v1208_v63, %v5194_v36  ;;  %v3689_v20 = vmul.f32 %v3038_v6, %v2928_v12  ;;  %v3691_v63 = vld [vmem:[#allocation2 + $0x2b8] sm:$0xff]  ;;  %v497_v62 = vadd.f32 %v591_v2, %v3589_v34  ;;  %v498_v19 = vadd.f32 %v402_v33, %v306_v43 }
  0xe5   :  { %v1696_v45 = vsel %vm17_vm0, %v3683_v47, 0.0  ;;  %v1217_v24 = vsel %vm1092_vm4, %v1214_v50, %v1216_v9  ;;  %v1213_v7 = vrot.slane %v683_v5, 2  ;;  %v3697_v3 = vadd.f32 %v591_v2, %v494_v38  ;;  %v3712_v38 = vld [vmem:[#allocation2 + $0x2d0] sm:$0xff] }
  0xe6   :  { %v1697_v60 = vadd.f32 %v1696_v45, %v1695_v22  ;;  %v3703_v12 = vmul.f32 %v3068_v25, %v2945_v21  ;;  %v926_v6 = vsel %vm803_vm3, %v924_v17, %v925_v10  ;;  %v496_v34 = vadd.f32 %v3691_v63, %v587_v54 }
  0xe7   :  { %v1698_v46 = vsel %vm17_vm0, %v3680_v31, 0.0  ;;  %v3709_v59 = vadd.f32 %v1210_v48, %v1074_v30  ;;  %v688_v4 = vadd.f32 %v592_v0, %v495_v32  ;;  %v686_v9 = vadd.f32 %v3691_v63, %v493_v42  ;;  %v309_v32 = vld [vmem:[#allocation2 + $0x2c8] sm:$0x3] }
  0xe8   :  { %v1699_v43 = vadd.f32 %v1698_v46, %v1697_v60  ;;  %v3716_v33 = vmul.f32 %v3036_v1, %v2862_v14  ;;  %v1700_v21 = vsel %vm17_vm0, %v3689_v20, 0.0  ;;  %v690_v25 = vadd.f32 %v3699_v16, %v497_v62 }
  0xe9   :  { %v691_v54 = vadd.f32 %v595_v26, %v498_v19  ;;  %v3721_v10 = vadd.f32 %v1217_v24, %v1077_v18  ;;  %v1076_v22 = vadd.f32 %v926_v6, %v683_v5  ;;  %v1215_v36 = vsel %vm1092_vm4, %v1213_v7, %v1214_v50  ;;  %v405_v5 = vld [vmem:[#allocation2 + $0x2e0] sm:$0x3] }
  0xea   :  { %v1701_v48 = vadd.f32 %v1700_v21, %v1699_v43  ;;  %v3726_v17 = vmul.f32 %v3066_v56, %v2941_v35  ;;  %v1702_v14 = vsel %vm17_vm0, %v3703_v12, 0.0  ;;  %v930_v1 = vrot.slane %v3697_v3, 1  ;;  %v3750_v21 = vld [vmem:[#allocation2 + $0x2f0] sm:$0xff] }
  0xeb   :  { %v689_v30 = vadd.f32 %v3712_v38, %v496_v34  ;;  %v932_v42 = vrot.slane %v688_v4, 1  ;;  %v1219_v18 = vrot.slane %v3697_v3, 2  ;;  %v929_v0 = vrot.slane %v686_v9, 1 }
  0xec   :  { %v1703_v62 = vadd.f32 %v1702_v14, %v1701_v48  ;;  %v1704_v50 = vsel %vm17_vm0, %v3716_v33, 0.0  ;;  %v3737_v35 = vmul.f32 %v3104_v23, %v3013_v28  ;;  %v935_v56 = vrot.slane %v690_v25, 1 }
  0xed   :  { %v937_v19 = vrot.slane %v691_v54, 1  ;;  %v3741_v45 = vmul.f32 %v3102_v44, %v3000_v29  ;;  %v3743_v24 = vadd.f32 %v1215_v36, %v1076_v22  ;;  %v1221_v7 = vrot.slane %v688_v4, 2  ;;  %v598_v29 = vld [vmem:[#allocation2 + $0x2f8] sm:$0x3] }
  0xee   :  { %v1705_v26 = vadd.f32 %v1704_v50, %v1703_v62  ;;  %v1706_v60 = vsel %vm17_vm0, %v3726_v17, 0.0  ;;  %v934_v6 = vrot.slane %v689_v30, 1  ;;  %v500_v34 = vadd.f32 %v3699_v16, %v591_v2 }
  0xef   :  { %v501_v46 = vadd.f32 %v405_v5, %v309_v32  ;;  %v933_v28 = vsel %vm803_vm3, %v930_v1, %v932_v42  ;;  %v931_v23 = vsel %vm803_vm3, %v929_v0, %v930_v1  ;;  %v1218_v43 = vrot.slane %v686_v9, 2 }
  0xf0   :  { %v1707_v44 = vadd.f32 %v1706_v60, %v1705_v26  ;;  %v1708_v4 = vsel %vm17_vm0, %v3737_v35, 0.0  ;;  %v3756_v22 = vmul.f32 %v3133_v40, %v3293_v57  ;;  %v938_v36 = vsel %vm803_vm3, %v935_v56, %v937_v19  ;;  %v5195_v26 = vld [vmem:[#allocation39_spill] sm:$0xff]  ;;  %v5196_v60 = vld [vmem:[#allocation12_spill] sm:$0xff] }
  0xf1   :  { %v1224_v2 = vrot.slane %v690_v25, 2  ;;  %v1710_v48 = vsel %vm17_vm0, %v3741_v45, 0.0  ;;  %v1226_v14 = vrot.slane %v691_v54, 2  ;;  %v1223_v1 = vrot.slane %v689_v30, 2 }
  0xf2   :  { %v1709_v32 = vadd.f32 %v1708_v4, %v1707_v44  ;;  %v3763_v42 = vmul.f32 %v3131_v58, %v3025_v52  ;;  %v936_v0 = vsel %vm803_vm3, %v934_v6, %v935_v56  ;;  %v3767_v5 = vadd.f32 %v3750_v21, %v500_v34 }
  0xf3   :  { %v694_v40 = vadd.f32 %v598_v29, %v501_v46  ;;  %v1079_v57 = vadd.f32 %v933_v28, %v3697_v3  ;;  %v1222_v62 = vsel %vm1092_vm4, %v1219_v18, %v1221_v7  ;;  %v1078_v50 = vadd.f32 %v931_v23, %v686_v9  ;;  %v5198_v7 = vld [vmem:[#allocation32_spill] sm:$0xff]  ;;  %v5199_v46 = vld [vmem:[#allocation11_spill] sm:$0xff] }
  0xf4   :  { %v1711_v19 = vadd.f32 %v1710_v48, %v1709_v32  ;;  %v1712_v54 = vsel %vm17_vm0, %v3756_v22, 0.0  ;;  %v3775_v44 = vmul.f32 %v5196_v60, %v5195_v26  ;;  %v1220_v52 = vsel %vm1092_vm4, %v1218_v43, %v1219_v18  ;;  %v5201_v43 = vld [vmem:[#allocation15_spill] sm:$0xff]  ;;  %v596_v32 = vld [vmem:[#allocation2 + $0x2e8] sm:$0xff] }
  0xf5   :  { %v1081_v58 = vadd.f32 %v938_v36, %v690_v25  ;;  %v1227_v56 = vsel %vm1092_vm4, %v1224_v2, %v1226_v14  ;;  %v1080_v6 = vadd.f32 %v936_v0, %v689_v30  ;;  %v1225_v34 = vsel %vm1092_vm4, %v1223_v1, %v1224_v2  ;;  %v5203_v2 = vld [vmem:[#allocation16_spill] sm:$0xff]  ;;  %v5205_v0 = vld [vmem:[#allocation21_spill] sm:$0xff] }
  0xf6   :  { %5197 = vst [vmem:[#allocation39_spill] sm:$0xff] %v3775_v44  ;;  %v1713_v3 = vadd.f32 %v1712_v54, %v1711_v19  ;;  %v1714_v9 = vsel %vm17_vm0, %v3763_v42, 0.0  ;;  %v3784_v28 = vmul.f32 %v5199_v46, %v5198_v7  ;;  %v940_v23 = vrot.slane %v3767_v5, 1  ;;  %v312_v19 = vld [vmem:[#allocation2 + $0x2e0] sm:$0x3] }
  0xf7   :  { %v942_v29 = vrot.slane %v694_v40, 1  ;;  %v1368_v4 = vadd.f32 %v1222_v62, %v1079_v57  ;;  %v1367_v48 = vadd.f32 %v1220_v52, %v1078_v50  ;;  %v499_v25 = vadd.f32 %v3712_v38, %v3691_v63  ;;  %v5207_v63 = vld [vmem:[#allocation19_spill] sm:$0xff]  ;;  %v408_v54 = vld [vmem:[#allocation2 + $0x2f8] sm:$0x3] }
  0xf8   :  { %5200 = vst [vmem:[#allocation12_spill] sm:$0xff] %v3784_v28  ;;  %v1715_v18 = vadd.f32 %v1714_v9, %v1713_v3  ;;  %v1716_v30 = vsel %vm17_vm0, %v3775_v44, 0.0  ;;  %v3793_v36 = vmul.f32 %v5201_v43, %v3646_v61  ;;  %v3797_v14 = vmul.f32 %v5203_v2, %v3652_v15  ;;  %v5209_v15 = vld [vmem:[#allocation25_spill] sm:$0xff]  ;;  %v5225_v44 = vld [vmem:[#allocation43_spill] sm:$0xff] }
  0xf9   :  { %v1370_v1 = vadd.f32 %v1227_v56, %v1081_v58  ;;  %v3801_v57 = vmul.f32 %v5205_v0, %v3656_v53  ;;  %v3805_v62 = vmul.f32 %v5207_v63, %v3658_v51  ;;  %v1369_v50 = vadd.f32 %v1225_v34, %v1080_v6  ;;  %v5211_v58 = vld [vmem:[#allocation23_spill] sm:$0xff]  ;;  %v5213_v43 = vld [vmem:[#allocation29_spill] sm:$0xff] }
  0xfa   :  { %5202 = vst [vmem:[#allocation32_spill] sm:$0xff] %v3793_v36  ;;  %5204 = vst [vmem:[#allocation11_spill] sm:$0xff] %v3797_v14  ;;  %v1717_v26 = vadd.f32 %v1716_v30, %v1715_v18  ;;  %v1718_v61 = vsel %vm17_vm0, %v3784_v28, 0.0  ;;  %v3811_v60 = vmul.f32 %v5209_v15, %v3660_v41  ;;  %v943_v52 = vsel %vm803_vm3, %v940_v23, %v942_v29  ;;  %v600_v29 = vld [vmem:[#allocation2 + $0x308] sm:$0xff]  ;;  %v411_v15 = vld [vmem:[#allocation2 + $0x310] sm:$0x3] }
  0xfb   :  { %5206 = vst [vmem:[#allocation15_spill] sm:$0xff] %v3801_v57  ;;  %5208 = vst [vmem:[#allocation16_spill] sm:$0xff] %v3805_v62  ;;  %v1229_v53 = vrot.slane %v3767_v5, 2  ;;  %v3817_v56 = vmul.f32 %v5211_v58, %v3709_v59  ;;  %v1231_v51 = vrot.slane %v694_v40, 2  ;;  %v692_v6 = vadd.f32 %v596_v32, %v499_v25  ;;  %v601_v40 = vld [vmem:[#allocation2 + $0x310] sm:$0x3] }
  0xfc   :  { %5210 = vst [vmem:[#allocation21_spill] sm:$0xff] %v3811_v60  ;;  %v1719_v34 = vadd.f32 %v1718_v61, %v1717_v26  ;;  %v1722_v3 = vsel %vm17_vm0, %v3793_v36, 0.0  ;;  %v1720_v9 = vsel %vm17_vm0, %v3797_v14, 0.0  ;;  %v503_v41 = vadd.f32 %v3750_v21, %v3699_v16  ;;  %v5215_v16 = vld [vmem:[#allocation27_spill] sm:$0xff]  ;;  %v315_v61 = vld [vmem:[#allocation2 + $0x2f8] sm:$0x3] }
  0xfd   :  { %5212 = vst [vmem:[#allocation19_spill] sm:$0xff] %v3817_v56  ;;  %v504_v7 = vadd.f32 %v408_v54, %v312_v19  ;;  %v1726_v46 = vsel %vm17_vm0, %v3801_v57, 0.0  ;;  %v1724_v59 = vsel %vm17_vm0, %v3805_v62, 0.0  ;;  %v502_v25 = vadd.f32 %v596_v32, %v3712_v38  ;;  %v599_v19 = vld [vmem:[#allocation2 + $0x300] sm:$0xff]  ;;  %v5221_v62 = vld [vmem:[#allocation38_spill] sm:$0xff] }
  0xfe   :  { %v1721_v18 = vadd.f32 %v1720_v9, %v1719_v34  ;;  %v1730_v30 = vsel %vm17_vm0, %v3811_v60, 0.0  ;;  %v3834_v2 = vmul.f32 %v5213_v43, %v3721_v10  ;;  %v3838_v0 = vmul.f32 %v5215_v16, %v3743_v24  ;;  %v5217_v34 = vld [vmem:[#allocation34_spill] sm:$0xff]  ;;  %v5219_v10 = vld [vmem:[#allocation31_spill] sm:$0xff] }
  0xff   :  { %v1083_v63 = vadd.f32 %v943_v52, %v3767_v5  ;;  %v1728_v54 = vsel %vm17_vm0, %v3817_v56, 0.0  ;;  %v1232_v38 = vsel %vm1092_vm4, %v1229_v53, %v1231_v51  ;;  %v939_v26 = vrot.slane %v692_v6, 1 }
 0x100   :  { %5214 = vst [vmem:[#allocation25_spill] sm:$0xff] %v3834_v2  ;;  %5216 = vst [vmem:[#allocation23_spill] sm:$0xff] %v3838_v0  ;;  %v1723_v58 = vadd.f32 %v1722_v3, %v1721_v18  ;;  %v3845_v9 = vmul.f32 %v5217_v34, %v1368_v4  ;;  %v3848_v43 = vmul.f32 %v5219_v10, %v1367_v48  ;;  %v1734_v51 = vsel %vm17_vm0, %v3834_v2, 0.0  ;;  %v603_v4 = vld [vmem:[#allocation2 + $0x320] sm:$0xff]  ;;  %v602_v34 = vld [vmem:[#allocation2 + $0x318] sm:$0xff] }
 0x101   :  { %v696_v24 = vadd.f32 %v600_v29, %v503_v41  ;;  %v697_v16 = vadd.f32 %v601_v40, %v504_v7  ;;  %v695_v60 = vadd.f32 %v599_v19, %v502_v25  ;;  %v506_v5 = vadd.f32 %v600_v29, %v3750_v21  ;;  %v604_v40 = vld [vmem:[#allocation2 + $0x328] sm:$0x3] }
 0x102   :  { %5218 = vst [vmem:[#allocation29_spill] sm:$0xff] %v3845_v9  ;;  %5220 = vst [vmem:[#allocation27_spill] sm:$0xff] %v3848_v43  ;;  %v505_v52 = vadd.f32 %v599_v19, %v596_v32  ;;  %v1725_v57 = vadd.f32 %v1724_v59, %v1723_v58  ;;  %v1732_v56 = vsel %vm17_vm0, %v3838_v0, 0.0  ;;  %v1372_v3 = vadd.f32 %v1232_v38, %v1083_v63  ;;  %v5223_v10 = vld [vmem:[#allocation36_spill] sm:$0xff] }
 0x103   :  { %v507_v18 = vadd.f32 %v411_v15, %v315_v61  ;;  %v3856_v48 = vmul.f32 %v5221_v62, %v1370_v1  ;;  %v941_v41 = vsel %vm803_vm3, %v939_v26, %v940_v23  ;;  %v1228_v7 = vrot.slane %v692_v6, 2  ;;  %v414_v2 = vld [vmem:[#allocation2 + $0x328] sm:$0x3] }
 0x104   :  { %v1727_v21 = vadd.f32 %v1726_v46, %v1725_v57  ;;  %v1738_v32 = vsel %vm17_vm0, %v3845_v9, 0.0  ;;  %v1736_v59 = vsel %vm17_vm0, %v3848_v43, 0.0  ;;  %v945_v25 = vrot.slane %v696_v24, 1  ;;  %v318_v9 = vld [vmem:[#allocation2 + $0x310] sm:$0x3]  ;;  %v606_v43 = vld [vmem:[#allocation2 + $0x338] sm:$0xff] }
 0x105   :  { %5222 = vst [vmem:[#allocation34_spill] sm:$0xff] %v3856_v48  ;;  %v947_v58 = vrot.slane %v697_v16, 1  ;;  %v944_v63 = vrot.slane %v695_v60, 1  ;;  %v699_v38 = vadd.f32 %v603_v4, %v506_v5  ;;  %v698_v61 = vadd.f32 %v602_v34, %v505_v52 }
 0x106   :  { %v1729_v15 = vadd.f32 %v1728_v54, %v1727_v21  ;;  %v3864_v1 = vmul.f32 %v5223_v10, %v1369_v50  ;;  %v1082_v62 = vadd.f32 %v941_v41, %v692_v6  ;;  %v700_v23 = vadd.f32 %v604_v40, %v507_v18  ;;  %v605_v50 = vld [vmem:[#allocation2 + $0x330] sm:$0xff] }
 0x107   :  { %v509_v26 = vadd.f32 %v603_v4, %v600_v29  ;;  %v1742_v57 = vsel %vm17_vm0, %v3856_v48, 0.0  ;;  %v1230_v46 = vsel %vm1092_vm4, %v1228_v7, %v1229_v53  ;;  %v508_v0 = vadd.f32 %v602_v34, %v599_v19 }
 0x108   :  { %5224 = vst [vmem:[#allocation31_spill] sm:$0xff] %v3864_v1  ;;  %v1731_v36 = vadd.f32 %v1730_v30, %v1729_v15  ;;  %v948_v5 = vsel %vm803_vm3, %v945_v25, %v947_v58  ;;  %v1234_v52 = vrot.slane %v696_v24, 2  ;;  %v1236_v54 = vrot.slane %v697_v16, 2  ;;  %v607_v15 = vld [vmem:[#allocation2 + $0x340] sm:$0x3] }
 0x109   :  { %v1233_v21 = vrot.slane %v695_v60, 2  ;;  %v946_v6 = vsel %vm803_vm3, %v944_v63, %v945_v25  ;;  %v950_v18 = vrot.slane %v699_v38, 1  ;;  %v949_v29 = vrot.slane %v698_v61, 1 }
 0x10a   :  { %v1733_v41 = vadd.f32 %v1732_v56, %v1731_v36  ;;  %v1740_v40 = vsel %vm17_vm0, %v3864_v1, 0.0  ;;  %v952_v53 = vrot.slane %v700_v23, 1  ;;  %v510_v7 = vadd.f32 %v414_v2, %v318_v9 }
 0x10b   :  { %v3873_v10 = vadd.f32 %v606_v43, %v509_v26  ;;  %v1371_v19 = vadd.f32 %v1230_v46, %v1082_v62  ;;  %v1085_v30 = vadd.f32 %v948_v5, %v696_v24  ;;  %v701_v58 = vadd.f32 %v605_v50, %v508_v0  ;;  %v321_v62 = vld [vmem:[#allocation2 + $0x328] sm:$0x3]  ;;  %v417_v26 = vld [vmem:[#allocation2 + $0x340] sm:$0x3] }
 0x10c   :  { %v1735_v48 = vadd.f32 %v1734_v51, %v1733_v41  ;;  %v1237_v16 = vsel %vm1092_vm4, %v1234_v52, %v1236_v54  ;;  %v1084_v14 = vadd.f32 %v946_v6, %v695_v60  ;;  %v1235_v25 = vsel %vm1092_vm4, %v1233_v21, %v1234_v52  ;;  %v5226_v52 = vld [vmem:[#allocation41_spill] sm:$0xff] }
 0x10d   :  { %v1239_v63 = vrot.slane %v699_v38, 2  ;;  %v1241_v28 = vrot.slane %v700_v23, 2  ;;  %v951_v36 = vsel %vm803_vm3, %v949_v29, %v950_v18  ;;  %v1238_v56 = vrot.slane %v698_v61, 2 }
 0x10e   :  { %v1737_v1 = vadd.f32 %v1736_v59, %v1735_v48  ;;  %v3879_v2 = vmul.f32 %v5225_v44, %v1372_v3  ;;  %v953_v9 = vsel %vm803_vm3, %v950_v18, %v952_v53  ;;  %v703_v24 = vadd.f32 %v607_v15, %v510_v7  ;;  %v609_v59 = vld [vmem:[#allocation2 + $0x350] sm:$0xff]  ;;  %v608_v44 = vld [vmem:[#allocation2 + $0x348] sm:$0xff] }
 0x10f   :  { %v955_v0 = vrot.slane %v3873_v10, 1  ;;  %v954_v51 = vrot.slane %v701_v58, 1  ;;  %v512_v60 = vadd.f32 %v606_v43, %v603_v4  ;;  %v511_v46 = vadd.f32 %v605_v50, %v602_v34 }
 0x110   :  { %v1739_v5 = vadd.f32 %v1738_v32, %v1737_v1  ;;  %v3884_v23 = vmul.f32 %v5226_v52, %v1371_v19  ;;  %v1374_v54 = vadd.f32 %v1237_v16, %v1085_v30  ;;  %v1373_v21 = vadd.f32 %v1235_v25, %v1084_v14  ;;  %v610_v32 = vld [vmem:[#allocation2 + $0x358] sm:$0x3] }
 0x111   :  { %v1086_v48 = vadd.f32 %v951_v36, %v698_v61  ;;  %v1087_v3 = vadd.f32 %v953_v9, %v699_v38  ;;  %v1242_v6 = vsel %vm1092_vm4, %v1239_v63, %v1241_v28  ;;  %v1240_v18 = vsel %vm1092_vm4, %v1238_v56, %v1239_v63  ;;  %v5227_v38 = vld [vmem:[#allocation45_spill] sm:$0xff]  ;;  %v5228_v19 = vld [vmem:[#allocation46_spill] sm:$0xff] }
 0x112   :  { %v1741_v29 = vadd.f32 %v1740_v40, %v1739_v5  ;;  %v957_v41 = vrot.slane %v703_v24, 1  ;;  %v1244_v53 = vrot.slane %v3873_v10, 2  ;;  %v1243_v43 = vrot.slane %v701_v58, 2  ;;  %v5229_v5 = vld [vmem:[#allocation50_spill] sm:$0xff] }
 0x113   :  { %v513_v4 = vadd.f32 %v417_v26, %v321_v62  ;;  %v956_v34 = vsel %vm803_vm3, %v954_v51, %v955_v0  ;;  %v705_v1 = vadd.f32 %v609_v59, %v512_v60  ;;  %v704_v50 = vadd.f32 %v608_v44, %v511_v46 }
 0x114   :  { %v1743_v14 = vadd.f32 %v1742_v57, %v1741_v29  ;;  %v1744_v61 = vsel %vm17_vm0, %v3884_v23, 0.0  ;;  %v3893_v7 = vmul.f32 %v5227_v38, %v1373_v21  ;;  %v1375_v28 = vadd.f32 %v1240_v18, %v1086_v48 }
 0x115   :  { %v1746_v40 = vsel %vm17_vm0, %v3879_v2, 0.0  ;;  %v3898_v30 = vmul.f32 %v5228_v19, %v1374_v54  ;;  %v1376_v15 = vadd.f32 %v1242_v6, %v1087_v3  ;;  %v958_v25 = vsel %vm803_vm3, %v955_v0, %v957_v41 }
 0x116   :  { %v1745_v16 = vadd.f32 %v1744_v61, %v1743_v14  ;;  %v1246_v63 = vrot.slane %v703_v24, 2  ;;  %v1088_v36 = vadd.f32 %v956_v34, %v701_v58  ;;  %v706_v57 = vadd.f32 %v610_v32, %v513_v4 }
 0x117   :  { %v1245_v56 = vsel %vm1092_vm4, %v1243_v43, %v1244_v53  ;;  %v960_v9 = vrot.slane %v705_v1, 1  ;;  %v959_v51 = vrot.slane %v704_v50, 1  ;;  %v1748_v26 = vsel %vm17_vm0, %v3893_v7, 0.0 }
 0x118   :  { %v1747_v62 = vadd.f32 %v1746_v40, %v1745_v16  ;;  %v3905_v60 = vmul.f32 %v3546_v27, %v1375_v28  ;;  %v1750_v46 = vsel %vm17_vm0, %v3898_v30, 0.0  ;;  %v3910_v52 = vmul.f32 %v5229_v5, %v1376_v15 }
 0x119   :  { %v1089_v58 = vadd.f32 %v958_v25, %v3873_v10  ;;  %v1247_v0 = vsel %vm1092_vm4, %v1244_v53, %v1246_v63  ;;  %v1377_v54 = vadd.f32 %v1245_v56, %v1088_v36  ;;  %v962_v21 = vrot.slane %v706_v57, 1 }
 0x11a   :  { %v1749_v24 = vadd.f32 %v1748_v26, %v1747_v62  ;;  %v1249_v48 = vrot.slane %v705_v1, 2  ;;  %v961_v59 = vsel %vm803_vm3, %v959_v51, %v960_v9  ;;  %v1248_v44 = vrot.slane %v704_v50, 2  ;;  %v5230_v26 = vld [vmem:[#allocation3_spill] sm:$0xff] }
 0x11b   :  { %v1752_v27 = vsel %vm17_vm0, %v3905_v60, 0.0  ;;  %v1754_v18 = vsel %vm17_vm0, %v3910_v52, 0.0  ;;  %v1378_v29 = vadd.f32 %v1247_v0, %v1089_v58  ;;  %v3920_v41 = vmul.f32 %v3603_v8, %v1377_v54  ;;  %v5233_v0 = vld [vmem:[#allocation6_spill] sm:$0xff] }
 0x11c   :  { %v1751_v3 = vadd.f32 %v1750_v46, %v1749_v24  ;;  %v1090_v10 = vadd.f32 %v961_v59, %v704_v50  ;;  %v963_v53 = vsel %vm803_vm3, %v960_v9, %v962_v21  ;;  %v1251_v43 = vrot.slane %v706_v57, 2  ;;  %v5231_v46 = vld [vmem:[#allocation5_spill] sm:$0xff]  ;;  %v5232_v24 = vld [vmem:[#allocation4_spill] sm:$0xff]  ;;  %v5234_v59 = vld [vmem:[#allocation7_spill] sm:$0xff] }
 0x11d   :  { %v1250_v4 = vsel %vm1092_vm4, %v1248_v44, %v1249_v48  ;;  %v3925_v32 = vmul.f32 %v3627_v11, %v1378_v29  ;;  %v1756_v14 = vsel %vm17_vm0, %v3920_v41, 0.0  ;;  %v1091_v61 = vadd.f32 %v963_v53, %v705_v1 }
 0x11e   :  { %v1753_v6 = vadd.f32 %v1752_v27, %v1751_v3  ;;  %v1379_v38 = vadd.f32 %v1250_v4, %v1090_v10  ;;  %v1252_v28 = vsel %vm1092_vm4, %v1249_v48, %v1251_v43  ;;  %v5235_v27 = vld [vmem:[#allocation8_spill] sm:$0xff]  ;;  %v5236_v43 = vld [vmem:[#allocation9_spill] sm:$0xff] }
 0x11f   :  { %v1758_v8 = vsel %vm17_vm0, %v3925_v32, 0.0  ;;  %v1380_v50 = vadd.f32 %v1252_v28, %v1091_v61 }
 0x120   :  { %v1755_v34 = vadd.f32 %v1754_v18, %v1753_v6  ;;  %v3933_v19 = vmul.f32 %v3664_v13, %v1379_v38  ;;  %v5237_v38 = vld [vmem:[#allocation10_spill] sm:$0xff] }
 0x121   :  { %v3936_v16 = vmul.f32 %v3662_v49, %v1380_v50 }
 0x122   :  { %v1757_v40 = vadd.f32 %v1756_v14, %v1755_v34  ;;  %v1760_v11 = vsel %vm17_vm0, %v3933_v19, 0.0 }
 0x123   :  { %v1762_v1 = vsel %vm17_vm0, %v3936_v16, 0.0 }
 0x124   :  { %v1759_v15 = vadd.f32 %v1758_v8, %v1757_v40 }
 0x126   :  { %v1761_v25 = vadd.f32 %v1760_v11, %v1759_v15  ;;  %v5238_v15 = vld [vmem:[#allocation13_spill] sm:$0xff] }
 0x128   :  { %v1763_v63 = vadd.f32 %v1762_v1, %v1761_v25 }
 0x12a   :  { %v1764_v36 = vrot.slane %v1763_v63, 4 }
 0x12c   :  { %v1765_v57 = vadd.f32 %v1764_v36, %v1763_v63  ;;  %v5239_v36 = vld [vmem:[#allocation14_spill] sm:$0xff] }
 0x12e   :  { %v1766_v56 = vrot.slane %v1765_v57, 2 }
 0x130   :  { %v1767_v9 = vadd.f32 %v1766_v56, %v1765_v57 }
 0x132   :  { %v1768_v51 = vrot.slane %v1767_v9, 1 }
 0x134   :  { %v1769_v62 = vadd.f32 %v1768_v51, %v1767_v9 }
 0x136   :  { %v3942_v13 = vmul.f32 0.001953125, %v1769_v62  ;;  %v5240_v62 = vld [vmem:[#allocation17_spill] sm:$0xff] }
 0x138   :  { %v3946_v49 = vsub.f32 %v5230_v26, %v3942_v13  ;;  %v3950_v5 = vsub.f32 %v5231_v46, %v3942_v13  ;;  %v3954_v58 = vsub.f32 %v5232_v24, %v3942_v13  ;;  %v3958_v54 = vsub.f32 %v5233_v0, %v3942_v13 }
 0x139   :  { %v3966_v44 = vsub.f32 %v5234_v59, %v3942_v13  ;;  %v3972_v6 = vsub.f32 %v5235_v27, %v3942_v13  ;;  %v3980_v4 = vsub.f32 %v5236_v43, %v3942_v13  ;;  %v3987_v28 = vsub.f32 %v5237_v38, %v3942_v13 }
 0x13a   :  { %v1835_v21 = vmul.f32 %v3946_v49, %v3946_v49  ;;  %v1836_v48 = vmul.f32 %v3950_v5, %v3950_v5  ;;  %v1837_v3 = vmul.f32 %v3954_v58, %v3954_v58  ;;  %v1838_v18 = vmul.f32 %v3958_v54, %v3958_v54 }
 0x13b   :  { %v1839_v34 = vmul.f32 %v3966_v44, %v3966_v44  ;;  %v1840_v40 = vmul.f32 %v3972_v6, %v3972_v6  ;;  %v3994_v11 = vsub.f32 %v5238_v15, %v3942_v13  ;;  %v1841_v25 = vmul.f32 %v3980_v4, %v3980_v4 }
 0x13c   :  { %v1899_v29 = vsel %vm17_vm0, %v1835_v21, 0.0  ;;  %v1900_v10 = vsel %vm17_vm0, %v1836_v48, 0.0  ;;  %v1902_v14 = vsel %vm17_vm0, %v1837_v3, 0.0  ;;  %v1904_v8 = vsel %vm17_vm0, %v1838_v18, 0.0  ;;  %v5241_v21 = vld [vmem:[#allocation18_spill] sm:$0xff]  ;;  %v5242_v18 = vld [vmem:[#allocation20_spill] sm:$0xff] }
 0x13d   :  { %v1901_v53 = vadd.f32 %v1900_v10, %v1899_v29  ;;  %v1906_v1 = vsel %vm17_vm0, %v1839_v34, 0.0  ;;  %v4001_v57 = vsub.f32 %v5239_v36, %v3942_v13  ;;  %v1842_v56 = vmul.f32 %v3987_v28, %v3987_v28  ;;  %v5243_v34 = vld [vmem:[#allocation22_spill] sm:$0xff] }
 0x13e   :  { %v1908_v9 = vsel %vm17_vm0, %v1840_v40, 0.0  ;;  %v4008_v26 = vsub.f32 %v5240_v62, %v3942_v13  ;;  %v1843_v46 = vmul.f32 %v3994_v11, %v3994_v11  ;;  %v1910_v24 = vsel %vm17_vm0, %v1841_v25, 0.0  ;;  %v5246_v62 = vld [vmem:[#allocation28_spill] sm:$0xff] }
 0x13f   :  { %v1903_v61 = vadd.f32 %v1902_v14, %v1901_v53  ;;  %v4015_v48 = vsub.f32 %v5241_v21, %v3942_v13  ;;  %v1844_v59 = vmul.f32 %v4001_v57, %v4001_v57  ;;  %v1912_v3 = vsel %vm17_vm0, %v1842_v56, 0.0 }
 0x140   :  { %v4022_v29 = vsub.f32 %v5242_v18, %v3942_v13  ;;  %v1845_v10 = vmul.f32 %v4008_v26, %v4008_v26  ;;  %v1914_v53 = vsel %vm17_vm0, %v1843_v46, 0.0  ;;  %v4029_v14 = vsub.f32 %v5243_v34, %v3942_v13 }
 0x141   :  { %v1905_v50 = vadd.f32 %v1904_v8, %v1903_v61  ;;  %v1846_v61 = vmul.f32 %v4015_v48, %v4015_v48  ;;  %v1916_v38 = vsel %vm17_vm0, %v1844_v59, 0.0  ;;  %v5244_v8 = vld [vmem:[#allocation24_spill] sm:$0xff]  ;;  %v4050_v46 = vsub.f32 %v5246_v62, %v3942_v13  ;;  %v5247_v59 = vld [vmem:[#allocation30_spill] sm:$0xff] }
 0x142   :  { %v1847_v15 = vmul.f32 %v4022_v29, %v4022_v29  ;;  %v1918_v25 = vsel %vm17_vm0, %v1845_v10, 0.0  ;;  %v1848_v56 = vmul.f32 %v4029_v14, %v4029_v14 }
 0x143   :  { %v1907_v63 = vadd.f32 %v1906_v1, %v1905_v50  ;;  %v4036_v50 = vsub.f32 %v5244_v8, %v3942_v13  ;;  %v1851_v34 = vmul.f32 %v4050_v46, %v4050_v46 }
 0x144   :  { %v1924_v18 = vsel %vm17_vm0, %v1848_v56, 0.0 }
 0x145   :  { %v1909_v51 = vadd.f32 %v1908_v9, %v1907_v63  ;;  %v5245_v63 = vld [vmem:[#allocation26_spill] sm:$0xff]  ;;  %v1920_v9 = vsel %vm17_vm0, %v1846_v61, 0.0 }
 0x146   :  { %v4043_v36 = vsub.f32 %v5245_v63, %v3942_v13  ;;  %v5250_v63 = vld [vmem:[#allocation37_spill] sm:$0xff] }
 0x147   :  { %v1911_v0 = vadd.f32 %v1910_v24, %v1909_v51  ;;  %v1849_v24 = vmul.f32 %v4036_v50, %v4036_v50  ;;  %v4078_v56 = vsub.f32 %v5250_v63, %v3942_v13  ;;  %v5254_v63 = vld [vmem:[#allocation47_spill] sm:$0xff] }
 0x149   :  { %v1913_v27 = vadd.f32 %v1912_v3, %v1911_v0  ;;  %v1922_v0 = vsel %vm17_vm0, %v1847_v15, 0.0  ;;  %v4057_v3 = vsub.f32 %v5247_v59, %v3942_v13  ;;  %v1926_v61 = vsel %vm17_vm0, %v1849_v24, 0.0  ;;  %v5251_v24 = vld [vmem:[#allocation40_spill] sm:$0xff] }
 0x14b   :  { %v1915_v43 = vadd.f32 %v1914_v53, %v1913_v27  ;;  %v1850_v27 = vmul.f32 %v4043_v36, %v4043_v36  ;;  %v5248_v53 = vld [vmem:[#allocation33_spill] sm:$0xff]  ;;  %v1852_v15 = vmul.f32 %v4057_v3, %v4057_v3 }
 0x14d   :  { %v1917_v40 = vadd.f32 %v1916_v38, %v1915_v43  ;;  %v4064_v43 = vsub.f32 %v5248_v53, %v3942_v13  ;;  %v1932_v59 = vsel %vm17_vm0, %v1852_v15, 0.0  ;;  %v1855_v53 = vmul.f32 %v4078_v56, %v4078_v56 }
 0x14f   :  { %v1919_v1 = vadd.f32 %v1918_v25, %v1917_v40  ;;  %v5249_v40 = vld [vmem:[#allocation35_spill] sm:$0xff]  ;;  %v1928_v25 = vsel %vm17_vm0, %v1850_v27, 0.0 }
 0x150   :  { %v4071_v8 = vsub.f32 %v5249_v40, %v3942_v13 }
 0x151   :  { %v1921_v51 = vadd.f32 %v1920_v9, %v1919_v1  ;;  %v1853_v9 = vmul.f32 %v4064_v43, %v4064_v43 }
 0x153   :  { %v1923_v21 = vadd.f32 %v1922_v0, %v1921_v51  ;;  %v1930_v51 = vsel %vm17_vm0, %v1851_v34, 0.0  ;;  %v4085_v0 = vsub.f32 %v5251_v24, %v3942_v13  ;;  %v1934_v34 = vsel %vm17_vm0, %v1853_v9, 0.0 }
 0x154   :  { %v1938_v9 = vsel %vm17_vm0, %v1855_v53, 0.0 }
 0x155   :  { %v1925_v10 = vadd.f32 %v1924_v18, %v1923_v21  ;;  %v1854_v21 = vmul.f32 %v4071_v8, %v4071_v8  ;;  %v5252_v18 = vld [vmem:[#allocation42_spill] sm:$0xff] }
 0x157   :  { %v1927_v38 = vadd.f32 %v1926_v61, %v1925_v10  ;;  %v4092_v10 = vsub.f32 %v5252_v18, %v3942_v13  ;;  %v1936_v15 = vsel %vm17_vm0, %v1854_v21, 0.0 }
 0x159   :  { %v1929_v1 = vadd.f32 %v1928_v25, %v1927_v38  ;;  %v5253_v38 = vld [vmem:[#allocation44_spill] sm:$0xff]  ;;  %v1856_v25 = vmul.f32 %v4085_v0, %v4085_v0 }
 0x15a   :  { %v4099_v40 = vsub.f32 %v5253_v38, %v3942_v13 }
 0x15b   :  { %v1931_v62 = vadd.f32 %v1930_v51, %v1929_v1  ;;  %v4106_v51 = vsub.f32 %v5254_v63, %v3942_v13  ;;  %v1940_v21 = vsel %vm17_vm0, %v1856_v25, 0.0  ;;  %v4127_v63 = vsub.f32 %v3593_v39, %v3942_v13 }
 0x15c   :  { %v1858_v18 = vmul.f32 %v4099_v40, %v4099_v40  ;;  %v4141_v39 = vsub.f32 %v3640_v55, %v3942_v13  ;;  %v4155_v55 = vsub.f32 %v3680_v31, %v3942_v13  ;;  %v4169_v31 = vsub.f32 %v3703_v12, %v3942_v13 }
 0x15d   :  { %v1933_v27 = vadd.f32 %v1932_v59, %v1931_v62  ;;  %v1857_v62 = vmul.f32 %v4092_v10, %v4092_v10  ;;  %v5255_v59 = vld [vmem:[#allocation48_spill] sm:$0xff]  ;;  %v4183_v12 = vsub.f32 %v3726_v17, %v3942_v13  ;;  %v4197_v17 = vsub.f32 %v3741_v45, %v3942_v13 }
 0x15e   :  { %v1944_v25 = vsel %vm17_vm0, %v1858_v18, 0.0  ;;  %v4211_v45 = vsub.f32 %v3763_v42, %v3942_v13 }
 0x15f   :  { %v1935_v61 = vadd.f32 %v1934_v34, %v1933_v27  ;;  %v4113_v27 = vsub.f32 %v5255_v59, %v3942_v13  ;;  %v1942_v53 = vsel %vm17_vm0, %v1857_v62, 0.0  ;;  %v4134_v59 = vsub.f32 %v3621_v37, %v3942_v13  ;;  %5257 = vst [vmem:[#allocation38_spill] sm:$0xff] %v4197_v17 }
 0x160   :  { %v4148_v37 = vsub.f32 %v3683_v47, %v3942_v13  ;;  %v4162_v47 = vsub.f32 %v3689_v20, %v3942_v13  ;;  %v4176_v20 = vsub.f32 %v3716_v33, %v3942_v13  ;;  %v4190_v33 = vsub.f32 %v3737_v35, %v3942_v13  ;;  %5259 = vst [vmem:[#allocation43_spill] sm:$0xff] %v4211_v45 }
 0x161   :  { %v1937_v1 = vadd.f32 %v1936_v15, %v1935_v61  ;;  %v5256_v61 = vld [vmem:[#allocation49_spill] sm:$0xff]  ;;  %v1859_v15 = vmul.f32 %v4106_v51, %v4106_v51  ;;  %v4204_v35 = vsub.f32 %v3756_v22, %v3942_v13 }
 0x162   :  { %v4120_v38 = vsub.f32 %v5256_v61, %v3942_v13  ;;  %v1862_v61 = vmul.f32 %v4127_v63, %v4127_v63 }
 0x163   :  { %v1939_v24 = vadd.f32 %v1938_v9, %v1937_v1  ;;  %v1860_v9 = vmul.f32 %v4113_v27, %v4113_v27  ;;  %v1946_v62 = vsel %vm17_vm0, %v1859_v15, 0.0  ;;  %5258 = vst [vmem:[#allocation36_spill] sm:$0xff] %v4204_v35 }
 0x165   :  { %v1941_v34 = vadd.f32 %v1940_v21, %v1939_v24  ;;  %v1861_v21 = vmul.f32 %v4120_v38, %v4120_v38  ;;  %v1948_v18 = vsel %vm17_vm0, %v1860_v9, 0.0  ;;  %v1952_v9 = vsel %vm17_vm0, %v1862_v61, 0.0 }
 0x167   :  { %v1943_v1 = vadd.f32 %v1942_v53, %v1941_v34  ;;  %v1950_v15 = vsel %vm17_vm0, %v1861_v21, 0.0 }
 0x169   :  { %v1945_v24 = vadd.f32 %v1944_v25, %v1943_v1  ;;  %v1863_v1 = vmul.f32 %v4134_v59, %v4134_v59 }
 0x16b   :  { %v1947_v34 = vadd.f32 %v1946_v62, %v1945_v24  ;;  %v1864_v24 = vmul.f32 %v4141_v39, %v4141_v39  ;;  %v1954_v21 = vsel %vm17_vm0, %v1863_v1, 0.0 }
 0x16d   :  { %v1949_v53 = vadd.f32 %v1948_v18, %v1947_v34  ;;  %v1865_v34 = vmul.f32 %v4148_v37, %v4148_v37  ;;  %v1956_v61 = vsel %vm17_vm0, %v1864_v24, 0.0 }
 0x16f   :  { %v1951_v25 = vadd.f32 %v1950_v15, %v1949_v53  ;;  %v1866_v53 = vmul.f32 %v4155_v55, %v4155_v55  ;;  %v1958_v1 = vsel %vm17_vm0, %v1865_v34, 0.0 }
 0x171   :  { %v1953_v62 = vadd.f32 %v1952_v9, %v1951_v25  ;;  %v1867_v25 = vmul.f32 %v4162_v47, %v4162_v47  ;;  %v1960_v24 = vsel %vm17_vm0, %v1866_v53, 0.0 }
 0x173   :  { %v1955_v18 = vadd.f32 %v1954_v21, %v1953_v62  ;;  %v1868_v62 = vmul.f32 %v4169_v31, %v4169_v31  ;;  %v1962_v34 = vsel %vm17_vm0, %v1867_v25, 0.0 }
 0x175   :  { %v1957_v15 = vadd.f32 %v1956_v61, %v1955_v18  ;;  %v1869_v18 = vmul.f32 %v4176_v20, %v4176_v20  ;;  %v1964_v53 = vsel %vm17_vm0, %v1868_v62, 0.0 }
 0x177   :  { %v1959_v9 = vadd.f32 %v1958_v1, %v1957_v15  ;;  %v1870_v15 = vmul.f32 %v4183_v12, %v4183_v12  ;;  %v1966_v25 = vsel %vm17_vm0, %v1869_v18, 0.0 }
 0x179   :  { %v1961_v21 = vadd.f32 %v1960_v24, %v1959_v9  ;;  %v1871_v9 = vmul.f32 %v4190_v33, %v4190_v33  ;;  %v1968_v62 = vsel %vm17_vm0, %v1870_v15, 0.0 }
 0x17b   :  { %v1963_v61 = vadd.f32 %v1962_v34, %v1961_v21  ;;  %v1872_v21 = vmul.f32 %v4197_v17, %v4197_v17  ;;  %v1970_v18 = vsel %vm17_vm0, %v1871_v9, 0.0  ;;  %v1874_v17 = vmul.f32 %v4211_v45, %v4211_v45 }
 0x17d   :  { %v1965_v1 = vadd.f32 %v1964_v53, %v1963_v61  ;;  %v5260_v61 = vld [vmem:[#allocation39_spill] sm:$0xff]  ;;  %v1873_v53 = vmul.f32 %v4204_v35, %v4204_v35  ;;  %v1972_v15 = vsel %vm17_vm0, %v1872_v21, 0.0  ;;  %v1976_v21 = vsel %vm17_vm0, %v1874_v17, 0.0 }
 0x17e   :  { %v4218_v22 = vsub.f32 %v5260_v61, %v3942_v13 }
 0x17f   :  { %v1967_v24 = vadd.f32 %v1966_v25, %v1965_v1  ;;  %v5262_v25 = vld [vmem:[#allocation12_spill] sm:$0xff]  ;;  %v1974_v9 = vsel %vm17_vm0, %v1873_v53, 0.0 }
 0x180   :  { %5261 = vst [vmem:[#allocation41_spill] sm:$0xff] %v4218_v22  ;;  %v4225_v42 = vsub.f32 %v5262_v25, %v3942_v13  ;;  %v1875_v35 = vmul.f32 %v4218_v22, %v4218_v22 }
 0x181   :  { %v1969_v34 = vadd.f32 %v1968_v62, %v1967_v24  ;;  %v5264_v62 = vld [vmem:[#allocation11_spill] sm:$0xff] }
 0x182   :  { %5263 = vst [vmem:[#allocation45_spill] sm:$0xff] %v4225_v42  ;;  %v4232_v61 = vsub.f32 %v5264_v62, %v3942_v13  ;;  %v1876_v45 = vmul.f32 %v4225_v42, %v4225_v42  ;;  %v1978_v53 = vsel %vm17_vm0, %v1875_v35, 0.0 }
 0x183   :  { %v1971_v1 = vadd.f32 %v1970_v18, %v1969_v34  ;;  %v5266_v18 = vld [vmem:[#allocation32_spill] sm:$0xff] }
 0x184   :  { %5265 = vst [vmem:[#allocation46_spill] sm:$0xff] %v4232_v61  ;;  %v4239_v25 = vsub.f32 %v5266_v18, %v3942_v13  ;;  %v1877_v22 = vmul.f32 %v4232_v61, %v4232_v61  ;;  %v1980_v17 = vsel %vm17_vm0, %v1876_v45, 0.0 }
 0x185   :  { %v1973_v24 = vadd.f32 %v1972_v15, %v1971_v1  ;;  %v5268_v15 = vld [vmem:[#allocation16_spill] sm:$0xff] }
 0x186   :  { %5267 = vst [vmem:[#allocation50_spill] sm:$0xff] %v4239_v25  ;;  %v4246_v62 = vsub.f32 %v5268_v15, %v3942_v13  ;;  %v1878_v42 = vmul.f32 %v4239_v25, %v4239_v25  ;;  %v1982_v35 = vsel %vm17_vm0, %v1877_v22, 0.0 }
 0x187   :  { %v1975_v34 = vadd.f32 %v1974_v9, %v1973_v24  ;;  %v5270_v9 = vld [vmem:[#allocation15_spill] sm:$0xff] }
 0x188   :  { %5269 = vst [vmem:[#allocation3_spill] sm:$0xff] %v4246_v62  ;;  %v4253_v18 = vsub.f32 %v5270_v9, %v3942_v13  ;;  %v1879_v61 = vmul.f32 %v4246_v62, %v4246_v62  ;;  %v1984_v45 = vsel %vm17_vm0, %v1878_v42, 0.0 }
 0x189   :  { %v1977_v1 = vadd.f32 %v1976_v21, %v1975_v34  ;;  %v5272_v21 = vld [vmem:[#allocation19_spill] sm:$0xff] }
 0x18a   :  { %5271 = vst [vmem:[#allocation5_spill] sm:$0xff] %v4253_v18  ;;  %v4260_v15 = vsub.f32 %v5272_v21, %v3942_v13  ;;  %v1880_v25 = vmul.f32 %v4253_v18, %v4253_v18  ;;  %v1986_v22 = vsel %vm17_vm0, %v1879_v61, 0.0 }
 0x18b   :  { %v1979_v24 = vadd.f32 %v1978_v53, %v1977_v1  ;;  %v5274_v53 = vld [vmem:[#allocation21_spill] sm:$0xff] }
 0x18c   :  { %5273 = vst [vmem:[#allocation4_spill] sm:$0xff] %v4260_v15  ;;  %v4267_v9 = vsub.f32 %v5274_v53, %v3942_v13  ;;  %v1881_v62 = vmul.f32 %v4260_v15, %v4260_v15  ;;  %v1988_v42 = vsel %vm17_vm0, %v1880_v25, 0.0 }
 0x18d   :  { %v1981_v34 = vadd.f32 %v1980_v17, %v1979_v24  ;;  %v5276_v17 = vld [vmem:[#allocation23_spill] sm:$0xff] }
 0x18e   :  { %5275 = vst [vmem:[#allocation6_spill] sm:$0xff] %v4267_v9  ;;  %v4274_v21 = vsub.f32 %v5276_v17, %v3942_v13  ;;  %v1882_v18 = vmul.f32 %v4267_v9, %v4267_v9  ;;  %v1990_v61 = vsel %vm17_vm0, %v1881_v62, 0.0 }
 0x18f   :  { %v1983_v1 = vadd.f32 %v1982_v35, %v1981_v34  ;;  %v5278_v35 = vld [vmem:[#allocation25_spill] sm:$0xff] }
 0x190   :  { %5277 = vst [vmem:[#allocation7_spill] sm:$0xff] %v4274_v21  ;;  %v4281_v53 = vsub.f32 %v5278_v35, %v3942_v13  ;;  %v1883_v15 = vmul.f32 %v4274_v21, %v4274_v21  ;;  %v1992_v25 = vsel %vm17_vm0, %v1882_v18, 0.0 }
 0x191   :  { %v1985_v24 = vadd.f32 %v1984_v45, %v1983_v1  ;;  %v5280_v45 = vld [vmem:[#allocation27_spill] sm:$0xff] }
 0x192   :  { %5279 = vst [vmem:[#allocation8_spill] sm:$0xff] %v4281_v53  ;;  %v4288_v17 = vsub.f32 %v5280_v45, %v3942_v13  ;;  %v1884_v9 = vmul.f32 %v4281_v53, %v4281_v53  ;;  %v1994_v62 = vsel %vm17_vm0, %v1883_v15, 0.0 }
 0x193   :  { %v1987_v34 = vadd.f32 %v1986_v22, %v1985_v24  ;;  %v5281_v22 = vld [vmem:[#allocation29_spill] sm:$0xff] }
 0x194   :  { %v4295_v35 = vsub.f32 %v5281_v22, %v3942_v13  ;;  %v1885_v21 = vmul.f32 %v4288_v17, %v4288_v17  ;;  %v1996_v18 = vsel %vm17_vm0, %v1884_v9, 0.0 }
 0x195   :  { %v1989_v1 = vadd.f32 %v1988_v42, %v1987_v34  ;;  %v5282_v42 = vld [vmem:[#allocation31_spill] sm:$0xff] }
 0x196   :  { %v4302_v45 = vsub.f32 %v5282_v42, %v3942_v13  ;;  %v1886_v53 = vmul.f32 %v4295_v35, %v4295_v35  ;;  %v1998_v15 = vsel %vm17_vm0, %v1885_v21, 0.0 }
 0x197   :  { %v1991_v24 = vadd.f32 %v1990_v61, %v1989_v1  ;;  %v5283_v61 = vld [vmem:[#allocation34_spill] sm:$0xff] }
 0x198   :  { %v4309_v22 = vsub.f32 %v5283_v61, %v3942_v13  ;;  %v1887_v42 = vmul.f32 %v4302_v45, %v4302_v45  ;;  %v2000_v9 = vsel %vm17_vm0, %v1886_v53, 0.0 }
 0x199   :  { %v1993_v34 = vadd.f32 %v1992_v25, %v1991_v24  ;;  %v4316_v25 = vsub.f32 %v3884_v23, %v3942_v13  ;;  %v4330_v23 = vsub.f32 %v3893_v7, %v3942_v13  ;;  %v4344_v7 = vsub.f32 %v3905_v60, %v3942_v13 }
 0x19a   :  { %v1888_v61 = vmul.f32 %v4309_v22, %v4309_v22  ;;  %v2002_v21 = vsel %vm17_vm0, %v1887_v42, 0.0  ;;  %v4358_v60 = vsub.f32 %v3920_v41, %v3942_v13  ;;  %v4372_v41 = vsub.f32 %v3933_v19, %v3942_v13 }
 0x19b   :  { %v1995_v1 = vadd.f32 %v1994_v62, %v1993_v34  ;;  %v4323_v62 = vsub.f32 %v3879_v2, %v3942_v13  ;;  %v4337_v2 = vsub.f32 %v3898_v30, %v3942_v13  ;;  %5285 = vst [vmem:[#allocation10_spill] sm:$0xff] %v4344_v7  ;;  %v4351_v30 = vsub.f32 %v3910_v52, %v3942_v13 }
 0x19c   :  { %v2004_v53 = vsel %vm17_vm0, %v1888_v61, 0.0  ;;  %5287 = vst [vmem:[#allocation14_spill] sm:$0xff] %v4358_v60  ;;  %v4365_v52 = vsub.f32 %v3925_v32, %v3942_v13  ;;  %5289 = vst [vmem:[#allocation18_spill] sm:$0xff] %v4372_v41  ;;  %v4379_v32 = vsub.f32 %v3936_v16, %v3942_v13  ;;  %v1897_v19 = vmul.f32 %v4372_v41, %v4372_v41 }
 0x19d   :  { %v1997_v24 = vadd.f32 %v1996_v18, %v1995_v1  ;;  %v1889_v18 = vmul.f32 %v4316_v25, %v4316_v25  ;;  %5284 = vst [vmem:[#allocation9_spill] sm:$0xff] %v4337_v2  ;;  %5286 = vst [vmem:[#allocation13_spill] sm:$0xff] %v4351_v30 }
 0x19e   :  { %5288 = vst [vmem:[#allocation17_spill] sm:$0xff] %v4365_v52  ;;  %5290 = vst [vmem:[#allocation20_spill] sm:$0xff] %v4379_v32  ;;  %v2022_v16 = vsel %vm17_vm0, %v1897_v19, 0.0 }
 0x19f   :  { %v1999_v34 = vadd.f32 %v1998_v15, %v1997_v24  ;;  %v1890_v15 = vmul.f32 %v4323_v62, %v4323_v62  ;;  %v2006_v42 = vsel %vm17_vm0, %v1889_v18, 0.0 }
 0x1a1   :  { %v2001_v1 = vadd.f32 %v2000_v9, %v1999_v34  ;;  %v1891_v9 = vmul.f32 %v4330_v23, %v4330_v23  ;;  %v2008_v61 = vsel %vm17_vm0, %v1890_v15, 0.0 }
 0x1a3   :  { %v2003_v24 = vadd.f32 %v2002_v21, %v2001_v1  ;;  %v1892_v21 = vmul.f32 %v4337_v2, %v4337_v2  ;;  %v2010_v18 = vsel %vm17_vm0, %v1891_v9, 0.0 }
 0x1a5   :  { %v2005_v34 = vadd.f32 %v2004_v53, %v2003_v24  ;;  %v1893_v53 = vmul.f32 %v4344_v7, %v4344_v7  ;;  %v2012_v15 = vsel %vm17_vm0, %v1892_v21, 0.0 }
 0x1a7   :  { %v2007_v1 = vadd.f32 %v2006_v42, %v2005_v34  ;;  %v1894_v42 = vmul.f32 %v4351_v30, %v4351_v30  ;;  %v2014_v9 = vsel %vm17_vm0, %v1893_v53, 0.0  ;;  %v1898_v53 = vmul.f32 %v4379_v32, %v4379_v32 }
 0x1a9   :  { %v2009_v24 = vadd.f32 %v2008_v61, %v2007_v1  ;;  %v1895_v61 = vmul.f32 %v4358_v60, %v4358_v60  ;;  %v2016_v21 = vsel %vm17_vm0, %v1894_v42, 0.0 }
 0x1ab   :  { %v2011_v34 = vadd.f32 %v2010_v18, %v2009_v24  ;;  %v1896_v18 = vmul.f32 %v4365_v52, %v4365_v52  ;;  %v2024_v52 = vsel %vm17_vm0, %v1898_v53, 0.0 }
 0x1ad   :  { %v2013_v1 = vadd.f32 %v2012_v15, %v2011_v34  ;;  %v2018_v15 = vsel %vm17_vm0, %v1895_v61, 0.0 }
 0x1af   :  { %v2015_v24 = vadd.f32 %v2014_v9, %v2013_v1  ;;  %v2020_v1 = vsel %vm17_vm0, %v1896_v18, 0.0 }
 0x1b1   :  { %v2017_v34 = vadd.f32 %v2016_v21, %v2015_v24 }
 0x1b3   :  { %v2019_v30 = vadd.f32 %v2018_v15, %v2017_v34  ;;  %v2037_v15 = vlaneseq }
 0x1b5   :  { %v2021_v9 = vadd.f32 %v2020_v1, %v2019_v30  ;;  %v2038_v32 = vshrl.u32 %v2037_v15, 7  ;;  %v2035_v30 = vld [vmem:[%s5044_s2] sm:$0x1] }
 0x1b6   :  { %v5298_v15 = vld [vmem:[#allocation3_spill] sm:$0xff] }
 0x1b7   :  { %v2023_v13 = vadd.f32 %v2022_v16, %v2021_v9  ;;  %v2039_v18 = vsub.s32 0, %v2038_v32  ;;  %v5291_v32 = vld [vmem:[#allocation38_spill] sm:$0xff]  ;;  %v5292_v9 = vld [vmem:[#allocation36_spill] sm:$0xff]  ;;  %v5293_v16 = vld [vmem:[#allocation43_spill] sm:$0xff] }
 0x1b9   :  { %v2025_v60 = vadd.f32 %v2024_v52, %v2023_v13  ;;  %v5294_v13 = vld [vmem:[#allocation41_spill] sm:$0xff] }
 0x1bb   :  { %v2026_v42 = vrot.slane %v2025_v60, 4 }
 0x1bd   :  { %v2027_v24 = vadd.f32 %v2026_v42, %v2025_v60  ;;  %v5295_v42 = vld [vmem:[#allocation45_spill] sm:$0xff] }
 0x1bf   :  { %v2028_v21 = vrot.slane %v2027_v24, 2 }
 0x1c1   :  { %v2029_v7 = vadd.f32 %v2028_v21, %v2027_v24  ;;  %v5296_v24 = vld [vmem:[#allocation46_spill] sm:$0xff] }
 0x1c3   :  { %v2030_v41 = vrot.slane %v2029_v7, 1 }
 0x1c5   :  { %v2031_v2 = vadd.f32 %v2030_v41, %v2029_v7 }
 0x1c7   :  { %v2032_v61 = vmul.f32 0.001953125, %v2031_v2 }
 0x1c9   :  { %v2033_v34 = vadd.f32 1e-05, %v2032_v61  ;;  %v5297_v61 = vld [vmem:[#allocation50_spill] sm:$0xff] }
 0x1cb   :  { %2249 = vrsqrt.f32 %v2033_v34 }
 0x1d8   :  { %v2250_v19 = vpop.eup %2249 }
 0x1d9   :  { %v2036_v1 = vmul.f32 %v2250_v19, %v2035_v30 }
 0x1db   :  { %v4395_v53 = vrot.slane %v2036_v1, %v2039_v18  ;;  %v5299_v18 = vld [vmem:[#allocation5_spill] sm:$0xff]  ;;  %v5300_v1 = vld [vmem:[#allocation4_spill] sm:$0xff] }
 0x1dd   :  { %v4399_v60 = vmul.f32 %v4395_v53, %v3946_v49  ;;  %v4403_v2 = vmul.f32 %v4395_v53, %v3950_v5  ;;  %v4407_v7 = vmul.f32 %v4395_v53, %v3954_v58  ;;  %v4411_v52 = vmul.f32 %v4395_v53, %v3958_v54 }
 0x1de   :  { %v4415_v41 = vmul.f32 %v4395_v53, %v3966_v44  ;;  %v4419_v49 = vmul.f32 %v4395_v53, %v3972_v6  ;;  %v4423_v5 = vmul.f32 %v4395_v53, %v3980_v4  ;;  %v4427_v58 = vmul.f32 %v4395_v53, %v3987_v28 }
 0x1df   :  { %v4431_v54 = vmul.f32 %v4395_v53, %v3994_v11  ;;  %v4435_v44 = vmul.f32 %v4395_v53, %v4001_v57  ;;  %v4439_v6 = vmul.f32 %v4395_v53, %v4008_v26  ;;  %v4443_v4 = vmul.f32 %v4395_v53, %v4015_v48 }
 0x1e0   :  { %v4447_v28 = vmul.f32 %v4395_v53, %v4022_v29  ;;  %v4451_v11 = vmul.f32 %v4395_v53, %v4029_v14  ;;  %v4455_v57 = vmul.f32 %v4395_v53, %v4036_v50  ;;  %v4459_v26 = vmul.f32 %v4395_v53, %v4043_v36 }
 0x1e1   :  { %v4463_v48 = vmul.f32 %v4395_v53, %v4050_v46  ;;  %v4467_v29 = vmul.f32 %v4395_v53, %v4057_v3  ;;  %v4471_v14 = vmul.f32 %v4395_v53, %v4064_v43  ;;  %v4475_v50 = vmul.f32 %v4395_v53, %v4071_v8 }
 0x1e2   :  { %v4479_v36 = vmul.f32 %v4395_v53, %v4078_v56  ;;  %v4483_v46 = vmul.f32 %v4395_v53, %v4085_v0  ;;  %v4487_v3 = vmul.f32 %v4395_v53, %v4092_v10  ;;  %v4491_v43 = vmul.f32 %v4395_v53, %v4099_v40 }
 0x1e3   :  { %v4495_v8 = vmul.f32 %v4395_v53, %v4106_v51  ;;  %v4499_v56 = vmul.f32 %v4395_v53, %v4113_v27  ;;  %v4503_v0 = vmul.f32 %v4395_v53, %v4120_v38  ;;  %v4507_v10 = vmul.f32 %v4395_v53, %v4127_v63 }
 0x1e4   :  { %v4511_v40 = vmul.f32 %v4395_v53, %v4134_v59  ;;  %v4515_v51 = vmul.f32 %v4395_v53, %v4141_v39  ;;  %v4519_v27 = vmul.f32 %v4395_v53, %v4148_v37  ;;  %v4523_v38 = vmul.f32 %v4395_v53, %v4155_v55 }
 0x1e5   :  { %v4527_v63 = vmul.f32 %v4395_v53, %v4162_v47  ;;  %v4531_v59 = vmul.f32 %v4395_v53, %v4169_v31  ;;  %v4535_v39 = vmul.f32 %v4395_v53, %v4176_v20  ;;  %v4539_v37 = vmul.f32 %v4395_v53, %v4183_v12 }
 0x1e6   :  { %v4543_v55 = vmul.f32 %v4395_v53, %v4190_v33  ;;  %v4547_v47 = vmul.f32 %v4395_v53, %v5291_v32  ;;  %v4551_v31 = vmul.f32 %v4395_v53, %v5292_v9  ;;  %v4555_v20 = vmul.f32 %v4395_v53, %v5293_v16  ;;  %v5301_v9 = vld [vmem:[#allocation6_spill] sm:$0xff] }
 0x1e7   :  { %v4559_v12 = vmul.f32 %v4395_v53, %v5294_v13  ;;  %v4563_v33 = vmul.f32 %v4395_v53, %v5295_v42  ;;  %v4567_v21 = vmul.f32 %v4395_v53, %v5296_v24  ;;  %v4571_v34 = vmul.f32 %v4395_v53, %v5297_v61  ;;  %v5302_v13 = vld [vmem:[#allocation7_spill] sm:$0xff]  ;;  %v5303_v24 = vld [vmem:[#allocation8_spill] sm:$0xff] }
 0x1e8   :  { %v4575_v30 = vmul.f32 %v4395_v53, %v5298_v15  ;;  %v4579_v19 = vmul.f32 %v4395_v53, %v5299_v18  ;;  %v4583_v32 = vmul.f32 %v4395_v53, %v5300_v1  ;;  %v4587_v16 = vmul.f32 %v4395_v53, %v5301_v9  ;;  %v4608_v1 = vld [vmem:[%s5045_s3] ss:$0 sm:$0xff] }
 0x1e9   :  { %v4591_v42 = vmul.f32 %v4395_v53, %v5302_v13  ;;  %v4595_v61 = vmul.f32 %v4395_v53, %v5303_v24  ;;  %v4599_v15 = vmul.f32 %v4395_v53, %v4288_v17  ;;  %v4603_v18 = vmul.f32 %v4395_v53, %v4295_v35 }
 0x1ea   :  { %v4612_v9 = vmul.f32 %v4395_v53, %v4302_v45  ;;  %v4616_v13 = vmul.f32 %v4395_v53, %v4309_v22  ;;  %v4620_v17 = vmul.f32 %v4395_v53, %v4316_v25  ;;  %v4624_v35 = vmul.f32 %v4395_v53, %v4323_v62 }
 0x1eb   :  { %5304 = vst [vmem:[#allocation22_spill] sm:$0xff] %v4603_v18  ;;  %v4628_v24 = vmul.f32 %v4395_v53, %v4330_v23  ;;  %v5310_v18 = vld [vmem:[#allocation9_spill] sm:$0xff] }
 0x1ec   :  { %5305 = vst [vmem:[#allocation24_spill] sm:$0xff] %v4612_v9  ;;  %5306 = vst [vmem:[#allocation26_spill] sm:$0xff] %v4616_v13  ;;  %v4632_v45 = vmul.f32 %v4395_v53, %v5310_v18  ;;  %v5312_v9 = vld [vmem:[#allocation10_spill] sm:$0xff]  ;;  %v5313_v13 = vld [vmem:[#allocation13_spill] sm:$0xff] }
 0x1ed   :  { %5307 = vst [vmem:[#allocation28_spill] sm:$0xff] %v4620_v17  ;;  %5308 = vst [vmem:[#allocation30_spill] sm:$0xff] %v4624_v35  ;;  %v4636_v22 = vmul.f32 %v4395_v53, %v5312_v9  ;;  %v4640_v25 = vmul.f32 %v4395_v53, %v5313_v13  ;;  %v5315_v17 = vld [vmem:[#allocation14_spill] sm:$0xff]  ;;  %v5316_v35 = vld [vmem:[#allocation17_spill] sm:$0xff]  ;;  %v2112_v13 = vadd.f32 %v4608_v1, %v4399_v60 }
 0x1ee   :  { %5309 = vst [vmem:[#allocation33_spill] sm:$0xff] %v4628_v24  ;;  %5311 = vst [vmem:[#allocation35_spill] sm:$0xff] %v4632_v45  ;;  %v4644_v62 = vmul.f32 %v4395_v53, %v5315_v17  ;;  %v4648_v23 = vmul.f32 %v4395_v53, %v5316_v35  ;;  %v5317_v24 = vld [vmem:[#allocation18_spill] sm:$0xff]  ;;  %v5319_v45 = vld [vmem:[#allocation20_spill] sm:$0xff]  ;;  %v2114_v17 = vadd.f32 %v4608_v1, %v4407_v7 }
 0x1ef   :  { %5314 = vst [vmem:[#allocation37_spill] sm:$0xff] %v4640_v25  ;;  %v4652_v18 = vmul.f32 %v4395_v53, %v5317_v24  ;;  %v4656_v9 = vmul.f32 %v4395_v53, %v5319_v45  ;;  %v2113_v25 = vadd.f32 %v4608_v1, %v4403_v2  ;;  %v2115_v35 = vadd.f32 %v4608_v1, %v4411_v52 }
 0x1f0   :  { %v2116_v24 = vadd.f32 %v4608_v1, %v4415_v41  ;;  %v2118_v53 = vadd.f32 %v4608_v1, %v4423_v5  ;;  %v2119_v60 = vadd.f32 %v4608_v1, %v4427_v58  ;;  %v2120_v2 = vadd.f32 %v4608_v1, %v4431_v54  ;;  %2176 = vst.msk [vmem:[%s5046_s4] sm:$0xff] %vm17_vm0, %v2112_v13 }
 0x1f1   :  { %5318 = vst [vmem:[#allocation40_spill] sm:$0xff] %v4652_v18  ;;  %v2117_v18 = vadd.f32 %v4608_v1, %v4419_v49  ;;  %v2121_v7 = vadd.f32 %v4608_v1, %v4435_v44  ;;  %v2122_v52 = vadd.f32 %v4608_v1, %v4439_v6  ;;  %v2123_v41 = vadd.f32 %v4608_v1, %v4443_v4 }
 0x1f2   :  { %2177 = vst.msk [vmem:[%s5046_s4 + $0x8] sm:$0xff] %vm17_vm0, %v2113_v25  ;;  %2178 = vst.msk [vmem:[%s5046_s4 + $0x10] sm:$0xff] %vm17_vm0, %v2114_v17  ;;  %v2124_v49 = vadd.f32 %v4608_v1, %v4447_v28  ;;  %v2125_v5 = vadd.f32 %v4608_v1, %v4451_v11  ;;  %v2126_v58 = vadd.f32 %v4608_v1, %v4455_v57 }
 0x1f3   :  { %2179 = vst.msk [vmem:[%s5046_s4 + $0x18] sm:$0xff] %vm17_vm0, %v2115_v35  ;;  %v2127_v54 = vadd.f32 %v4608_v1, %v4459_v26  ;;  %2180 = vst.msk [vmem:[%s5046_s4 + $0x20] sm:$0xff] %vm17_vm0, %v2116_v24  ;;  %v2128_v44 = vadd.f32 %v4608_v1, %v4463_v48  ;;  %v2129_v6 = vadd.f32 %v4608_v1, %v4467_v29 }
 0x1f4   :  { %2181 = vst.msk [vmem:[%s5046_s4 + $0x28] sm:$0xff] %vm17_vm0, %v2117_v18  ;;  %2182 = vst.msk [vmem:[%s5046_s4 + $0x30] sm:$0xff] %vm17_vm0, %v2118_v53  ;;  %v2130_v4 = vadd.f32 %v4608_v1, %v4471_v14  ;;  %v2131_v28 = vadd.f32 %v4608_v1, %v4475_v50  ;;  %v2132_v11 = vadd.f32 %v4608_v1, %v4479_v36  ;;  %v5324_v25 = vld [vmem:[#allocation30_spill] sm:$0xff] }
 0x1f5   :  { %2183 = vst.msk [vmem:[%s5046_s4 + $0x38] sm:$0xff] %vm17_vm0, %v2119_v60  ;;  %2184 = vst.msk [vmem:[%s5046_s4 + $0x40] sm:$0xff] %vm17_vm0, %v2120_v2  ;;  %v2133_v57 = vadd.f32 %v4608_v1, %v4483_v46  ;;  %v2134_v26 = vadd.f32 %v4608_v1, %v4487_v3  ;;  %v2135_v48 = vadd.f32 %v4608_v1, %v4491_v43  ;;  %v5325_v13 = vld [vmem:[#allocation33_spill] sm:$0xff]  ;;  %v5326_v35 = vld [vmem:[#allocation35_spill] sm:$0xff] }
 0x1f6   :  { %2185 = vst.msk [vmem:[%s5046_s4 + $0x48] sm:$0xff] %vm17_vm0, %v2121_v7  ;;  %2186 = vst.msk [vmem:[%s5046_s4 + $0x50] sm:$0xff] %vm17_vm0, %v2122_v52  ;;  %v2136_v29 = vadd.f32 %v4608_v1, %v4495_v8  ;;  %v2137_v14 = vadd.f32 %v4608_v1, %v4499_v56  ;;  %v2138_v50 = vadd.f32 %v4608_v1, %v4503_v0  ;;  %v5327_v60 = vld [vmem:[#allocation37_spill] sm:$0xff] }
 0x1f7   :  { %2187 = vst.msk [vmem:[%s5046_s4 + $0x58] sm:$0xff] %vm17_vm0, %v2123_v41  ;;  %2188 = vst.msk [vmem:[%s5046_s4 + $0x60] sm:$0xff] %vm17_vm0, %v2124_v49  ;;  %v2139_v36 = vadd.f32 %v4608_v1, %v4507_v10  ;;  %v2140_v46 = vadd.f32 %v4608_v1, %v4511_v40  ;;  %v2141_v3 = vadd.f32 %v4608_v1, %v4515_v51 }
 0x1f8   :  { %2189 = vst.msk [vmem:[%s5046_s4 + $0x68] sm:$0xff] %vm17_vm0, %v2125_v5  ;;  %2190 = vst.msk [vmem:[%s5046_s4 + $0x70] sm:$0xff] %vm17_vm0, %v2126_v58  ;;  %v2142_v43 = vadd.f32 %v4608_v1, %v4519_v27  ;;  %v2143_v8 = vadd.f32 %v4608_v1, %v4523_v38  ;;  %v2144_v56 = vadd.f32 %v4608_v1, %v4527_v63  ;;  %v5328_v52 = vld [vmem:[#allocation40_spill] sm:$0xff] }
 0x1f9   :  { %2191 = vst.msk [vmem:[%s5046_s4 + $0x78] sm:$0xff] %vm17_vm0, %v2127_v54  ;;  %2192 = vst.msk [vmem:[%s5046_s4 + $0x80] sm:$0xff] %vm17_vm0, %v2128_v44  ;;  %v2145_v0 = vadd.f32 %v4608_v1, %v4531_v59  ;;  %v2146_v10 = vadd.f32 %v4608_v1, %v4535_v39  ;;  %v2147_v40 = vadd.f32 %v4608_v1, %v4539_v37 }
 0x1fa   :  { %2193 = vst.msk [vmem:[%s5046_s4 + $0x88] sm:$0xff] %vm17_vm0, %v2129_v6  ;;  %2194 = vst.msk [vmem:[%s5046_s4 + $0x90] sm:$0xff] %vm17_vm0, %v2130_v4  ;;  %v2148_v51 = vadd.f32 %v4608_v1, %v4543_v55  ;;  %v2149_v27 = vadd.f32 %v4608_v1, %v4547_v47  ;;  %v2150_v38 = vadd.f32 %v4608_v1, %v4551_v31 }
 0x1fb   :  { %2195 = vst.msk [vmem:[%s5046_s4 + $0x98] sm:$0xff] %vm17_vm0, %v2131_v28  ;;  %2196 = vst.msk [vmem:[%s5046_s4 + $0xa0] sm:$0xff] %vm17_vm0, %v2132_v11  ;;  %v2151_v63 = vadd.f32 %v4608_v1, %v4555_v20  ;;  %v2152_v59 = vadd.f32 %v4608_v1, %v4559_v12  ;;  %v2153_v39 = vadd.f32 %v4608_v1, %v4563_v33 }
 0x1fc   :  { %2197 = vst.msk [vmem:[%s5046_s4 + $0xa8] sm:$0xff] %vm17_vm0, %v2133_v57  ;;  %2198 = vst.msk [vmem:[%s5046_s4 + $0xb0] sm:$0xff] %vm17_vm0, %v2134_v26  ;;  %v2154_v37 = vadd.f32 %v4608_v1, %v4567_v21  ;;  %v2155_v55 = vadd.f32 %v4608_v1, %v4571_v34  ;;  %v2156_v47 = vadd.f32 %v4608_v1, %v4575_v30  ;;  %v5320_v30 = vld [vmem:[#allocation22_spill] sm:$0xff] }
 0x1fd   :  { %2199 = vst.msk [vmem:[%s5046_s4 + $0xb8] sm:$0xff] %vm17_vm0, %v2135_v48  ;;  %2200 = vst.msk [vmem:[%s5046_s4 + $0xc0] sm:$0xff] %vm17_vm0, %v2136_v29  ;;  %v2157_v31 = vadd.f32 %v4608_v1, %v4579_v19  ;;  %v2158_v20 = vadd.f32 %v4608_v1, %v4583_v32  ;;  %v2159_v12 = vadd.f32 %v4608_v1, %v4587_v16  ;;  %v5321_v32 = vld [vmem:[#allocation24_spill] sm:$0xff] }
 0x1fe   :  { %2201 = vst.msk [vmem:[%s5046_s4 + $0xc8] sm:$0xff] %vm17_vm0, %v2137_v14  ;;  %2202 = vst.msk [vmem:[%s5046_s4 + $0xd0] sm:$0xff] %vm17_vm0, %v2138_v50  ;;  %v2160_v33 = vadd.f32 %v4608_v1, %v4591_v42  ;;  %v2161_v21 = vadd.f32 %v4608_v1, %v4595_v61  ;;  %v2162_v34 = vadd.f32 %v4608_v1, %v4599_v15  ;;  %v5322_v42 = vld [vmem:[#allocation26_spill] sm:$0xff]  ;;  %v5323_v15 = vld [vmem:[#allocation28_spill] sm:$0xff] }
 0x1ff   :  { %2203 = vst.msk [vmem:[%s5046_s4 + $0xd8] sm:$0xff] %vm17_vm0, %v2139_v36  ;;  %2204 = vst.msk [vmem:[%s5046_s4 + $0xe0] sm:$0xff] %vm17_vm0, %v2140_v46  ;;  %v2163_v19 = vadd.f32 %v4608_v1, %v5320_v30  ;;  %v2164_v16 = vadd.f32 %v4608_v1, %v5321_v32  ;;  %v2165_v61 = vadd.f32 %v4608_v1, %v5322_v42 }
 0x200   :  { %2205 = vst.msk [vmem:[%s5046_s4 + $0xe8] sm:$0xff] %vm17_vm0, %v2141_v3  ;;  %2206 = vst.msk [vmem:[%s5046_s4 + $0xf0] sm:$0xff] %vm17_vm0, %v2142_v43  ;;  %v2166_v45 = vadd.f32 %v4608_v1, %v5323_v15  ;;  %v2167_v18 = vadd.f32 %v4608_v1, %v5324_v25  ;;  %v2168_v17 = vadd.f32 %v4608_v1, %v5325_v13 }
 0x201   :  { %2207 = vst.msk [vmem:[%s5046_s4 + $0xf8] sm:$0xff] %vm17_vm0, %v2143_v8  ;;  %2208 = vst.msk [vmem:[%s5046_s4 + $0x100] sm:$0xff] %vm17_vm0, %v2144_v56  ;;  %v2169_v24 = vadd.f32 %v4608_v1, %v5326_v35  ;;  %v2170_v53 = vadd.f32 %v4608_v1, %v4636_v22  ;;  %v2171_v2 = vadd.f32 %v4608_v1, %v5327_v60 }
 0x202   :  { %2209 = vst.msk [vmem:[%s5046_s4 + $0x108] sm:$0xff] %vm17_vm0, %v2145_v0  ;;  %2210 = vst.msk [vmem:[%s5046_s4 + $0x110] sm:$0xff] %vm17_vm0, %v2146_v10  ;;  %v2172_v22 = vadd.f32 %v4608_v1, %v4644_v62  ;;  %v2173_v7 = vadd.f32 %v4608_v1, %v4648_v23  ;;  %v2174_v41 = vadd.f32 %v4608_v1, %v5328_v52 }
 0x203   :  { %2211 = vst.msk [vmem:[%s5046_s4 + $0x118] sm:$0xff] %vm17_vm0, %v2147_v40  ;;  %2212 = vst.msk [vmem:[%s5046_s4 + $0x120] sm:$0xff] %vm17_vm0, %v2148_v51  ;;  %v2175_v49 = vadd.f32 %v4608_v1, %v4656_v9 }
 0x204   :  { %2213 = vst.msk [vmem:[%s5046_s4 + $0x128] sm:$0xff] %vm17_vm0, %v2149_v27  ;;  %2214 = vst.msk [vmem:[%s5046_s4 + $0x130] sm:$0xff] %vm17_vm0, %v2150_v38 }
 0x205   :  { %2215 = vst.msk [vmem:[%s5046_s4 + $0x138] sm:$0xff] %vm17_vm0, %v2151_v63  ;;  %2216 = vst.msk [vmem:[%s5046_s4 + $0x140] sm:$0xff] %vm17_vm0, %v2152_v59 }
 0x206   :  { %2217 = vst.msk [vmem:[%s5046_s4 + $0x148] sm:$0xff] %vm17_vm0, %v2153_v39  ;;  %2218 = vst.msk [vmem:[%s5046_s4 + $0x150] sm:$0xff] %vm17_vm0, %v2154_v37 }
 0x207   :  { %2219 = vst.msk [vmem:[%s5046_s4 + $0x158] sm:$0xff] %vm17_vm0, %v2155_v55  ;;  %2220 = vst.msk [vmem:[%s5046_s4 + $0x160] sm:$0xff] %vm17_vm0, %v2156_v47 }
 0x208   :  { %2221 = vst.msk [vmem:[%s5046_s4 + $0x168] sm:$0xff] %vm17_vm0, %v2157_v31  ;;  %2222 = vst.msk [vmem:[%s5046_s4 + $0x170] sm:$0xff] %vm17_vm0, %v2158_v20 }
 0x209   :  { %2223 = vst.msk [vmem:[%s5046_s4 + $0x178] sm:$0xff] %vm17_vm0, %v2159_v12  ;;  %2224 = vst.msk [vmem:[%s5046_s4 + $0x180] sm:$0xff] %vm17_vm0, %v2160_v33 }
 0x20a   :  { %2225 = vst.msk [vmem:[%s5046_s4 + $0x188] sm:$0xff] %vm17_vm0, %v2161_v21  ;;  %2226 = vst.msk [vmem:[%s5046_s4 + $0x190] sm:$0xff] %vm17_vm0, %v2162_v34 }
 0x20b   :  { %2227 = vst.msk [vmem:[%s5046_s4 + $0x198] sm:$0xff] %vm17_vm0, %v2163_v19  ;;  %2228 = vst.msk [vmem:[%s5046_s4 + $0x1a0] sm:$0xff] %vm17_vm0, %v2164_v16 }
 0x20c   :  { %2229 = vst.msk [vmem:[%s5046_s4 + $0x1a8] sm:$0xff] %vm17_vm0, %v2165_v61  ;;  %2230 = vst.msk [vmem:[%s5046_s4 + $0x1b0] sm:$0xff] %vm17_vm0, %v2166_v45 }
 0x20d   :  { %2231 = vst.msk [vmem:[%s5046_s4 + $0x1b8] sm:$0xff] %vm17_vm0, %v2167_v18  ;;  %2232 = vst.msk [vmem:[%s5046_s4 + $0x1c0] sm:$0xff] %vm17_vm0, %v2168_v17 }
 0x20e   :  { %2233 = vst.msk [vmem:[%s5046_s4 + $0x1c8] sm:$0xff] %vm17_vm0, %v2169_v24  ;;  %2234 = vst.msk [vmem:[%s5046_s4 + $0x1d0] sm:$0xff] %vm17_vm0, %v2170_v53 }
 0x20f   :  { %2235 = vst.msk [vmem:[%s5046_s4 + $0x1d8] sm:$0xff] %vm17_vm0, %v2171_v2  ;;  %2236 = vst.msk [vmem:[%s5046_s4 + $0x1e0] sm:$0xff] %vm17_vm0, %v2172_v22 }
 0x210   :  { %2237 = vst.msk [vmem:[%s5046_s4 + $0x1e8] sm:$0xff] %vm17_vm0, %v2173_v7  ;;  %2238 = vst.msk [vmem:[%s5046_s4 + $0x1f0] sm:$0xff] %vm17_vm0, %v2174_v41 }
 0x211   :  { %2239 = vst.msk [vmem:[%s5046_s4 + $0x1f8] sm:$0xff] %vm17_vm0, %v2175_v49 }

</bundles_post_ra>
